<compile_context>
chip_gen: v5e
topology: v5e:2x2
jax: 0.10.0
libtpu: 0.0.40
codegen_flags: <defaults>
</compile_context>

<pallas_src>
import jax
import jax.numpy as jnp
from jax import lax
from jax.experimental import pallas as pl
from jax.experimental.pallas import tpu as pltpu


def _elu(x):
    # ELU(alpha=1):  x if x > 0 else exp(x) - 1   (clamp arg of exp for safety)
    return jnp.where(x > 0, x, jnp.exp(jnp.minimum(x, 0.0)) - 1.0)


def _softplus(x):
    # numerically stable softplus
    return jnp.maximum(x, 0.0) + jnp.log(1.0 + jnp.exp(-jnp.abs(x)))


def _convt_block_matrix(wt, hi, wi):
    """ConvTranspose2d(k=3, s=1) as one (P_in*Cin, P_out*Cout) block matrix.

    wt: PyTorch ConvTranspose2d weight (Cin, Cout, kH, kW).
    out[b, q*Cout+co] = sum_{p,ci} in[b, p*Cin+ci] * wt[ci, co, qy-py, qx-px].
    """
    cin, cout, kh, kw = wt.shape
    ho, wo = hi + kh - 1, wi + kw - 1
    blocks = jnp.zeros((hi * wi, ho * wo, cin, cout), wt.dtype)
    for iy in range(hi):
        for ix in range(wi):
            p = iy * wi + ix
            for ky in range(kh):
                for kx in range(kw):
                    q = (iy + ky) * wo + (ix + kx)
                    blocks = blocks.at[p, q].set(wt[:, :, ky, kx])
    return jnp.transpose(blocks, (0, 2, 1, 3)).reshape(hi * wi * cin, ho * wo * cout)


def _make_kernel(n_mu_cols):
    """Whole forward pass on one (bn, .) batch tile: 5 matmuls, no scratch."""

    def kernel(x_ref, w1_ref, b1_ref, wt1_ref, bt1_ref, wt2_ref, bt2_ref,
               wc2_ref, bc2_ref, whd_ref, bhd_ref, out_ref):
        def mm(a, w_ref):
            # bf16 operands on the MXU, f32 accumulation.
            return jnp.dot(a.astype(jnp.bfloat16), w_ref[...],
                           preferred_element_type=jnp.float32)

        x = x_ref[...]                                    # (bn, P1*z)      f32
        h1 = _elu(mm(x, w1_ref) + b1_ref[...])            # 1x1 conv + ELU
        a1 = _elu(mm(h1, wt1_ref) + bt1_ref[...])         # ConvT 3x3 + ELU
        a2 = _elu(mm(a1, wt2_ref) + bt2_ref[...])         # ConvT 3x3 + ELU
        h4 = _elu(mm(a2, wc2_ref) + bc2_ref[...])         # 1x1 conv + ELU
        o = mm(h4, whd_ref) + bhd_ref[...]                # fused mu|var heads

        # softplus only on the var half (lanes >= n_mu_cols); mu passes through.
        lane = lax.broadcasted_iota(jnp.int32, o.shape, 1)
        out_ref[...] = jnp.where(lane < n_mu_cols, o, _softplus(o))

    return kernel


def decoder5x5_forward(x_nchw, params):
    """Pallas forward pass.  x_nchw: (N, z_dim, H, W) float32 (PyTorch layout)."""
    n, z, h_in, w_in = x_nchw.shape
    hd = int(params['hidden_dim'])
    two_h = 2 * hd
    h2, w2 = h_in + 2, w_in + 2
    h3, w3 = h_in + 4, w_in + 4
    p1, p2, p3 = h_in * w_in, h2 * w2, h3 * w3
    f32, bf16 = jnp.float32, jnp.bfloat16

    # ---- wrapper-side weight fusion (block / block-diagonal matrices) -------
    w1 = jnp.transpose(params['w_c1'].reshape(two_h, z))              # (z, 2H)
    w1_big = jnp.kron(jnp.eye(p1, dtype=f32), w1)                     # (P1*z, P1*2H)
    b1_big = jnp.tile(params['b_c1'], p1).reshape(1, p1 * two_h)

    wt1_big = _convt_block_matrix(params['w_t1'], h_in, w_in)         # (P1*2H, P2*2H)
    bt1_big = jnp.tile(params['b_t1'], p2).reshape(1, p2 * two_h)
    wt2_big = _convt_block_matrix(params['w_t2'], h2, w2)             # (P2*2H, P3*2H)
    bt2_big = jnp.tile(params['b_t2'], p3).reshape(1, p3 * two_h)

    wc2 = jnp.transpose(params['w_c2'].reshape(hd, two_h))            # (2H, H)
    wc2_big = jnp.kron(jnp.eye(p3, dtype=f32), wc2)                   # (P3*2H, P3*H)
    bc2_big = jnp.tile(params['b_c2'], p3).reshape(1, p3 * hd)

    wmu = jnp.transpose(params['w_mu'].reshape(1, hd))                # (H, 1)
    wvar = jnp.transpose(params['w_var'].reshape(1, hd))
    whd_big = jnp.concatenate(
        [jnp.kron(jnp.eye(p3, dtype=f32), wmu),
         jnp.kron(jnp.eye(p3, dtype=f32), wvar)], axis=1)             # (P3*H, 2*P3)
    bhd_big = jnp.concatenate(
        [jnp.broadcast_to(params['b_mu'], (p3,)),
         jnp.broadcast_to(params['b_var'], (p3,))]).reshape(1, 2 * p3)

    mats = [m.astype(bf16) for m in (w1_big, wt1_big, wt2_big, wc2_big, whd_big)]

    # ---- activations: dense (N, P*C) slab, batch padded to sublane tile -----
    bn = 8
    n_pad = ((n + bn - 1) // bn) * bn
    x_wide = jnp.transpose(x_nchw, (0, 2, 3, 1)).reshape(n, p1 * z)
    x_wide = jnp.pad(x_wide, ((0, n_pad - n), (0, 0)))

    full = lambda shape: pl.BlockSpec(shape, lambda i: (0, 0))
    out_wide = pl.pallas_call(
        _make_kernel(p3),
        out_shape=jax.ShapeDtypeStruct((n_pad, 2 * p3), f32),
        grid=(n_pad // bn,),
        in_specs=[
            pl.BlockSpec((bn, p1 * z), lambda i: (i, 0)),
            full((p1 * z, p1 * two_h)), full((1, p1 * two_h)),
            full((p1 * two_h, p2 * two_h)), full((1, p2 * two_h)),
            full((p2 * two_h, p3 * two_h)), full((1, p3 * two_h)),
            full((p3 * two_h, p3 * hd)), full((1, p3 * hd)),
            full((p3 * hd, 2 * p3)), full((1, 2 * p3)),
        ],
        out_specs=pl.BlockSpec((bn, 2 * p3), lambda i: (i, 0)),
        compiler_params=pltpu.CompilerParams(
            dimension_semantics=("parallel",)),
    )(x_wide, mats[0], b1_big, mats[1], bt1_big, mats[2], bt2_big,
      mats[3], bc2_big, mats[4], bhd_big)

    out_wide = out_wide[:n]
    mu = out_wide[:, :p3].reshape(n, 1, h3, w3)
    var = out_wide[:, p3:].reshape(n, 1, h3, w3)
    return mu, var


def init_params(key, z_dim, hidden_dim):
    """Deterministic PyTorch-default-like uniform init (no checkpoint loading)."""
    two_h = 2 * hidden_dim
    ks = jax.random.split(key, 12)

    def u(k, shape, fan_in):
        b = 1.0 / float(fan_in) ** 0.5
        return jax.random.uniform(k, shape, jnp.float32, -b, b)

    return {
        'hidden_dim': hidden_dim,
        # nn.Conv2d(z_dim, 2H, 1)           weight (Cout, Cin, 1, 1)
        'w_c1': u(ks[0], (two_h, z_dim, 1, 1), z_dim),
        'b_c1': u(ks[1], (two_h,), z_dim),
        # nn.ConvTranspose2d(2H, 2H, 3)     weight (Cin, Cout, 3, 3)
        'w_t1': u(ks[2], (two_h, two_h, 3, 3), two_h * 9),
        'b_t1': u(ks[3], (two_h,), two_h * 9),
        'w_t2': u(ks[4], (two_h, two_h, 3, 3), two_h * 9),
        'b_t2': u(ks[5], (two_h,), two_h * 9),
        # nn.Conv2d(2H, H, 1)
        'w_c2': u(ks[6], (hidden_dim, two_h, 1, 1), two_h),
        'b_c2': u(ks[7], (hidden_dim,), two_h),
        # fc_mu / fc_var: nn.Conv2d(H, 1, 1)
        'w_mu': u(ks[8], (1, hidden_dim, 1, 1), hidden_dim),
        'b_mu': u(ks[9], (1,), hidden_dim),
        'w_var': u(ks[10], (1, hidden_dim, 1, 1), hidden_dim),
        'b_var': u(ks[11], (1,), hidden_dim),
    }


def ref_forward(x, params):
    """Pure-JAX reference (NCHW) mirroring the PyTorch module (var='train')."""
    def conv1x1(x, w, b):
        y = lax.conv_general_dilated(x, w, (1, 1), 'VALID',
                                     dimension_numbers=('NCHW', 'OIHW', 'NCHW'),
                                     precision=lax.Precision.HIGHEST)
        return y + b.reshape(1, -1, 1, 1)

    def convT3(x, w, b):
        # ConvTranspose2d(k=3, s=1, p=0) == conv with flipped, transposed kernel
        # on input padded by 2.
        k = jnp.transpose(w, (1, 0, 2, 3))[:, :, ::-1, ::-1]
        y = lax.conv_general_dilated(x, k, (1, 1), ((2, 2), (2, 2)),
                                     dimension_numbers=('NCHW', 'OIHW', 'NCHW'),
                                     precision=lax.Precision.HIGHEST)
        return y + b.reshape(1, -1, 1, 1)

    h = jax.nn.elu(conv1x1(x, params['w_c1'], params['b_c1']))
    h = jax.nn.elu(convT3(h, params['w_t1'], params['b_t1']))
    h = jax.nn.elu(convT3(h, params['w_t2'], params['b_t2']))
    h = jax.nn.elu(conv1x1(h, params['w_c2'], params['b_c2']))
    mu = conv1x1(h, params['w_mu'], params['b_mu'])
    var = jax.nn.softplus(conv1x1(h, params['w_var'], params['b_var']))
    return mu, var


if __name__ == "__main__":
    # TODO(synk): the fixed-variance branch (isinstance(self.var, float)) just
    # returns a host-side constant tensor; only the var='train' path is a kernel.
    key = jax.random.PRNGKey(0)
    kp, kx = jax.random.split(key)

    z_dim, hidden_dim = 8, 16
    n, h_in, w_in = 2, 1, 1                 # latent map 1x1 -> output 5x5
    params = init_params(kp, z_dim, hidden_dim)
    x = jax.random.normal(kx, (n, z_dim, h_in, w_in), jnp.float32)

    mu, var = jax.block_until_ready(decoder5x5_forward(x, params))

    # sanity: shapes + agreement with pure-JAX f32 reference (bf16 MXU operands)
    assert mu.shape == (n, 1, h_in + 4, w_in + 4), mu.shape
    assert var.shape == (n, 1, h_in + 4, w_in + 4), var.shape
    mu_r, var_r = ref_forward(x, params)
    assert jnp.allclose(mu, mu_r, rtol=2e-2, atol=5e-3), float(jnp.max(jnp.abs(mu - mu_r)))
    assert jnp.allclose(var, var_r, rtol=2e-2, atol=5e-3), float(jnp.max(jnp.abs(var - var_r)))

    print("KERNEL_OK")
</pallas_src>

<mosaic_0001>
module attributes {stable_mosaic.version = 11 : i64} {
  func.func @kernel(%arg0: i32, %arg1: memref<8x8xf32, #tpu.memory_space<vmem>>, %arg2: memref<8x32xbf16, #tpu.memory_space<vmem>>, %arg3: memref<1x32xf32, #tpu.memory_space<vmem>>, %arg4: memref<32x288xbf16, #tpu.memory_space<vmem>>, %arg5: memref<1x288xf32, #tpu.memory_space<vmem>>, %arg6: memref<288x800xbf16, #tpu.memory_space<vmem>>, %arg7: memref<1x800xf32, #tpu.memory_space<vmem>>, %arg8: memref<800x400xbf16, #tpu.memory_space<vmem>>, %arg9: memref<1x400xf32, #tpu.memory_space<vmem>>, %arg10: memref<400x50xbf16, #tpu.memory_space<vmem>>, %arg11: memref<1x50xf32, #tpu.memory_space<vmem>>, %arg12: memref<8x50xf32, #tpu.memory_space<vmem>>) attributes {dimension_semantics = [#tpu.dimension_semantics<parallel>], iteration_bounds = array<i64: 1>, scalar_prefetch = 0 : i64, scratch_operands = 0 : i64, tpu.core_type = #tpu.core_type<tc>, window_params = [{transform_indices = @transform_0, window_bounds = array<i64: 8, 8>}, {pipeline_mode = #tpu.pipeline_mode<synchronous>, transform_indices = @transform_1, window_bounds = array<i64: 8, 32>}, {pipeline_mode = #tpu.pipeline_mode<synchronous>, transform_indices = @transform_2, window_bounds = array<i64: 1, 32>}, {pipeline_mode = #tpu.pipeline_mode<synchronous>, transform_indices = @transform_3, window_bounds = array<i64: 32, 288>}, {pipeline_mode = #tpu.pipeline_mode<synchronous>, transform_indices = @transform_4, window_bounds = array<i64: 1, 288>}, {pipeline_mode = #tpu.pipeline_mode<synchronous>, transform_indices = @transform_5, window_bounds = array<i64: 288, 800>}, {pipeline_mode = #tpu.pipeline_mode<synchronous>, transform_indices = @transform_6, window_bounds = array<i64: 1, 800>}, {pipeline_mode = #tpu.pipeline_mode<synchronous>, transform_indices = @transform_7, window_bounds = array<i64: 800, 400>}, {pipeline_mode = #tpu.pipeline_mode<synchronous>, transform_indices = @transform_8, window_bounds = array<i64: 1, 400>}, {pipeline_mode = #tpu.pipeline_mode<synchronous>, transform_indices = @transform_9, window_bounds = array<i64: 400, 50>}, {pipeline_mode = #tpu.pipeline_mode<synchronous>, transform_indices = @transform_10, window_bounds = array<i64: 1, 50>}, {transform_indices = @transform_11, window_bounds = array<i64: 8, 50>}]} {
    %c0 = arith.constant 0 : index
    %c0_0 = arith.constant 0 : index
    %0 = vector.load %arg1[%c0, %c0_0] : memref<8x8xf32, #tpu.memory_space<vmem>>, vector<8x8xf32>
    %1 = arith.truncf %0 : vector<8x8xf32> to vector<8x8xbf16>
    %c0_1 = arith.constant 0 : index
    %c0_2 = arith.constant 0 : index
    %2 = vector.load %arg2[%c0_1, %c0_2] : memref<8x32xbf16, #tpu.memory_space<vmem>>, vector<8x32xbf16>
    %cst = arith.constant dense<0.000000e+00> : vector<8x32xf32>
    %3 = tpu.matmul %1, %2, %cst {dimension_numbers = #tpu.dot_dimension_numbers<[1], [0], [0], [1], [0, 0, 1, 1], [], []>} : vector<8x8xbf16>, vector<8x32xbf16>, vector<8x32xf32> -> vector<8x32xf32>
    %c0_3 = arith.constant 0 : index
    %c0_4 = arith.constant 0 : index
    %4 = vector.load %arg3[%c0_3, %c0_4] : memref<1x32xf32, #tpu.memory_space<vmem>>, vector<1x32xf32>
    %5 = vector.broadcast %4 : vector<1x32xf32> to vector<8x32xf32>
    %6 = arith.addf %3, %5 : vector<8x32xf32>
    %cst_5 = arith.constant 0.000000e+00 : f32
    %7 = vector.broadcast %cst_5 : f32 to vector<8x32xf32>
    %8 = arith.cmpf ogt, %6, %7 : vector<8x32xf32>
    %cst_6 = arith.constant 0.000000e+00 : f32
    %9 = vector.broadcast %cst_6 : f32 to vector<8x32xf32>
    %10 = arith.minimumf %6, %9 : vector<8x32xf32>
    %11 = math.exp %10 : vector<8x32xf32>
    %cst_7 = arith.constant 1.000000e+00 : f32
    %12 = vector.broadcast %cst_7 : f32 to vector<8x32xf32>
    %13 = arith.subf %11, %12 : vector<8x32xf32>
    %14 = arith.select %8, %6, %13 : vector<8x32xi1>, vector<8x32xf32>
    %15 = arith.truncf %14 : vector<8x32xf32> to vector<8x32xbf16>
    %c0_8 = arith.constant 0 : index
    %c0_9 = arith.constant 0 : index
    %16 = vector.load %arg4[%c0_8, %c0_9] : memref<32x288xbf16, #tpu.memory_space<vmem>>, vector<32x288xbf16>
    %cst_10 = arith.constant dense<0.000000e+00> : vector<8x288xf32>
    %17 = tpu.matmul %15, %16, %cst_10 {dimension_numbers = #tpu.dot_dimension_numbers<[1], [0], [0], [1], [0, 0, 1, 1], [], []>} : vector<8x32xbf16>, vector<32x288xbf16>, vector<8x288xf32> -> vector<8x288xf32>
    %c0_11 = arith.constant 0 : index
    %c0_12 = arith.constant 0 : index
    %18 = vector.load %arg5[%c0_11, %c0_12] : memref<1x288xf32, #tpu.memory_space<vmem>>, vector<1x288xf32>
    %19 = vector.broadcast %18 : vector<1x288xf32> to vector<8x288xf32>
    %20 = arith.addf %17, %19 : vector<8x288xf32>
    %cst_13 = arith.constant 0.000000e+00 : f32
    %21 = vector.broadcast %cst_13 : f32 to vector<8x288xf32>
    %22 = arith.cmpf ogt, %20, %21 : vector<8x288xf32>
    %cst_14 = arith.constant 0.000000e+00 : f32
    %23 = vector.broadcast %cst_14 : f32 to vector<8x288xf32>
    %24 = arith.minimumf %20, %23 : vector<8x288xf32>
    %25 = math.exp %24 : vector<8x288xf32>
    %cst_15 = arith.constant 1.000000e+00 : f32
    %26 = vector.broadcast %cst_15 : f32 to vector<8x288xf32>
    %27 = arith.subf %25, %26 : vector<8x288xf32>
    %28 = arith.select %22, %20, %27 : vector<8x288xi1>, vector<8x288xf32>
    %29 = arith.truncf %28 : vector<8x288xf32> to vector<8x288xbf16>
    %c0_16 = arith.constant 0 : index
    %c0_17 = arith.constant 0 : index
    %30 = vector.load %arg6[%c0_16, %c0_17] : memref<288x800xbf16, #tpu.memory_space<vmem>>, vector<288x800xbf16>
    %cst_18 = arith.constant dense<0.000000e+00> : vector<8x800xf32>
    %31 = tpu.matmul %29, %30, %cst_18 {dimension_numbers = #tpu.dot_dimension_numbers<[1], [0], [0], [1], [0, 0, 1, 1], [], []>} : vector<8x288xbf16>, vector<288x800xbf16>, vector<8x800xf32> -> vector<8x800xf32>
    %c0_19 = arith.constant 0 : index
    %c0_20 = arith.constant 0 : index
    %32 = vector.load %arg7[%c0_19, %c0_20] : memref<1x800xf32, #tpu.memory_space<vmem>>, vector<1x800xf32>
    %33 = vector.broadcast %32 : vector<1x800xf32> to vector<8x800xf32>
    %34 = arith.addf %31, %33 : vector<8x800xf32>
    %cst_21 = arith.constant 0.000000e+00 : f32
    %35 = vector.broadcast %cst_21 : f32 to vector<8x800xf32>
    %36 = arith.cmpf ogt, %34, %35 : vector<8x800xf32>
    %cst_22 = arith.constant 0.000000e+00 : f32
    %37 = vector.broadcast %cst_22 : f32 to vector<8x800xf32>
    %38 = arith.minimumf %34, %37 : vector<8x800xf32>
    %39 = math.exp %38 : vector<8x800xf32>
    %cst_23 = arith.constant 1.000000e+00 : f32
    %40 = vector.broadcast %cst_23 : f32 to vector<8x800xf32>
    %41 = arith.subf %39, %40 : vector<8x800xf32>
    %42 = arith.select %36, %34, %41 : vector<8x800xi1>, vector<8x800xf32>
    %43 = arith.truncf %42 : vector<8x800xf32> to vector<8x800xbf16>
    %c0_24 = arith.constant 0 : index
    %c0_25 = arith.constant 0 : index
    %44 = vector.load %arg8[%c0_24, %c0_25] : memref<800x400xbf16, #tpu.memory_space<vmem>>, vector<800x400xbf16>
    %cst_26 = arith.constant dense<0.000000e+00> : vector<8x400xf32>
    %45 = tpu.matmul %43, %44, %cst_26 {dimension_numbers = #tpu.dot_dimension_numbers<[1], [0], [0], [1], [0, 0, 1, 1], [], []>} : vector<8x800xbf16>, vector<800x400xbf16>, vector<8x400xf32> -> vector<8x400xf32>
    %c0_27 = arith.constant 0 : index
    %c0_28 = arith.constant 0 : index
    %46 = vector.load %arg9[%c0_27, %c0_28] : memref<1x400xf32, #tpu.memory_space<vmem>>, vector<1x400xf32>
    %47 = vector.broadcast %46 : vector<1x400xf32> to vector<8x400xf32>
    %48 = arith.addf %45, %47 : vector<8x400xf32>
    %cst_29 = arith.constant 0.000000e+00 : f32
    %49 = vector.broadcast %cst_29 : f32 to vector<8x400xf32>
    %50 = arith.cmpf ogt, %48, %49 : vector<8x400xf32>
    %cst_30 = arith.constant 0.000000e+00 : f32
    %51 = vector.broadcast %cst_30 : f32 to vector<8x400xf32>
    %52 = arith.minimumf %48, %51 : vector<8x400xf32>
    %53 = math.exp %52 : vector<8x400xf32>
    %cst_31 = arith.constant 1.000000e+00 : f32
    %54 = vector.broadcast %cst_31 : f32 to vector<8x400xf32>
    %55 = arith.subf %53, %54 : vector<8x400xf32>
    %56 = arith.select %50, %48, %55 : vector<8x400xi1>, vector<8x400xf32>
    %57 = arith.truncf %56 : vector<8x400xf32> to vector<8x400xbf16>
    %c0_32 = arith.constant 0 : index
    %c0_33 = arith.constant 0 : index
    %58 = vector.load %arg10[%c0_32, %c0_33] : memref<400x50xbf16, #tpu.memory_space<vmem>>, vector<400x50xbf16>
    %cst_34 = arith.constant dense<0.000000e+00> : vector<8x50xf32>
    %59 = tpu.matmul %57, %58, %cst_34 {dimension_numbers = #tpu.dot_dimension_numbers<[1], [0], [0], [1], [0, 0, 1, 1], [], []>} : vector<8x400xbf16>, vector<400x50xbf16>, vector<8x50xf32> -> vector<8x50xf32>
    %c0_35 = arith.constant 0 : index
    %c0_36 = arith.constant 0 : index
    %60 = vector.load %arg11[%c0_35, %c0_36] : memref<1x50xf32, #tpu.memory_space<vmem>>, vector<1x50xf32>
    %61 = vector.broadcast %60 : vector<1x50xf32> to vector<8x50xf32>
    %62 = arith.addf %59, %61 : vector<8x50xf32>
    %63 = tpu.iota {dimensions = array<i32: 1>} : vector<8x50xi32>
    %c25_i32 = arith.constant 25 : i32
    %64 = vector.broadcast %c25_i32 : i32 to vector<8x50xi32>
    %65 = arith.cmpi slt, %63, %64 : vector<8x50xi32>
    %cst_37 = arith.constant 0.000000e+00 : f32
    %66 = vector.broadcast %cst_37 : f32 to vector<8x50xf32>
    %67 = arith.maximumf %62, %66 : vector<8x50xf32>
    %68 = math.absf %62 : vector<8x50xf32>
    %cst_38 = arith.constant 0.000000e+00 : f32
    %69 = vector.broadcast %cst_38 : f32 to vector<8x50xf32>
    %70 = arith.subf %69, %68 : vector<8x50xf32>
    %71 = math.exp %70 : vector<8x50xf32>
    %cst_39 = arith.constant 1.000000e+00 : f32
    %72 = vector.broadcast %cst_39 : f32 to vector<8x50xf32>
    %73 = arith.addf %72, %71 : vector<8x50xf32>
    %74 = math.log %73 : vector<8x50xf32>
    %75 = arith.addf %67, %74 : vector<8x50xf32>
    %76 = arith.select %65, %62, %75 : vector<8x50xi1>, vector<8x50xf32>
    %c0_40 = arith.constant 0 : index
    %c0_41 = arith.constant 0 : index
    %77 = vector.load %arg12[%c0_40, %c0_41] : memref<8x50xf32, #tpu.memory_space<vmem>>, vector<8x50xf32>
    tpu.vector_store %arg12[%c0_40, %c0_41], %76 {strides = array<i32>} : memref<8x50xf32, #tpu.memory_space<vmem>>, vector<8x50xf32>,
    return
  }
  func.func @transform_0(%arg0: i32) -> (i32, i32) {
    %c0_i32 = arith.constant 0 : i32
    %c0_i32_0 = arith.constant 0 : i32
    return %arg0, %c0_i32 : i32, i32
  }
  func.func @transform_1(%arg0: i32) -> (i32, i32) {
    %c0_i32 = arith.constant 0 : i32
    %c0_i32_0 = arith.constant 0 : i32
    %c0_i32_1 = arith.constant 0 : i32
    return %c0_i32, %c0_i32_0 : i32, i32
  }
  func.func @transform_2(%arg0: i32) -> (i32, i32) {
    %c0_i32 = arith.constant 0 : i32
    %c0_i32_0 = arith.constant 0 : i32
    %c0_i32_1 = arith.constant 0 : i32
    return %c0_i32, %c0_i32_0 : i32, i32
  }
  func.func @transform_3(%arg0: i32) -> (i32, i32) {
    %c0_i32 = arith.constant 0 : i32
    %c0_i32_0 = arith.constant 0 : i32
    %c0_i32_1 = arith.constant 0 : i32
    return %c0_i32, %c0_i32_0 : i32, i32
  }
  func.func @transform_4(%arg0: i32) -> (i32, i32) {
    %c0_i32 = arith.constant 0 : i32
    %c0_i32_0 = arith.constant 0 : i32
    %c0_i32_1 = arith.constant 0 : i32
    return %c0_i32, %c0_i32_0 : i32, i32
  }
  func.func @transform_5(%arg0: i32) -> (i32, i32) {
    %c0_i32 = arith.constant 0 : i32
    %c0_i32_0 = arith.constant 0 : i32
    %c0_i32_1 = arith.constant 0 : i32
    return %c0_i32, %c0_i32_0 : i32, i32
  }
  func.func @transform_6(%arg0: i32) -> (i32, i32) {
    %c0_i32 = arith.constant 0 : i32
    %c0_i32_0 = arith.constant 0 : i32
    %c0_i32_1 = arith.constant 0 : i32
    return %c0_i32, %c0_i32_0 : i32, i32
  }
  func.func @transform_7(%arg0: i32) -> (i32, i32) {
    %c0_i32 = arith.constant 0 : i32
    %c0_i32_0 = arith.constant 0 : i32
    %c0_i32_1 = arith.constant 0 : i32
    return %c0_i32, %c0_i32_0 : i32, i32
  }
  func.func @transform_8(%arg0: i32) -> (i32, i32) {
    %c0_i32 = arith.constant 0 : i32
    %c0_i32_0 = arith.constant 0 : i32
    %c0_i32_1 = arith.constant 0 : i32
    return %c0_i32, %c0_i32_0 : i32, i32
  }
  func.func @transform_9(%arg0: i32) -> (i32, i32) {
    %c0_i32 = arith.constant 0 : i32
    %c0_i32_0 = arith.constant 0 : i32
    %c0_i32_1 = arith.constant 0 : i32
    return %c0_i32, %c0_i32_0 : i32, i32
  }
  func.func @transform_10(%arg0: i32) -> (i32, i32) {
    %c0_i32 = arith.constant 0 : i32
    %c0_i32_0 = arith.constant 0 : i32
    %c0_i32_1 = arith.constant 0 : i32
    return %c0_i32, %c0_i32_0 : i32, i32
  }
  func.func @transform_11(%arg0: i32) -> (i32, i32) {
    %c0_i32 = arith.constant 0 : i32
    %c0_i32_0 = arith.constant 0 : i32
    return %arg0, %c0_i32 : i32, i32
  }
}

</mosaic_0001>

<bundles_post_ra>
// kernel: tpu_custom_call.1
= control target key start
LH: loop header
LB: loop body
LE: loop exit
PB: predicated region body
PF: predicated region fallthrough
CT: control target
= control target key end

     0   :  { %vm51_vm0 = vcmask 1043456   ;;  %vm47_vm1 = vcmask 64512   ;;  %s7384_s0 = inlined_call_operand.vmem [shape: f32[8,8], index: 0, kind: input, shape index: {}]   ;;  %s7385_s1 = inlined_call_operand.vmem [shape: bf16[8,32], index: 1, kind: input, shape index: {}]   ;;  %s7386_s2 = inlined_call_operand.vmem [shape: f32[1,32], index: 2, kind: input, shape index: {}]   ;;  %s7387_s3 = inlined_call_operand.vmem [shape: bf16[32,288], index: 3, kind: input, shape index: {}]   ;;  %s7388_s4 = inlined_call_operand.vmem [shape: f32[1,288], index: 4, kind: input, shape index: {}]   ;;  %s7389_s5 = inlined_call_operand.vmem [shape: bf16[288,800], index: 5, kind: input, shape index: {}]   ;;  %s7390_s6 = inlined_call_operand.vmem [shape: f32[1,800], index: 6, kind: input, shape index: {}]   ;;  %s7391_s7 = inlined_call_operand.vmem [shape: bf16[800,400], index: 7, kind: input, shape index: {}]   ;;  %s7392_s8 = inlined_call_operand.vmem [shape: f32[1,400], index: 8, kind: input, shape index: {}]   ;;  %s7393_s9 = inlined_call_operand.vmem [shape: bf16[400,50], index: 9, kind: input, shape index: {}]   ;;  %s7394_s10 = inlined_call_operand.vmem [shape: f32[1,50], index: 10, kind: input, shape index: {}]   ;;  %s7395_s11 = inlined_call_operand.hbm [shape: f32[8,50], index: 11, kind: output, shape index: {}]  }
   0x1   :  { %v42_v0 = vld [vmem:[%s7385_s1] sm:$0xf] }
   0x2   :  { %v40_v1 = vld [vmem:[%s7384_s0] sm:$0xff]  ;;  %v53_v2 = vsel %vm51_vm0, %v42_v0, 0 }
   0x3   :  { %v41_v3 = vpack.c.bf16 %v40_v1, %v40_v1  ;;  %62 = vmatpush.bf16.msra.mxu0 %v53_v2 }
   0x4   :  { %16 = vsyncpa [#allocation3], 0  ;;  %v3232_v4 = vld [vmem:[%s7387_s3 + $0x18] sm:$0xf]  ;;  %v4679_v5 = vld [vmem:[%s7387_s3 + $0x20] sm:$0xf0] }
   0x5   :  { %v4678_v6 = vld [vmem:[%s7387_s3 + $0x1c] sm:$0xf]  ;;  %v3233_v7 = vor.u32 %v4679_v5, %v3232_v4  ;;  %v3234_v8 = vld [vmem:[%s7387_s3 + $0x24] sm:$0xf0]  ;;  %v3240_v9 = vld [vmem:[%s7387_s3 + $0x20] sm:$0xf] }
   0x6   :  { %3216 = vmatmul.msk.bf16.vlgmr.msra.gmra.mxu0 %vm47_vm1, %v41_v3  ;;  %v4680_v10 = vld [vmem:[%s7387_s3 + $0x28] sm:$0xf0]  ;;  %v3237_v11 = vor.u32 %v4678_v6, %v3234_v8  ;;  %v3220_v13 = vld [vmem:[%s7387_s3] sm:$0xf]  ;;  %v4675_v15 = vld [vmem:[%s7387_s3 + $0x4] sm:$0xf] }
   0x7   :  { %v3241_v12 = vor.u32 %v4680_v10, %v3240_v9  ;;  %133 = vmatpush.bf16.msra.mxu1 %v3233_v7  ;;  %v4676_v14 = vld [vmem:[%s7387_s3 + $0x8] sm:$0xf0]  ;;  %v3222_v17 = vld [vmem:[%s7387_s3 + $0xc] sm:$0xf0]  ;;  %v3228_v18 = vld [vmem:[%s7387_s3 + $0x8] sm:$0xf] }
   0x8   :  { %146 = vmatpush.bf16.msra.mxu2 %v3237_v11  ;;  %v3221_v16 = vor.u32 %v4676_v14, %v3220_v13  ;;  %v4677_v19 = vld [vmem:[%s7387_s3 + $0x10] sm:$0xf0]  ;;  %v3225_v20 = vor.u32 %v4675_v15, %v3222_v17  ;;  %v4730_v22 = vld [vmem:[%s7389_s5 + $0x18c] sm:$0xf]  ;;  %v3448_v23 = vld [vmem:[%s7389_s5 + $0x1a4] sm:$0xf0] }
   0x9   :  { %159 = vmatpush.bf16.msra.mxu3 %v3241_v12  ;;  %v3229_v21 = vor.u32 %v4677_v19, %v3228_v18  ;;  %v4723_v24 = vld [vmem:[%s7389_s5 + $0x154] sm:$0xf]  ;;  %v3451_v25 = vor.u32 %v4730_v22, %v3448_v23  ;;  %v3420_v26 = vld [vmem:[%s7389_s5 + $0x16c] sm:$0xf0]  ;;  %v3670_v28 = vld [vmem:[%s7389_s5 + $0x348] sm:$0xf] }
   0xa   :  { %v3423_v27 = vor.u32 %v4723_v24, %v3420_v26  ;;  %v4789_v29 = vld [vmem:[%s7389_s5 + $0x360] sm:$0xf0]  ;;  %v4716_v30 = vld [vmem:[%s7389_s5 + $0x11c] sm:$0xf]  ;;  %v3392_v31 = vld [vmem:[%s7389_s5 + $0x134] sm:$0xf0] }
   0xb   :  { %134 = vmatpush.bf16.msra.mxu1 %v3221_v16  ;;  %v3671_v32 = vor.u32 %v4789_v29, %v3670_v28  ;;  %v3642_v33 = vld [vmem:[%s7389_s5 + $0x310] sm:$0xf]  ;;  %v4782_v34 = vld [vmem:[%s7389_s5 + $0x328] sm:$0xf0]  ;;  %v3446_v36 = vld [vmem:[%s7389_s5 + $0x188] sm:$0xf]  ;;  %v3395_v37 = vor.u32 %v4716_v30, %v3392_v31 }
   0xc   :  { %147 = vmatpush.bf16.msra.mxu2 %v3225_v20  ;;  %v3643_v35 = vor.u32 %v4782_v34, %v3642_v33  ;;  %v3614_v38 = vld [vmem:[%s7389_s5 + $0x2d8] sm:$0xf]  ;;  %v4775_v39 = vld [vmem:[%s7389_s5 + $0x2f0] sm:$0xf0]  ;;  %v4733_v40 = vld [vmem:[%s7389_s5 + $0x1a0] sm:$0xf0] }
   0xd   :  { %160 = vmatpush.bf16.msra.mxu3 %v3229_v21  ;;  %v4709_v41 = vld [vmem:[%s7389_s5 + $0xe4] sm:$0xf]  ;;  %v3364_v42 = vld [vmem:[%s7389_s5 + $0xfc] sm:$0xf0]  ;;  %v3447_v43 = vor.u32 %v4733_v40, %v3446_v36  ;;  %v3726_v45 = vld [vmem:[%s7389_s5 + $0x3b8] sm:$0xf]  ;;  %v3615_v48 = vor.u32 %v4775_v39, %v3614_v38 }
   0xe   :  { %v5033_v44 = vld [vmem:[%s7386_s2] ss:$0 sm:$0xff]  ;;  %v4803_v46 = vld [vmem:[%s7389_s5 + $0x3d0] sm:$0xf0]  ;;  %v4702_v47 = vld [vmem:[%s7389_s5 + $0xac] sm:$0xf]  ;;  %v3367_v52 = vor.u32 %v4709_v41, %v3364_v42 }
   0xf   :  { %1011 = vmatpush.bf16.msrb.mxu1 %v3671_v32  ;;  %998 = vmatpush.bf16.msrb.mxu0 %v3447_v43  ;;  %v3727_v49 = vor.u32 %v4803_v46, %v3726_v45  ;;  %v3418_v50 = vld [vmem:[%s7389_s5 + $0x150] sm:$0xf]  ;;  %v4726_v51 = vld [vmem:[%s7389_s5 + $0x168] sm:$0xf0]  ;;  %v3336_v53 = vld [vmem:[%s7389_s5 + $0xc4] sm:$0xf0] }
  0x10   :  { %v3586_v54 = vld [vmem:[%s7389_s5 + $0x2a0] sm:$0xf]  ;;  %v4768_v55 = vld [vmem:[%s7389_s5 + $0x2b8] sm:$0xf0]  ;;  %v3419_v56 = vor.u32 %v4726_v51, %v3418_v50  ;;  %v3390_v60 = vld [vmem:[%s7389_s5 + $0x118] sm:$0xf]  ;;  %v3339_v3 = vor.u32 %v4702_v47, %v3336_v53 }
  0x11   :  { %1037 = vmatpush.bf16.msrb.mxu3 %v3451_v25  ;;  %1030 = vmatpush.bf16.msrb.mxu2 %v3727_v49  ;;  %v3698_v58 = vld [vmem:[%s7389_s5 + $0x380] sm:$0xf]  ;;  %v4796_v59 = vld [vmem:[%s7389_s5 + $0x398] sm:$0xf0]  ;;  %v4719_v63 = vld [vmem:[%s7389_s5 + $0x130] sm:$0xf0]  ;;  %v3587_v0 = vor.u32 %v4768_v55, %v3586_v54 }
  0x12   :  { %v3699_v62 = vor.u32 %v4796_v59, %v3698_v58  ;;  %v3391_v1 = vor.u32 %v4719_v63, %v3390_v60  ;;  %v3558_v4 = vld [vmem:[%s7389_s5 + $0x268] sm:$0xf]  ;;  %v4761_v5 = vld [vmem:[%s7389_s5 + $0x280] sm:$0xf0]  ;;  %v4695_v6 = vld [vmem:[%s7389_s5 + $0x74] sm:$0xf] }
  0x13   :  { %1012 = vmatpush.bf16.msrb.mxu1 %v3643_v35  ;;  %999 = vmatpush.bf16.msrb.mxu0 %v3419_v56  ;;  %v3308_v7 = vld [vmem:[%s7389_s5 + $0x8c] sm:$0xf0]  ;;  %v3559_v9 = vor.u32 %v4761_v5, %v3558_v4  ;;  %v4754_v12 = vld [vmem:[%s7389_s5 + $0x248] sm:$0xf0]  ;;  %v4688_v14 = vld [vmem:[%s7389_s5 + $0x3c] sm:$0xf] }
  0x14   :  { %v3311_v10 = vor.u32 %v4695_v6, %v3308_v7  ;;  %v3530_v11 = vld [vmem:[%s7389_s5 + $0x230] sm:$0xf]  ;;  %v3280_v15 = vld [vmem:[%s7389_s5 + $0x54] sm:$0xf0]  ;;  %v4786_v19 = vld [vmem:[%s7389_s5 + $0x34c] sm:$0xf] }
  0x15   :  { %1038 = vmatpush.bf16.msrb.mxu3 %v3423_v27  ;;  %1031 = vmatpush.bf16.msrb.mxu2 %v3699_v62  ;;  %v3531_v16 = vor.u32 %v4754_v12, %v3530_v11  ;;  %v3283_v17 = vor.u32 %v4688_v14, %v3280_v15  ;;  %v3672_v20 = vld [vmem:[%s7389_s5 + $0x364] sm:$0xf0]  ;;  %v4681_v22 = vld [vmem:[%s7389_s5 + $0x4] sm:$0xf]  ;;  %v3252_v23 = vld [vmem:[%s7389_s5 + $0x1c] sm:$0xf0] }
  0x16   :  { %v3678_v24 = vld [vmem:[%s7389_s5 + $0x350] sm:$0xf]  ;;  %v4790_v25 = vld [vmem:[%s7389_s5 + $0x368] sm:$0xf0]  ;;  %vm123_vm3 = vcmask 261120   ;;  %v3675_v27 = vor.u32 %v4786_v19, %v3672_v20  ;;  %v3255_v29 = vor.u32 %v4681_v22, %v3252_v23  ;;  %s3207_s15 = sshll.u32 %s7395_s11, 4  ;;  %s3208_s15 = int_to_ptr.hbm [resolvable:$true] %s3207_s15 }
  0x17   :  { %1013 = vmatpush.bf16.msrb.mxu1 %v3615_v48  ;;  %1000 = vmatpush.bf16.msrb.mxu0 %v3391_v1  ;;  %v3679_v30 = vor.u32 %v4790_v25, %v3678_v24  ;;  %v3650_v31 = vld [vmem:[%s7389_s5 + $0x318] sm:$0xf]  ;;  %v4783_v32 = vld [vmem:[%s7389_s5 + $0x330] sm:$0xf0]  ;;  %v3622_v34 = vld [vmem:[%s7389_s5 + $0x2e0] sm:$0xf] }
  0x18   :  { %v3651_v33 = vor.u32 %v4783_v32, %v3650_v31  ;;  %v4776_v35 = vld [vmem:[%s7389_s5 + $0x2f8] sm:$0xf0]  ;;  %v4779_v39 = vld [vmem:[%s7389_s5 + $0x314] sm:$0xf]  ;;  %v3644_v41 = vld [vmem:[%s7389_s5 + $0x32c] sm:$0xf0] }
  0x19   :  { %1039 = vmatpush.bf16.msrb.mxu3 %v3395_v37  ;;  %v3623_v36 = vor.u32 %v4776_v35, %v3622_v34  ;;  %v3362_v37 = vld [vmem:[%s7389_s5 + $0xe0] sm:$0xf]  ;;  %v4712_v38 = vld [vmem:[%s7389_s5 + $0xf8] sm:$0xf0]  ;;  %v3647_v42 = vor.u32 %v4779_v39, %v3644_v41  ;;  %v3502_v43 = vld [vmem:[%s7389_s5 + $0x1f8] sm:$0xf] }
  0x1a   :  { %v3363_v40 = vor.u32 %v4712_v38, %v3362_v37  ;;  %v3594_v45 = vld [vmem:[%s7389_s5 + $0x2a8] sm:$0xf]  ;;  %v4769_v47 = vld [vmem:[%s7389_s5 + $0x2c0] sm:$0xf0]  ;;  %v4772_v51 = vld [vmem:[%s7389_s5 + $0x2dc] sm:$0xf] }
  0x1b   :  { %1014 = vmatpush.bf16.msrb.mxu1 %v3587_v0  ;;  %v3595_v48 = vor.u32 %v4769_v47, %v3594_v45  ;;  %v3334_v49 = vld [vmem:[%s7389_s5 + $0xa8] sm:$0xf]  ;;  %v4705_v50 = vld [vmem:[%s7389_s5 + $0xc0] sm:$0xf0]  ;;  %v3616_v53 = vld [vmem:[%s7389_s5 + $0x2f4] sm:$0xf0] }
  0x1c   :  { %1001 = vmatpush.bf16.msrb.mxu0 %v3363_v40  ;;  %v3619_v54 = vor.u32 %v4772_v51, %v3616_v53  ;;  %v3474_v55 = vld [vmem:[%s7389_s5 + $0x1c0] sm:$0xf]  ;;  %v4740_v56 = vld [vmem:[%s7389_s5 + $0x1d8] sm:$0xf0]  ;;  %v4762_v59 = vld [vmem:[%s7389_s5 + $0x288] sm:$0xf0] }
  0x1d   :  { %1040 = vmatpush.bf16.msrb.mxu3 %v3367_v52  ;;  %v3335_v52 = vor.u32 %v4705_v50, %v3334_v49  ;;  %v3475_v58 = vor.u32 %v4740_v56, %v3474_v55  ;;  %v3454_v60 = vld [vmem:[%s7389_s5 + $0x190] sm:$0xf]  ;;  %v4698_v1 = vld [vmem:[%s7389_s5 + $0x88] sm:$0xf0]  ;;  %v3588_v4 = vld [vmem:[%s7389_s5 + $0x2bc] sm:$0xf0] }
  0x1e   :  { %v3306_v0 = vld [vmem:[%s7389_s5 + $0x70] sm:$0xf]  ;;  %v3538_v6 = vld [vmem:[%s7389_s5 + $0x238] sm:$0xf]  ;;  %v4755_v7 = vld [vmem:[%s7389_s5 + $0x250] sm:$0xf0] }
  0x1f   :  { %1015 = vmatpush.bf16.msrb.mxu1 %v3559_v9  ;;  %v3426_v9 = vld [vmem:[%s7389_s5 + $0x158] sm:$0xf]  ;;  %v4758_v14 = vld [vmem:[%s7389_s5 + $0x26c] sm:$0xf]  ;;  %v4748_v19 = vld [vmem:[%s7389_s5 + $0x218] sm:$0xf0] }
  0x20   :  { %1002 = vmatpush.bf16.msrb.mxu0 %v3335_v52  ;;  %v3278_v12 = vld [vmem:[%s7389_s5 + $0x38] sm:$0xf]  ;;  %v4720_v22 = vld [vmem:[%s7389_s5 + $0x138] sm:$0xf0]  ;;  %v3250_v24 = vld [vmem:[%s7389_s5] sm:$0xf] }
  0x21   :  { %1041 = vmatpush.bf16.msrb.mxu3 %v3339_v3  ;;  %v4765_v3 = vld [vmem:[%s7389_s5 + $0x2a4] sm:$0xf]  ;;  %v4684_v25 = vld [vmem:[%s7389_s5 + $0x18] sm:$0xf0]  ;;  %v3504_v37 = vld [vmem:[%s7389_s5 + $0x214] sm:$0xf0] }
  0x22   :  { %v3591_v5 = vor.u32 %v4765_v3, %v3588_v4  ;;  %v4741_v31 = vld [vmem:[%s7389_s5 + $0x1e0] sm:$0xf0]  ;;  %v3342_v39 = vld [vmem:[%s7389_s5 + $0xb0] sm:$0xf]  ;;  %v4706_v40 = vld [vmem:[%s7389_s5 + $0xc8] sm:$0xf0] }
  0x23   :  { %1016 = vmatpush.bf16.msrb.mxu1 %v3531_v16  ;;  %v3560_v16 = vld [vmem:[%s7389_s5 + $0x284] sm:$0xf0]  ;;  %v4713_v34 = vld [vmem:[%s7389_s5 + $0x100] sm:$0xf0]  ;;  %v3343_v41 = vor.u32 %v4706_v40, %v3342_v39  ;;  %v4800_v45 = vld [vmem:[%s7389_s5 + $0x3bc] sm:$0xf] }
  0x24   :  { %v3314_v49 = vld [vmem:[%s7389_s5 + $0x78] sm:$0xf]  ;;  %v4699_v50 = vld [vmem:[%s7389_s5 + $0x90] sm:$0xf0]  ;;  %v4793_v52 = vld [vmem:[%s7389_s5 + $0x384] sm:$0xf] }
  0x25   :  { %1042 = vmatpush.bf16.msrb.mxu3 %v3311_v10  ;;  %v4727_v10 = vld [vmem:[%s7389_s5 + $0x170] sm:$0xf0]  ;;  %v3315_v51 = vor.u32 %v4699_v50, %v3314_v49  ;;  %v3700_v53 = vld [vmem:[%s7389_s5 + $0x39c] sm:$0xf0]  ;;  %v3406_v39 = vld [vmem:[%s7389_s5 + $0x128] sm:$0xf] }
  0x26   :  { %v3427_v11 = vor.u32 %v4727_v10, %v3426_v9  ;;  %v3703_v55 = vor.u32 %v4793_v52, %v3700_v53  ;;  %v3286_v56 = vld [vmem:[%s7389_s5 + $0x40] sm:$0xf]  ;;  %v4721_v40 = vld [vmem:[%s7389_s5 + $0x140] sm:$0xf0]  ;;  %v4724_v50 = vld [vmem:[%s7389_s5 + $0x15c] sm:$0xf] }
  0x27   :  { %v3407_v49 = vor.u32 %v4721_v40, %v3406_v39  ;;  %v3378_v52 = vld [vmem:[%s7389_s5 + $0xf0] sm:$0xf]  ;;  %v4714_v53 = vld [vmem:[%s7389_s5 + $0x108] sm:$0xf0]  ;;  %v4689_v39 = vld [vmem:[%s7389_s5 + $0x44] sm:$0xf] }
  0x28   :  { %v3288_v40 = vld [vmem:[%s7389_s5 + $0x5c] sm:$0xf0] }
  0x29   :  { %1043 = vmatpush.bf16.msrb.mxu3 %v3283_v17  ;;  %v3563_v17 = vor.u32 %v4758_v14, %v3560_v16  ;;  %v3734_v16 = vld [vmem:[%s7389_s5 + $0x3c0] sm:$0xf] }
  0x2d   :  { %1044 = vmatpush.bf16.msrb.mxu3 %v3255_v29 }
  0x83   :  { %v64_v57 = vpop.f32.mrf.mxu0 }
  0x84   :  { %v65_v61 = vadd.f32 %v5033_v44, %v64_v57  ;;  %v4747_v44 = vld [vmem:[%s7389_s5 + $0x210] sm:$0xf0]  ;;  %v3566_v57 = vld [vmem:[%s7389_s5 + $0x270] sm:$0xf] }
  0x85   :  { %v3503_v46 = vor.u32 %v4747_v44, %v3502_v43  ;;  %v3567_v62 = vor.u32 %v4762_v59, %v3566_v57  ;;  %v3476_v43 = vld [vmem:[%s7389_s5 + $0x1dc] sm:$0xf0]  ;;  %v4692_v57 = vld [vmem:[%s7389_s5 + $0x58] sm:$0xf0] }
  0x86   :  { %v69_v2 = vmin.f32 %v65_v61, 0.0  ;;  %vm68_vm2 = vcmp.gt.f32.partialorder %v65_v61, 0.0 }
  0x87   :  { %1017 = vmatpush.bf16.msrb.mxu1 %v3503_v46  ;;  %v3728_v46 = vld [vmem:[%s7389_s5 + $0x3d4] sm:$0xf0] }
  0x88   :  { %v70_v8 = vmul.f32 1.442695, %v69_v2  ;;  %v3307_v2 = vor.u32 %v4698_v1, %v3306_v0  ;;  %v3731_v47 = vor.u32 %v4800_v45, %v3728_v46  ;;  %v4794_v46 = vld [vmem:[%s7389_s5 + $0x38c] sm:$0xf] }
  0x8a   :  { %5035 = vpow2.f32 %v70_v8  ;;  %1003 = vmatpush.bf16.msrb.mxu0 %v3307_v2  ;;  %v3539_v8 = vor.u32 %v4755_v7, %v3538_v6 }
  0x8b   :  { %v66_v13 = vpop.f32.mrf.mxu0  ;;  %1018 = vmatpush.bf16.msrb.mxu1 %v3475_v58  ;;  %v3287_v58 = vor.u32 %v4692_v57, %v3286_v56  ;;  %v3379_v56 = vor.u32 %v4714_v53, %v3378_v52  ;;  %v4717_v57 = vld [vmem:[%s7389_s5 + $0x124] sm:$0xf]  ;;  %v3260_v52 = vld [vmem:[%s7389_s5 + $0x24] sm:$0xf0]  ;;  %v3602_v53 = vld [vmem:[%s7389_s5 + $0x2b0] sm:$0xf] }
  0x8c   :  { %v4691_v13 = vld [vmem:[%s7389_s5 + $0x50] sm:$0xf0] }
  0x8d   :  { %v3279_v15 = vor.u32 %v4691_v13, %v3278_v12  ;;  %v3462_v13 = vld [vmem:[%s7389_s5 + $0x198] sm:$0xf] }
  0x8f   :  { %1004 = vmatpush.bf16.msrb.mxu0 %v3279_v15  ;;  %v4735_v15 = vld [vmem:[%s7389_s5 + $0x1b0] sm:$0xf0] }
  0x90   :  { %v5036_v18 = vpop.eup %5035 }
  0x91   :  { %v3217_v21 = vadd.f32 -1.0, %v5036_v18  ;;  %v3510_v18 = vld [vmem:[%s7389_s5 + $0x200] sm:$0xf] }
  0x92   :  { %v3511_v20 = vor.u32 %v4748_v19, %v3510_v18 }
  0x93   :  { %v73_v26 = vsel %vm68_vm2, %v65_v61, %v3217_v21  ;;  %v4734_v61 = vld [vmem:[%s7389_s5 + $0x1a8] sm:$0xf0]  ;;  %v3398_v21 = vld [vmem:[%s7389_s5 + $0x120] sm:$0xf]  ;;  %vm3129_vm2 = vcmask 130048  }
  0x94   :  { %v74_v28 = vpack.c.bf16 %v73_v26, %v73_v26  ;;  %v3455_v63 = vor.u32 %v4734_v61, %v3454_v60  ;;  %v3399_v23 = vor.u32 %v4720_v22, %v3398_v21  ;;  %v4751_v26 = vld [vmem:[%s7389_s5 + $0x234] sm:$0xf]  ;;  %v3258_v61 = vld [vmem:[%s7389_s5 + $0x8] sm:$0xf]  ;;  %v3463_v22 = vor.u32 %v4735_v15, %v3462_v13  ;;  %v3344_v13 = vld [vmem:[%s7389_s5 + $0xcc] sm:$0xf0] }
  0x95   :  { %v4773_v15 = vld [vmem:[%s7389_s5 + $0x2e4] sm:$0xf] }
  0x96   :  { %3242 = vmatmul.msk.bf16.vlgmr.msra.gmra.mxu1 %vm123_vm3, %v74_v28  ;;  %3243 = vmatmul.msk.bf16.vlgmr.msra.gmra.mxu2 %vm123_vm3, %v74_v28 }
  0x97   :  { %3244 = vmatmul.msk.bf16.vlgmr.msra.gmra.mxu3 %vm123_vm3, %v74_v28  ;;  %1050 = vmatpush.bf16.msra.mxu2 %v3675_v27  ;;  %v3251_v27 = vor.u32 %v4684_v25, %v3250_v24  ;;  %v3532_v28 = vld [vmem:[%s7389_s5 + $0x24c] sm:$0xf0] }
  0x98   :  { %1089 = vmatpush.bf16.msra.mxu3 %v3679_v30  ;;  %1076 = vmatpush.bf16.msra.mxu1 %v3455_v63  ;;  %v3535_v29 = vor.u32 %v4751_v26, %v3532_v28  ;;  %v3482_v30 = vld [vmem:[%s7389_s5 + $0x1c8] sm:$0xf]  ;;  %v4728_v26 = vld [vmem:[%s7389_s5 + $0x178] sm:$0xf0]  ;;  %v4797_v28 = vld [vmem:[%s7389_s5 + $0x3a0] sm:$0xf0] }
  0x99   :  { %1005 = vmatpush.bf16.msrb.mxu0 %v3251_v27  ;;  %v3483_v32 = vor.u32 %v4741_v31, %v3482_v30  ;;  %v3706_v27 = vld [vmem:[%s7389_s5 + $0x388] sm:$0xf]  ;;  %v4801_v30 = vld [vmem:[%s7389_s5 + $0x3c4] sm:$0xf]  ;;  %v3736_v31 = vld [vmem:[%s7389_s5 + $0x3dc] sm:$0xf0] }
  0x9b   :  { %1051 = vmatpush.bf16.msra.mxu2 %v3647_v42  ;;  %v4737_v42 = vld [vmem:[%s7389_s5 + $0x1c4] sm:$0xf] }
  0x9c   :  { %1090 = vmatpush.bf16.msra.mxu3 %v3651_v33  ;;  %1077 = vmatpush.bf16.msra.mxu1 %v3427_v11  ;;  %v3370_v33 = vld [vmem:[%s7389_s5 + $0xe8] sm:$0xf]  ;;  %v3479_v44 = vor.u32 %v4737_v42, %v3476_v43  ;;  %v3739_v42 = vor.u32 %v4801_v30, %v3736_v31  ;;  %v3266_v31 = vld [vmem:[%s7389_s5 + $0x10] sm:$0xf] }
  0x9d   :  { %v3371_v35 = vor.u32 %v4713_v34, %v3370_v33  ;;  %1069 = vmatpush.bf16.msra.mxu0 %v3731_v47  ;;  %v3708_v47 = vld [vmem:[%s7389_s5 + $0x3a4] sm:$0xf0] }
  0x9f   :  { %1052 = vmatpush.bf16.msra.mxu2 %v3619_v54 }
  0xa0   :  { %1091 = vmatpush.bf16.msra.mxu3 %v3623_v36  ;;  %1078 = vmatpush.bf16.msra.mxu1 %v3399_v23  ;;  %v4744_v36 = vld [vmem:[%s7389_s5 + $0x1fc] sm:$0xf]  ;;  %v3434_v23 = vld [vmem:[%s7389_s5 + $0x160] sm:$0xf] }
  0xa1   :  { %v3507_v38 = vor.u32 %v4744_v36, %v3504_v37  ;;  %1070 = vmatpush.bf16.msra.mxu0 %v3703_v55  ;;  %v3435_v34 = vor.u32 %v4728_v26, %v3434_v23  ;;  %v3456_v36 = vld [vmem:[%s7389_s5 + $0x1ac] sm:$0xf0]  ;;  %v3707_v37 = vor.u32 %v4797_v28, %v3706_v27  ;;  %v3316_v26 = vld [vmem:[%s7389_s5 + $0x94] sm:$0xf0]  ;;  %v4766_v28 = vld [vmem:[%s7389_s5 + $0x2ac] sm:$0xf] }
  0xa3   :  { %1053 = vmatpush.bf16.msra.mxu2 %v3591_v5 }
  0xa4   :  { %1092 = vmatpush.bf16.msra.mxu3 %v3595_v48  ;;  %1079 = vmatpush.bf16.msra.mxu1 %v3371_v35  ;;  %v83_v48 = vld [vmem:[%s7388_s4] sm:$0x7]  ;;  %v4731_v35 = vld [vmem:[%s7389_s5 + $0x194] sm:$0xf] }
  0xa5   :  { %v85_v54 = vperm.slane %v83_v48, 0  ;;  %v86_v0 = vperm.slane %v83_v48, 1  ;;  %v87_v2 = vperm.slane %v83_v48, 2  ;;  %v3459_v45 = vor.u32 %v4731_v35, %v3456_v36  ;;  %v3744_v35 = vld [vmem:[%s7389_s5 + $0x3e4] sm:$0xf0] }
  0xa6   :  { %v3630_v36 = vld [vmem:[%s7389_s5 + $0x2e8] sm:$0xf] }
  0xa7   :  { %1054 = vmatpush.bf16.msra.mxu2 %v3563_v17  ;;  %v4804_v17 = vld [vmem:[%s7389_s5 + $0x3d8] sm:$0xf0] }
  0xa8   :  { %1093 = vmatpush.bf16.msra.mxu3 %v3567_v62  ;;  %1080 = vmatpush.bf16.msra.mxu1 %v3343_v41  ;;  %v4685_v62 = vld [vmem:[%s7389_s5 + $0x20] sm:$0xf0]  ;;  %v3735_v24 = vor.u32 %v4804_v17, %v3734_v16  ;;  %v3624_v16 = vld [vmem:[%s7389_s5 + $0x2fc] sm:$0xf0] }
  0xa9   :  { %v3259_v1 = vor.u32 %v4685_v62, %v3258_v61  ;;  %v3350_v61 = vld [vmem:[%s7389_s5 + $0xb8] sm:$0xf]  ;;  %v4707_v62 = vld [vmem:[%s7389_s5 + $0xd0] sm:$0xf0]  ;;  %v3627_v23 = vor.u32 %v4773_v15, %v3624_v16  ;;  %v3546_v16 = vld [vmem:[%s7389_s5 + $0x240] sm:$0xf] }
  0xab   :  { %1055 = vmatpush.bf16.msra.mxu2 %v3535_v29 }
  0xac   :  { %1094 = vmatpush.bf16.msra.mxu3 %v3539_v8  ;;  %1081 = vmatpush.bf16.msra.mxu1 %v3315_v51  ;;  %v3428_v51 = vld [vmem:[%s7389_s5 + $0x174] sm:$0xf0] }
  0xad   :  { %v3431_v55 = vor.u32 %v4724_v50, %v3428_v51  ;;  %v4682_v50 = vld [vmem:[%s7389_s5 + $0xc] sm:$0xf]  ;;  %v3291_v51 = vor.u32 %v4689_v39, %v3288_v40 }
  0xae   :  { %v4774_v39 = vld [vmem:[%s7389_s5 + $0x2ec] sm:$0xf] }
  0xaf   :  { %1056 = vmatpush.bf16.msra.mxu2 %v3507_v38 }
  0xb0   :  { %1095 = vmatpush.bf16.msra.mxu3 %v3511_v20  ;;  %1082 = vmatpush.bf16.msra.mxu1 %v3287_v58  ;;  %v3400_v58 = vld [vmem:[%s7389_s5 + $0x13c] sm:$0xf0] }
  0xb3   :  { %1057 = vmatpush.bf16.msra.mxu2 %v3479_v44 }
  0xb4   :  { %1096 = vmatpush.bf16.msra.mxu3 %v3483_v32  ;;  %1083 = vmatpush.bf16.msra.mxu1 %v3259_v1  ;;  %v4710_v1 = vld [vmem:[%s7389_s5 + $0xec] sm:$0xf] }
 0x113   :  { %v136_v59 = vpop.f32.mrf.mxu1 }
 0x114   :  { %v137_v60 = vadd.f32 %v136_v59, %v85_v54  ;;  %v3711_v54 = vor.u32 %v4794_v46, %v3708_v47  ;;  %v4787_v59 = vld [vmem:[%s7389_s5 + $0x354] sm:$0xf] }
 0x115   :  { %v4795_v47 = vld [vmem:[%s7389_s5 + $0x394] sm:$0xf] }
 0x116   :  { %v169_v63 = vmin.f32 %v137_v60, 0.0  ;;  %vm166_vm4 = vcmp.gt.f32.partialorder %v137_v60, 0.0 }
 0x118   :  { %v172_v3 = vmul.f32 1.442695, %v169_v63  ;;  %v3403_v63 = vor.u32 %v4717_v57, %v3400_v58  ;;  %v4792_v57 = vld [vmem:[%s7389_s5 + $0x378] sm:$0xf0]  ;;  %v3742_v58 = vld [vmem:[%s7389_s5 + $0x3c8] sm:$0xf] }
 0x119   :  { %v149_v4 = vpop.f32.mrf.mxu2 }
 0x11a   :  { %5037 = vpow2.f32 %v172_v3  ;;  %v150_v5 = vadd.f32 %v149_v4, %v86_v0  ;;  %v162_v6 = vpop.f32.mrf.mxu3  ;;  %v3351_v3 = vor.u32 %v4707_v62, %v3350_v61  ;;  %v4780_v4 = vld [vmem:[%s7389_s5 + $0x31c] sm:$0xf]  ;;  %v3540_v61 = vld [vmem:[%s7389_s5 + $0x254] sm:$0xf0] }
 0x11b   :  { %v163_v7 = vadd.f32 %v162_v6, %v87_v2  ;;  %v138_v8 = vpop.f32.mrf.mxu1  ;;  %v3372_v2 = vld [vmem:[%s7389_s5 + $0x104] sm:$0xf0]  ;;  %v3322_v6 = vld [vmem:[%s7389_s5 + $0x80] sm:$0xf] }
 0x11c   :  { %v170_v9 = vmin.f32 %v150_v5, 0.0  ;;  %vm167_vm5 = vcmp.gt.f32.partialorder %v150_v5, 0.0  ;;  %v3375_v8 = vor.u32 %v4710_v1, %v3372_v2  ;;  %v3574_v2 = vld [vmem:[%s7389_s5 + $0x278] sm:$0xf] }
 0x11d   :  { %v171_v10 = vmin.f32 %v163_v7, 0.0  ;;  %vm168_vm6 = vcmp.gt.f32.partialorder %v163_v7, 0.0 }
 0x11e   :  { %v174_v11 = vmul.f32 1.442695, %v170_v9  ;;  %v3686_v9 = vld [vmem:[%s7389_s5 + $0x358] sm:$0xf] }
 0x11f   :  { %v176_v12 = vmul.f32 1.442695, %v171_v10  ;;  %v4791_v10 = vld [vmem:[%s7389_s5 + $0x370] sm:$0xf0] }
 0x120   :  { %v5038_v14 = vpop.eup %5037  ;;  %5039 = vpow2.f32 %v174_v11  ;;  %v3687_v17 = vor.u32 %v4791_v10, %v3686_v9  ;;  %v4798_v9 = vld [vmem:[%s7389_s5 + $0x3a8] sm:$0xf0]  ;;  %v4745_v10 = vld [vmem:[%s7389_s5 + $0x204] sm:$0xf] }
 0x121   :  { %v3245_v18 = vadd.f32 -1.0, %v5038_v14  ;;  %5041 = vpow2.f32 %v176_v12  ;;  %v151_v19 = vpop.f32.mrf.mxu2  ;;  %v4703_v12 = vld [vmem:[%s7389_s5 + $0xb4] sm:$0xf] }
 0x122   :  { %v164_v20 = vpop.f32.mrf.mxu3  ;;  %v4693_v19 = vld [vmem:[%s7389_s5 + $0x60] sm:$0xf0] }
 0x123   :  { %v181_v21 = vsel %vm166_vm4, %v137_v60, %v3245_v18  ;;  %v3680_v60 = vld [vmem:[%s7389_s5 + $0x36c] sm:$0xf0]  ;;  %v3294_v18 = vld [vmem:[%s7389_s5 + $0x48] sm:$0xf]  ;;  %v3347_v20 = vor.u32 %v4703_v12, %v3344_v13  ;;  %v4788_v13 = vld [vmem:[%s7389_s5 + $0x35c] sm:$0xf] }
 0x124   :  { %v5534_v25 = vpack.c.bf16 %v181_v21, %v181_v21  ;;  %v3683_v0 = vor.u32 %v4787_v59, %v3680_v60  ;;  %v3658_v21 = vld [vmem:[%s7389_s5 + $0x320] sm:$0xf]  ;;  %v3295_v27 = vor.u32 %v4693_v19, %v3294_v18  ;;  %v4805_v59 = vld [vmem:[%s7389_s5 + $0x3e0] sm:$0xf0]  ;;  %v4752_v60 = vld [vmem:[%s7389_s5 + $0x23c] sm:$0xf] }
 0x125   :  { %vm3198_vm4 = vcmask 408576  }
 0x126   :  { %v5040_v29 = vpop.eup %5039  ;;  %1006 = vmatmul.bf16.vlgmr.msrb.gmra.mxu0 %v5534_v25  ;;  %1045 = vmatmul.bf16.vlgmr.msrb.gmra.mxu3 %v5534_v25 }
 0x127   :  { %v5042_v32 = vpop.eup %5041  ;;  %v3246_v33 = vadd.f32 -1.0, %v5040_v29  ;;  %1154 = vmatpush.bf16.msrb.mxu3 %v3463_v22  ;;  %1108 = vmatpush.bf16.msrb.mxu0 %v3735_v24  ;;  %v4784_v22 = vld [vmem:[%s7389_s5 + $0x338] sm:$0xf0]  ;;  %v3596_v29 = vld [vmem:[%s7389_s5 + $0x2c4] sm:$0xf0] }
 0x128   :  { %v3247_v38 = vadd.f32 -1.0, %v5042_v32  ;;  %v4696_v24 = vld [vmem:[%s7389_s5 + $0x7c] sm:$0xf]  ;;  %v3659_v30 = vor.u32 %v4784_v22, %v3658_v21  ;;  %v4686_v32 = vld [vmem:[%s7389_s5 + $0x28] sm:$0xf0] }
 0x129   :  { %v182_v41 = vsel %vm167_vm5, %v150_v5, %v3246_v33  ;;  %v3652_v5 = vld [vmem:[%s7389_s5 + $0x334] sm:$0xf0]  ;;  %v4802_v33 = vld [vmem:[%s7389_s5 + $0x3cc] sm:$0xf] }
 0x12a   :  { %v5565_v43 = vpack.c.bf16 %v182_v41, %v182_v41  ;;  %v183_v44 = vsel %vm168_vm6, %v163_v7, %v3247_v38  ;;  %v4700_v7 = vld [vmem:[%s7389_s5 + $0x98] sm:$0xf0]  ;;  %v3655_v11 = vor.u32 %v4780_v4, %v3652_v5  ;;  %v3599_v38 = vor.u32 %v4766_v28, %v3596_v29  ;;  %v4778_v21 = vld [vmem:[%s7389_s5 + $0x308] sm:$0xf0]  ;;  %v3660_v28 = vld [vmem:[%s7389_s5 + $0x33c] sm:$0xf0] }
 0x12b   :  { %v5573_v48 = vpack.c.bf16 %v183_v44, %v183_v44  ;;  %1155 = vmatpush.bf16.msrb.mxu3 %v3435_v34  ;;  %1109 = vmatpush.bf16.msrb.mxu0 %v3707_v37  ;;  %v3323_v14 = vor.u32 %v4700_v7, %v3322_v6  ;;  %v3319_v34 = vor.u32 %v4696_v24, %v3316_v26  ;;  %v4777_v37 = vld [vmem:[%s7389_s5 + $0x300] sm:$0xf0]  ;;  %v3568_v44 = vld [vmem:[%s7389_s5 + $0x28c] sm:$0xf0]  ;;  %v3666_v6 = vld [vmem:[%s7389_s5 + $0x328] sm:$0xf] }
 0x12c   :  { %1019 = vmatmul.bf16.vlgmr.msrb.gmra.mxu1 %v5565_v43  ;;  %v3267_v41 = vor.u32 %v4686_v32, %v3266_v31  ;;  %v3631_v46 = vor.u32 %v4777_v37, %v3630_v36  ;;  %v3743_v4 = vor.u32 %v4805_v59, %v3742_v58  ;;  %v3543_v5 = vor.u32 %v4752_v60, %v3540_v61  ;;  %v4785_v7 = vld [vmem:[%s7389_s5 + $0x340] sm:$0xf0]  ;;  %v3484_v24 = vld [vmem:[%s7389_s5 + $0x1e4] sm:$0xf0]  ;;  %v4732_v29 = vld [vmem:[%s7389_s5 + $0x19c] sm:$0xf] }
 0x12d   :  { %3752 = vmatmul.msk.bf16.vlgmr.msrb.gmra.mxu2 %vm123_vm3, %v5573_v48  ;;  %1147 = vmatpush.bf16.msrb.mxu1 %v3739_v42  ;;  %v4759_v42 = vld [vmem:[%s7389_s5 + $0x274] sm:$0xf]  ;;  %v3667_v15 = vor.u32 %v4785_v7, %v3666_v6  ;;  %v4781_v26 = vld [vmem:[%s7389_s5 + $0x324] sm:$0xf]  ;;  %v3518_v32 = vld [vmem:[%s7389_s5 + $0x208] sm:$0xf] }
 0x12e   :  { %1115 = vmatpush.bf16.msrb.mxu2 %v3459_v45  ;;  %v3747_v45 = vor.u32 %v4802_v33, %v3744_v35  ;;  %v4749_v33 = vld [vmem:[%s7389_s5 + $0x220] sm:$0xf0]  ;;  %v3610_v35 = vld [vmem:[%s7389_s5 + $0x2b8] sm:$0xf]  ;;  %v4771_v36 = vld [vmem:[%s7389_s5 + $0x2d0] sm:$0xf0]  ;;  %v3663_v37 = vor.u32 %v4781_v26, %v3660_v28 }
 0x12f   :  { %1156 = vmatpush.bf16.msrb.mxu3 %v3407_v49  ;;  %v3716_v49 = vld [vmem:[%s7389_s5 + $0x3ac] sm:$0xf0]  ;;  %v3519_v40 = vor.u32 %v4749_v33, %v3518_v32  ;;  %v4718_v58 = vld [vmem:[%s7389_s5 + $0x12c] sm:$0xf]  ;;  %v3408_v59 = vld [vmem:[%s7389_s5 + $0x144] sm:$0xf0] }
 0x130   :  { %v3719_v62 = vor.u32 %v4795_v47, %v3716_v49  ;;  %v4742_v47 = vld [vmem:[%s7389_s5 + $0x1e8] sm:$0xf0]  ;;  %v3582_v49 = vld [vmem:[%s7389_s5 + $0x280] sm:$0xf]  ;;  %v4711_v6 = vld [vmem:[%s7389_s5 + $0xf4] sm:$0xf] }
 0x131   :  { %1148 = vmatpush.bf16.msrb.mxu1 %v3711_v54  ;;  %v4770_v54 = vld [vmem:[%s7389_s5 + $0x2c8] sm:$0xf0]  ;;  %v3380_v7 = vld [vmem:[%s7389_s5 + $0x10c] sm:$0xf0]  ;;  %v4715_v26 = vld [vmem:[%s7389_s5 + $0x110] sm:$0xf0] }
 0x132   :  { %1116 = vmatpush.bf16.msrb.mxu2 %v3431_v55  ;;  %v3571_v55 = vor.u32 %v4759_v42, %v3568_v44  ;;  %v4725_v42 = vld [vmem:[%s7389_s5 + $0x164] sm:$0xf]  ;;  %v3436_v44 = vld [vmem:[%s7389_s5 + $0x17c] sm:$0xf0] }
 0x133   :  { %1157 = vmatpush.bf16.msrb.mxu3 %v3379_v56  ;;  %v3694_v56 = vld [vmem:[%s7389_s5 + $0x360] sm:$0xf] }
 0x134   :  { %v3695_v1 = vor.u32 %v4792_v57, %v3694_v56  ;;  %v3604_v57 = vld [vmem:[%s7389_s5 + $0x2cc] sm:$0xf0]  ;;  %v3324_v32 = vld [vmem:[%s7389_s5 + $0x9c] sm:$0xf0] }
 0x136   :  { %1117 = vmatpush.bf16.msrb.mxu2 %v3403_v63  ;;  %3753 = vmatmul.msk.bf16.vlgmr.msra.gmra.mxu0 %vm123_vm3, %v5573_v48  ;;  %v3603_v63 = vor.u32 %v4770_v54, %v3602_v53  ;;  %v3439_v54 = vor.u32 %v4725_v42, %v3436_v44  ;;  %v3296_v42 = vld [vmem:[%s7389_s5 + $0x64] sm:$0xf0] }
 0x137   :  { %1097 = vmatmul.bf16.vlgmr.msra.gmra.mxu3 %v5565_v43  ;;  %1128 = vmatpush.bf16.msra.mxu0 %v3683_v0  ;;  %v3263_v0 = vor.u32 %v4682_v50, %v3260_v52  ;;  %v4764_v50 = vld [vmem:[%s7389_s5 + $0x298] sm:$0xf0] }
 0x138   :  { %1158 = vmatpush.bf16.msrb.mxu3 %v3351_v3  ;;  %v4763_v3 = vld [vmem:[%s7389_s5 + $0x290] sm:$0xf0]  ;;  %v4736_v52 = vld [vmem:[%s7389_s5 + $0x1b8] sm:$0xf0]  ;;  %v3583_v60 = vor.u32 %v4764_v50, %v3582_v49 }
 0x139   :  { %v3575_v12 = vor.u32 %v4763_v3, %v3574_v2  ;;  %v3411_v3 = vor.u32 %v4718_v58, %v3408_v59  ;;  %v4683_v50 = vld [vmem:[%s7389_s5 + $0x14] sm:$0xf] }
 0x13a   :  { %1118 = vmatpush.bf16.msrb.mxu2 %v3375_v8  ;;  %v3714_v8 = vld [vmem:[%s7389_s5 + $0x390] sm:$0xf] }
 0x13b   :  { %1129 = vmatpush.bf16.msra.mxu0 %v3655_v11  ;;  %v3512_v11 = vld [vmem:[%s7389_s5 + $0x21c] sm:$0xf0]  ;;  %v3715_v18 = vor.u32 %v4798_v9, %v3714_v8 }
 0x13c   :  { %1159 = vmatpush.bf16.msrb.mxu3 %v3323_v14  ;;  %1084 = vmatmul.bf16.vlgmr.msra.gmra.mxu1 %v5534_v25  ;;  %v3688_v14 = vld [vmem:[%s7389_s5 + $0x374] sm:$0xf0]  ;;  %v3515_v19 = vor.u32 %v4745_v10, %v3512_v11  ;;  %v3526_v10 = vld [vmem:[%s7389_s5 + $0x210] sm:$0xf]  ;;  %v4750_v11 = vld [vmem:[%s7389_s5 + $0x228] sm:$0xf0] }
 0x13d   :  { %1058 = vmatmul.bf16.vlgmr.msra.gmra.mxu2 %v5565_v43  ;;  %1167 = vmatpush.bf16.msra.mxu1 %v3687_v17  ;;  %v4756_v17 = vld [vmem:[%s7389_s5 + $0x258] sm:$0xf0]  ;;  %v3691_v22 = vor.u32 %v4788_v13, %v3688_v14  ;;  %v4722_v13 = vld [vmem:[%s7389_s5 + $0x148] sm:$0xf0] }
 0x13e   :  { %1119 = vmatpush.bf16.msrb.mxu2 %v3347_v20  ;;  %v3638_v20 = vld [vmem:[%s7389_s5 + $0x2f0] sm:$0xf] }
 0x13f   :  { %1130 = vmatpush.bf16.msra.mxu0 %v3627_v23  ;;  %v4738_v23 = vld [vmem:[%s7389_s5 + $0x1cc] sm:$0xf]  ;;  %v3639_v31 = vor.u32 %v4778_v21, %v3638_v20  ;;  %v3527_v20 = vor.u32 %v4750_v11, %v3526_v10  ;;  %v3832_v11 = vld [vmem:[%s7391_s7 + $0x80] sm:$0xf] }
 0x140   :  { %1160 = vmatpush.bf16.msrb.mxu3 %v3295_v27  ;;  %v3547_v27 = vor.u32 %v4756_v17, %v3546_v16  ;;  %v4753_v16 = vld [vmem:[%s7389_s5 + $0x244] sm:$0xf]  ;;  %v3548_v17 = vld [vmem:[%s7389_s5 + $0x25c] sm:$0xf0] }
 0x141   :  { %1168 = vmatpush.bf16.msra.mxu1 %v3659_v30  ;;  %v3464_v30 = vld [vmem:[%s7389_s5 + $0x1b4] sm:$0xf0] }
 0x142   :  { %1120 = vmatpush.bf16.msrb.mxu2 %v3319_v34  ;;  %v3487_v34 = vor.u32 %v4738_v23, %v3484_v24  ;;  %v4743_v23 = vld [vmem:[%s7389_s5 + $0x1f0] sm:$0xf0]  ;;  %v3386_v24 = vld [vmem:[%s7389_s5 + $0xf8] sm:$0xf] }
 0x143   :  { %1131 = vmatpush.bf16.msra.mxu0 %v3599_v38  ;;  %v3467_v38 = vor.u32 %v4732_v29, %v3464_v30  ;;  %v4746_v29 = vld [vmem:[%s7389_s5 + $0x20c] sm:$0xf]  ;;  %v3520_v30 = vld [vmem:[%s7389_s5 + $0x224] sm:$0xf0] }
 0x144   :  { %1161 = vmatpush.bf16.msrb.mxu3 %v3267_v41  ;;  %v3632_v41 = vld [vmem:[%s7389_s5 + $0x304] sm:$0xf0] }
 0x145   :  { %1169 = vmatpush.bf16.msra.mxu1 %v3631_v46  ;;  %v3490_v46 = vld [vmem:[%s7389_s5 + $0x1d0] sm:$0xf]  ;;  %v3635_v53 = vor.u32 %v4774_v39, %v3632_v41  ;;  %v4739_v39 = vld [vmem:[%s7389_s5 + $0x1d4] sm:$0xf]  ;;  %v4690_v41 = vld [vmem:[%s7389_s5 + $0x4c] sm:$0xf] }
 0x146   :  { %1121 = vmatpush.bf16.msrb.mxu2 %v3291_v51  ;;  %3754 = vmatmul.msk.bf16.vlgmr.msrb.gmra.mxu0 %vm123_vm3, %v5573_v48  ;;  %v3470_v51 = vld [vmem:[%s7389_s5 + $0x1a0] sm:$0xf]  ;;  %v3491_v56 = vor.u32 %v4742_v47, %v3490_v46  ;;  %v4701_v46 = vld [vmem:[%s7389_s5 + $0xa0] sm:$0xf0]  ;;  %v3299_v49 = vor.u32 %v4690_v41, %v3296_v42 }
 0x147   :  { %1132 = vmatpush.bf16.msra.mxu0 %v3571_v55  ;;  %1162 = vmatmul.bf16.vlgmr.msrb.gmra.mxu3 %v5534_v25  ;;  %v4767_v55 = vld [vmem:[%s7389_s5 + $0x2b4] sm:$0xf]  ;;  %v3471_v61 = vor.u32 %v4736_v52, %v3470_v51  ;;  %v3268_v51 = vld [vmem:[%s7389_s5 + $0x2c] sm:$0xf0]  ;;  %v3784_v42 = vld [vmem:[%s7391_s7 + $0x20] sm:$0xf] }
 0x148   :  { %1225 = vmatpush.bf16.msra.mxu3 %v3747_v45  ;;  %v3611_v45 = vor.u32 %v4771_v36, %v3610_v35  ;;  %v3607_v2 = vor.u32 %v4767_v55, %v3604_v57  ;;  %v3358_v35 = vld [vmem:[%s7389_s5 + $0xc0] sm:$0xf]  ;;  %v4708_v36 = vld [vmem:[%s7389_s5 + $0xd8] sm:$0xf0]  ;;  %v3302_v55 = vld [vmem:[%s7389_s5 + $0x50] sm:$0xf]  ;;  %v3271_v57 = vor.u32 %v4683_v50, %v3268_v51 }
 0x149   :  { %1170 = vmatpush.bf16.msra.mxu1 %v3603_v63  ;;  %v4757_v63 = vld [vmem:[%s7389_s5 + $0x260] sm:$0xf0]  ;;  %v3359_v44 = vor.u32 %v4708_v36, %v3358_v35  ;;  %v4136_v35 = vld [vmem:[%s7391_s7 + $0x2e0] sm:$0xf]  ;;  %v4901_v36 = vld [vmem:[%s7391_s7 + $0x2ec] sm:$0xf0] }
 0x14a   :  { %1122 = vmatpush.bf16.msrb.mxu2 %v3263_v0  ;;  %v3442_v0 = vld [vmem:[%s7389_s5 + $0x168] sm:$0xf]  ;;  %v4897_v51 = vld [vmem:[%s7391_s7 + $0x2cc] sm:$0xf0] }
 0x14b   :  { %1133 = vmatpush.bf16.msra.mxu0 %v3543_v5  ;;  %v3576_v5 = vld [vmem:[%s7389_s5 + $0x294] sm:$0xf0] }
 0x14c   :  { %1226 = vmatpush.bf16.msra.mxu3 %v3719_v62  ;;  %3755 = vmatmul.msk.bf16.vlgmr.msrb.gmra.mxu1 %vm123_vm3, %v5573_v48  ;;  %v3554_v62 = vld [vmem:[%s7389_s5 + $0x248] sm:$0xf] }
 0x14d   :  { %1123 = vmatmul.bf16.vlgmr.msrb.gmra.mxu2 %v5534_v25  ;;  %1171 = vmatpush.bf16.msra.mxu1 %v3575_v12  ;;  %v3555_v8 = vor.u32 %v4757_v63, %v3554_v62  ;;  %v3414_v12 = vld [vmem:[%s7389_s5 + $0x130] sm:$0xf]  ;;  %v3274_v62 = vld [vmem:[%s7389_s5 + $0x18] sm:$0xf]  ;;  %v4687_v63 = vld [vmem:[%s7389_s5 + $0x30] sm:$0xf0] }
 0x14e   :  { %1186 = vmatpush.bf16.msra.mxu2 %v3743_v4  ;;  %v4760_v4 = vld [vmem:[%s7389_s5 + $0x27c] sm:$0xf]  ;;  %v3415_v21 = vor.u32 %v4722_v13, %v3414_v12  ;;  %v4825_v12 = vld [vmem:[%s7391_s7 + $0x8c] sm:$0xf0]  ;;  %v4008_v13 = vld [vmem:[%s7391_s7 + $0x1e0] sm:$0xf] }
 0x14f   :  { %1134 = vmatpush.bf16.msra.mxu0 %v3515_v19  ;;  %v3579_v14 = vor.u32 %v4760_v4, %v3576_v5  ;;  %v3352_v19 = vld [vmem:[%s7389_s5 + $0xd4] sm:$0xf0]  ;;  %v3864_v4 = vld [vmem:[%s7391_s7 + $0xc0] sm:$0xf] }
 0x150   :  { %1245 = vmatpush.bf16.msrb.mxu3 %v3695_v1  ;;  %v4729_v1 = vld [vmem:[%s7389_s5 + $0x180] sm:$0xf0] }
 0x151   :  { %1172 = vmatpush.bf16.msra.mxu1 %v3547_v27  ;;  %v3443_v9 = vor.u32 %v4729_v1, %v3442_v0  ;;  %v3551_v27 = vor.u32 %v4753_v16, %v3548_v17  ;;  %v3275_v1 = vor.u32 %v4687_v63, %v3274_v62  ;;  %v4248_v17 = vld [vmem:[%s7391_s7 + $0x3c0] sm:$0xf]  ;;  %v4893_v62 = vld [vmem:[%s7391_s7 + $0x2ac] sm:$0xf0] }
 0x152   :  { %1187 = vmatpush.bf16.msra.mxu2 %v3715_v18  ;;  %v4704_v18 = vld [vmem:[%s7389_s5 + $0xbc] sm:$0xf] }
 0x153   :  { %1135 = vmatpush.bf16.msra.mxu0 %v3487_v34  ;;  %v3355_v28 = vor.u32 %v4704_v18, %v3352_v19  ;;  %v3387_v34 = vor.u32 %v4715_v26, %v3386_v24  ;;  %v4929_v18 = vld [vmem:[%s7391_s7 + $0x3cc] sm:$0xf0] }
 0x154   :  { %1246 = vmatpush.bf16.msrb.mxu3 %v3667_v15  ;;  %v3383_v15 = vor.u32 %v4711_v6, %v3380_v7  ;;  %v3848_v6 = vld [vmem:[%s7391_s7 + $0xa0] sm:$0xf]  ;;  %v4249_v19 = vor.u32 %v4929_v18, %v4248_v17  ;;  %v4865_v24 = vld [vmem:[%s7391_s7 + $0x1cc] sm:$0xf0] }
 0x155   :  { %1173 = vmatpush.bf16.msra.mxu1 %v3519_v40  ;;  %v3492_v40 = vld [vmem:[%s7389_s5 + $0x1ec] sm:$0xf0]  ;;  %v4072_v17 = vld [vmem:[%s7391_s7 + $0x260] sm:$0xf] }
 0x156   :  { %1206 = vmatpush.bf16.msrb.mxu2 %v3691_v22  ;;  %1136 = vmatmul.bf16.vlgmr.msra.gmra.mxu0 %v5565_v43  ;;  %v3498_v22 = vld [vmem:[%s7389_s5 + $0x1d8] sm:$0xf]  ;;  %v3495_v47 = vor.u32 %v4739_v39, %v3492_v40  ;;  %v4216_v39 = vld [vmem:[%s7391_s7 + $0x380] sm:$0xf]  ;;  %v4921_v40 = vld [vmem:[%s7391_s7 + $0x38c] sm:$0xf0] }
 0x157   :  { %1193 = vmatpush.bf16.msrb.mxu0 %v3467_v38  ;;  %3757 = vmatmul.msk.bf16.vlgmr.msra.gmra.mxu3 %vm123_vm3, %v5573_v48  ;;  %v3499_v33 = vor.u32 %v4743_v23, %v3498_v22  ;;  %v3992_v22 = vld [vmem:[%s7391_s7 + $0x1c0] sm:$0xf]  ;;  %v4217_v41 = vor.u32 %v4921_v40, %v4216_v39  ;;  %v4957_v39 = vld [vmem:[%s7391_s7 + $0x4ac] sm:$0xf0]  ;;  %v4835_v40 = vld [vmem:[%s7391_s7 + $0xe4] sm:$0xf] }
 0x158   :  { %1247 = vmatpush.bf16.msrb.mxu3 %v3639_v31  ;;  %v4697_v31 = vld [vmem:[%s7389_s5 + $0x84] sm:$0xf]  ;;  %v3993_v26 = vor.u32 %v4865_v24, %v3992_v22 }
 0x159   :  { %1174 = vmatpush.bf16.msra.mxu1 %v3491_v56  ;;  %v3327_v38 = vor.u32 %v4697_v31, %v3324_v32  ;;  %v4694_v56 = vld [vmem:[%s7389_s5 + $0x68] sm:$0xf0]  ;;  %v4817_v31 = vld [vmem:[%s7391_s7 + $0x4c] sm:$0xf0]  ;;  %v3976_v32 = vld [vmem:[%s7391_s7 + $0x1a0] sm:$0xf] }
 0x15a   :  { %1207 = vmatpush.bf16.msrb.mxu2 %v3663_v37  ;;  %v3523_v37 = vor.u32 %v4746_v29, %v3520_v30  ;;  %v3303_v59 = vor.u32 %v4694_v56, %v3302_v55  ;;  %v3800_v30 = vld [vmem:[%s7391_s7 + $0x40] sm:$0xf] }
 0x15b   :  { %1194 = vmatpush.bf16.msrb.mxu0 %v3439_v54  ;;  %v4806_v54 = vld [vmem:[%s7389_s5 + $0x3e8] sm:$0xf0]  ;;  %v3768_v56 = vld [vmem:[%s7391_s7] sm:$0xf] }
 0x15c   :  { %1248 = vmatpush.bf16.msrb.mxu3 %v3611_v45  ;;  %1175 = vmatmul.bf16.vlgmr.msra.gmra.mxu1 %v5565_v43  ;;  %v3330_v45 = vld [vmem:[%s7389_s5 + $0x88] sm:$0xf] }
 0x15d   :  { %1232 = vmatpush.bf16.msrb.mxu1 %v3471_v61  ;;  %3756 = vmatmul.msk.bf16.vlgmr.msra.gmra.mxu2 %vm123_vm3, %v5573_v48  ;;  %v3331_v52 = vor.u32 %v4701_v46, %v3330_v45  ;;  %v4799_v61 = vld [vmem:[%s7389_s5 + $0x3b0] sm:$0xf0]  ;;  %v3960_v46 = vld [vmem:[%s7391_s7 + $0x180] sm:$0xf] }
 0x15e   :  { %1208 = vmatpush.bf16.msrb.mxu2 %v3635_v53  ;;  %v3750_v53 = vld [vmem:[%s7389_s5 + $0x3d0] sm:$0xf] }
 0x15f   :  { %1195 = vmatpush.bf16.msrb.mxu0 %v3411_v3  ;;  %v3751_v58 = vor.u32 %v4806_v54, %v3750_v53  ;;  %v4200_v53 = vld [vmem:[%s7391_s7 + $0x360] sm:$0xf]  ;;  %v4917_v54 = vld [vmem:[%s7391_s7 + $0x36c] sm:$0xf0] }
 0x160   :  { %1249 = vmatpush.bf16.msrb.mxu3 %v3583_v60  ;;  %v3722_v60 = vld [vmem:[%s7389_s5 + $0x398] sm:$0xf]  ;;  %v4201_v55 = vor.u32 %v4917_v54, %v4200_v53 }
 0x161   :  { %1233 = vmatpush.bf16.msrb.mxu1 %v3443_v9  ;;  %v3723_v0 = vor.u32 %v4799_v61, %v3722_v60  ;;  %v4933_v9 = vld [vmem:[%s7391_s7 + $0x3ec] sm:$0xf0]  ;;  %v4104_v61 = vld [vmem:[%s7391_s7 + $0x2a0] sm:$0xf] }
 0x162   :  { %1209 = vmatpush.bf16.msrb.mxu2 %v3607_v2  ;;  %v4837_v2 = vld [vmem:[%s7391_s7 + $0xec] sm:$0xf0] }
 0x163   :  { %1196 = vmatpush.bf16.msrb.mxu0 %v3383_v15  ;;  %v4869_v15 = vld [vmem:[%s7391_s7 + $0x1ec] sm:$0xf0] }
 0x164   :  { %1250 = vmatpush.bf16.msrb.mxu3 %v3555_v8  ;;  %v4264_v8 = vld [vmem:[%s7391_s7 + $0x3e0] sm:$0xf]  ;;  %v4009_v16 = vor.u32 %v4869_v15, %v4008_v13  ;;  %v4853_v60 = vld [vmem:[%s7391_s7 + $0x16c] sm:$0xf0] }
 0x165   :  { %1234 = vmatpush.bf16.msrb.mxu1 %v3415_v21  ;;  %v4265_v10 = vor.u32 %v4933_v9, %v4264_v8  ;;  %v4821_v21 = vld [vmem:[%s7391_s7 + $0x6c] sm:$0xf0]  ;;  %v3912_v15 = vld [vmem:[%s7391_s7 + $0x120] sm:$0xf] }
 0x166   :  { %1210 = vmatpush.bf16.msrb.mxu2 %v3579_v14  ;;  %v3833_v14 = vor.u32 %v4825_v12, %v3832_v11  ;;  %v4965_v8 = vld [vmem:[%s7391_s7 + $0x4ec] sm:$0xf0]  ;;  %v6150_v11 = vld [vmem:[%s7390_s6] sm:$0x7f] }
 0x167   :  { %1197 = vmatpush.bf16.msrb.mxu0 %v3355_v28  ;;  %v4925_v28 = vld [vmem:[%s7391_s7 + $0x3ac] sm:$0xf0]  ;;  %v4168_v12 = vld [vmem:[%s7391_s7 + $0x320] sm:$0xf]  ;;  %v333_v24 = vperm.slane %v6150_v11, 0 }
 0x168   :  { %1251 = vmatpush.bf16.msrb.mxu3 %v3527_v20  ;;  %v3816_v20 = vld [vmem:[%s7391_s7 + $0x60] sm:$0xf]  ;;  %v4909_v13 = vld [vmem:[%s7391_s7 + $0x32c] sm:$0xf0] }
 0x169   :  { %1235 = vmatpush.bf16.msrb.mxu1 %v3387_v34  ;;  %v3817_v23 = vor.u32 %v4821_v21, %v3816_v20  ;;  %v4861_v34 = vld [vmem:[%s7391_s7 + $0x1ac] sm:$0xf0]  ;;  %v4376_v20 = vld [vmem:[%s7391_s7 + $0x4c0] sm:$0xf] }
 0x16a   :  { %1211 = vmatpush.bf16.msrb.mxu2 %v3551_v27  ;;  %v4232_v27 = vld [vmem:[%s7391_s7 + $0x3a0] sm:$0xf]  ;;  %v4961_v21 = vld [vmem:[%s7391_s7 + $0x4cc] sm:$0xf0] }
 0x16b   :  { %1198 = vmatpush.bf16.msrb.mxu0 %v3327_v38  ;;  %v4233_v29 = vor.u32 %v4925_v28, %v4232_v27  ;;  %v4137_v38 = vor.u32 %v4901_v36, %v4136_v35  ;;  %v4152_v28 = vld [vmem:[%s7391_s7 + $0x300] sm:$0xf]  ;;  %v4881_v36 = vld [vmem:[%s7391_s7 + $0x24c] sm:$0xf0] }
 0x16c   :  { %1252 = vmatpush.bf16.msrb.mxu3 %v3499_v33  ;;  %v3801_v33 = vor.u32 %v4817_v31, %v3800_v30  ;;  %v3896_v31 = vld [vmem:[%s7391_s7 + $0x100] sm:$0xf] }
 0x16d   :  { %1236 = vmatpush.bf16.msrb.mxu1 %v3359_v44  ;;  %v4813_v44 = vld [vmem:[%s7391_s7 + $0x2c] sm:$0xf0]  ;;  %v4056_v35 = vld [vmem:[%s7391_s7 + $0x240] sm:$0xf] }
 0x16e   :  { %1212 = vmatpush.bf16.msrb.mxu2 %v3523_v37  ;;  %v3977_v37 = vor.u32 %v4861_v34, %v3976_v32  ;;  %v3785_v45 = vor.u32 %v4813_v44, %v3784_v42  ;;  %v4841_v32 = vld [vmem:[%s7391_s7 + $0x10c] sm:$0xf0] }
 0x16f   :  { %1253 = vmatmul.bf16.vlgmr.msrb.gmra.mxu3 %v5565_v43  ;;  %1199 = vmatpush.bf16.msrb.mxu0 %v3299_v49  ;;  %v4120_v49 = vld [vmem:[%s7391_s7 + $0x2c0] sm:$0xf]  ;;  %v3897_v34 = vor.u32 %v4841_v32, %v3896_v31 }
 0x170   :  { %2572 = vmatpush.bf16.msra.mxu3 %v4265_v10  ;;  %v4296_v32 = vld [vmem:[%s7391_s7 + $0x420] sm:$0xf] }
 0x171   :  { %1237 = vmatpush.bf16.msrb.mxu1 %v3331_v52  ;;  %v4121_v52 = vor.u32 %v4897_v51, %v4120_v49  ;;  %v4877_v51 = vld [vmem:[%s7391_s7 + $0x22c] sm:$0xf0] }
 0x172   :  { %1213 = vmatpush.bf16.msrb.mxu2 %v3495_v47  ;;  %v4857_v47 = vld [vmem:[%s7391_s7 + $0x18c] sm:$0xf0] }
 0x173   :  { %1200 = vmatpush.bf16.msrb.mxu0 %v3271_v57  ;;  %v3961_v50 = vor.u32 %v4857_v47, %v3960_v46  ;;  %v4809_v57 = vld [vmem:[%s7391_s7 + $0xc] sm:$0xf0]  ;;  %v4520_v46 = vld [vmem:[%s7391_s7 + $0x5e0] sm:$0xf] }
 0x174   :  { %2573 = vmatpush.bf16.msra.mxu3 %v4249_v19  ;;  %v4885_v19 = vld [vmem:[%s7391_s7 + $0x26c] sm:$0xf0] }
 0x175   :  { %1214 = vmatmul.bf16.vlgmr.msrb.gmra.mxu2 %v5565_v43  ;;  %1238 = vmatpush.bf16.msrb.mxu1 %v3303_v59  ;;  %v3880_v43 = vld [vmem:[%s7391_s7 + $0xe0] sm:$0xf]  ;;  %v3769_v59 = vor.u32 %v4809_v57, %v3768_v56  ;;  %v4073_v22 = vor.u32 %v4885_v19, %v4072_v17  ;;  %v4997_v47 = vld [vmem:[%s7391_s7 + $0x5ec] sm:$0xf0]  ;;  %v4831_v56 = vld [vmem:[%s7391_s7 + $0xc4] sm:$0xf] }
 0x176   :  { %1201 = vmatmul.bf16.vlgmr.msrb.gmra.mxu0 %v5534_v25  ;;  %v3881_v3 = vor.u32 %v4837_v2, %v3880_v43  ;;  %v4913_v43 = vld [vmem:[%s7391_s7 + $0x34c] sm:$0xf0]  ;;  %v4521_v49 = vor.u32 %v4997_v47, %v4520_v46  ;;  %v3866_v57 = vld [vmem:[%s7391_s7 + $0xd0] sm:$0xf0]  ;;  %v4280_v46 = vld [vmem:[%s7391_s7 + $0x400] sm:$0xf] }
 0x177   :  { %1264 = vmatpush.bf16.msra.mxu0 %v3751_v58  ;;  %v3944_v58 = vld [vmem:[%s7391_s7 + $0x160] sm:$0xf]  ;;  %v4945_v17 = vld [vmem:[%s7391_s7 + $0x44c] sm:$0xf0] }
 0x178   :  { %2533 = vmatpush.bf16.msra.mxu2 %v3881_v3  ;;  %2574 = vmatpush.bf16.msra.mxu3 %v4233_v29  ;;  %v3945_v63 = vor.u32 %v4853_v60, %v3944_v58  ;;  %v3928_v3 = vld [vmem:[%s7391_s7 + $0x140] sm:$0xf]  ;;  %v4905_v29 = vld [vmem:[%s7391_s7 + $0x30c] sm:$0xf0]  ;;  %v3869_v60 = vor.u32 %v4831_v56, %v3866_v57  ;;  %v4899_v57 = vld [vmem:[%s7391_s7 + $0x2e4] sm:$0xf] }
 0x179   :  { %1239 = vmatpush.bf16.msrb.mxu1 %v3275_v1  ;;  %v4184_v1 = vld [vmem:[%s7391_s7 + $0x340] sm:$0xf]  ;;  %v4153_v30 = vor.u32 %v4905_v29, %v4152_v28  ;;  %v334_v28 = vperm.slane %v6150_v11, 1  ;;  %v335_v29 = vperm.slane %v6150_v11, 2  ;;  %v4937_v47 = vld [vmem:[%s7391_s7 + $0x40c] sm:$0xf0] }
 0x17a   :  { %v4185_v2 = vor.u32 %v4913_v43, %v4184_v1  ;;  %v4977_v56 = vld [vmem:[%s7391_s7 + $0x54c] sm:$0xf0] }
 0x17b   :  { %1265 = vmatpush.bf16.msra.mxu0 %v3723_v0  ;;  %v4105_v0 = vor.u32 %v4893_v62, %v4104_v61  ;;  %v4504_v61 = vld [vmem:[%s7391_s7 + $0x5c0] sm:$0xf]  ;;  %v4993_v62 = vld [vmem:[%s7391_s7 + $0x5cc] sm:$0xf0] }
 0x17c   :  { %1240 = vmatmul.bf16.vlgmr.msrb.gmra.mxu1 %v5534_v25  ;;  %v4833_v25 = vld [vmem:[%s7391_s7 + $0xcc] sm:$0xf0]  ;;  %2575 = vmatpush.bf16.msra.mxu3 %v4217_v41  ;;  %v3882_v41 = vld [vmem:[%s7391_s7 + $0xf0] sm:$0xf0]  ;;  %v4505_v43 = vor.u32 %v4993_v62, %v4504_v61 }
 0x17d   :  { %v3865_v5 = vor.u32 %v4833_v25, %v3864_v4  ;;  %2559 = vmatpush.bf16.msra.mxu1 %v4137_v38  ;;  %v4849_v4 = vld [vmem:[%s7391_s7 + $0x14c] sm:$0xf0]  ;;  %v4088_v25 = vld [vmem:[%s7391_s7 + $0x280] sm:$0xf]  ;;  %v4057_v38 = vor.u32 %v4881_v36, %v4056_v35 }
 0x17f   :  { %2534 = vmatpush.bf16.msra.mxu2 %v3865_v5  ;;  %2546 = vmatpush.bf16.msrb.mxu0 %v4009_v16  ;;  %v4845_v16 = vld [vmem:[%s7391_s7 + $0x12c] sm:$0xf0] }
 0x180   :  { %2576 = vmatpush.bf16.msra.mxu3 %v4201_v55  ;;  %v3913_v18 = vor.u32 %v4845_v16, %v3912_v15  ;;  %v4953_v55 = vld [vmem:[%s7391_s7 + $0x48c] sm:$0xf0]  ;;  %v4312_v16 = vld [vmem:[%s7391_s7 + $0x440] sm:$0xf] }
 0x181   :  { %2560 = vmatpush.bf16.msra.mxu1 %v4121_v52  ;;  %v4344_v52 = vld [vmem:[%s7391_s7 + $0x480] sm:$0xf]  ;;  %v4313_v19 = vor.u32 %v4945_v17, %v4312_v16 }
 0x182   :  { %v4408_v17 = vld [vmem:[%s7391_s7 + $0x500] sm:$0xf] }
 0x183   :  { %2547 = vmatpush.bf16.msrb.mxu0 %v3993_v26 }
 0x184   :  { %2577 = vmatpush.bf16.msra.mxu3 %v4185_v2  ;;  %v4024_v2 = vld [vmem:[%s7391_s7 + $0x200] sm:$0xf] }
 0x185   :  { %2561 = vmatpush.bf16.msra.mxu1 %v4105_v0 }
 0x186   :  { %3758 = vmatmul.msk.bf16.vlgmr.msra.gmra.mxu0 %vm123_vm3, %v5573_v48  ;;  %v4829_v48 = vld [vmem:[%s7391_s7 + $0xac] sm:$0xf0] }
 0x187   :  { %v3849_v7 = vor.u32 %v4829_v48, %v3848_v6  ;;  %2548 = vmatpush.bf16.msrb.mxu0 %v3977_v37  ;;  %v3929_v6 = vor.u32 %v4849_v4, %v3928_v3  ;;  %v4889_v48 = vld [vmem:[%s7391_s7 + $0x28c] sm:$0xf0]  ;;  %v4360_v37 = vld [vmem:[%s7391_s7 + $0x4a0] sm:$0xf] }
 0x188   :  { %v4089_v9 = vor.u32 %v4889_v48, %v4088_v25  ;;  %v4361_v44 = vor.u32 %v4957_v39, %v4360_v37  ;;  %v4873_v3 = vld [vmem:[%s7391_s7 + $0x20c] sm:$0xf0]  ;;  %v4328_v4 = vld [vmem:[%s7391_s7 + $0x460] sm:$0xf]  ;;  %v3818_v37 = vld [vmem:[%s7391_s7 + $0x70] sm:$0xf0] }
 0x189   :  { %2535 = vmatpush.bf16.msra.mxu2 %v3849_v7  ;;  %v4392_v7 = vld [vmem:[%s7391_s7 + $0x4e0] sm:$0xf]  ;;  %v4949_v48 = vld [vmem:[%s7391_s7 + $0x46c] sm:$0xf0] }
 0x18a   :  { %v4393_v10 = vor.u32 %v4965_v8, %v4392_v7  ;;  %2562 = vmatpush.bf16.msra.mxu1 %v4089_v9  ;;  %v4827_v7 = vld [vmem:[%s7391_s7 + $0xa4] sm:$0xf]  ;;  %v4329_v8 = vor.u32 %v4949_v48, %v4328_v4  ;;  %v3850_v9 = vld [vmem:[%s7391_s7 + $0xb0] sm:$0xf0]  ;;  %v4981_v39 = vld [vmem:[%s7391_s7 + $0x56c] sm:$0xf0] }
 0x18b   :  { %2549 = vmatpush.bf16.msrb.mxu0 %v3961_v50  ;;  %v4040_v50 = vld [vmem:[%s7391_s7 + $0x220] sm:$0xf]  ;;  %v4895_v48 = vld [vmem:[%s7391_s7 + $0x2c4] sm:$0xf] }
 0x18c   :  { %v4041_v54 = vor.u32 %v4877_v51, %v4040_v50  ;;  %v4815_v50 = vld [vmem:[%s7391_s7 + $0x44] sm:$0xf]  ;;  %v3802_v51 = vld [vmem:[%s7391_s7 + $0x50] sm:$0xf0] }
 0x18d   :  { %2536 = vmatpush.bf16.msra.mxu2 %v3833_v14  ;;  %v4169_v14 = vor.u32 %v4909_v13, %v4168_v12  ;;  %v4989_v12 = vld [vmem:[%s7391_s7 + $0x5ac] sm:$0xf0] }
 0x18e   :  { %2563 = vmatpush.bf16.msra.mxu1 %v4073_v22  ;;  %v4985_v22 = vld [vmem:[%s7391_s7 + $0x58c] sm:$0xf0] }
 0x18f   :  { %2550 = vmatpush.bf16.msrb.mxu0 %v3945_v63  ;;  %2578 = vmatpush.bf16.msra.mxu3 %v4169_v14  ;;  %v3853_v14 = vor.u32 %v4827_v7, %v3850_v9 }
 0x191   :  { %2537 = vmatpush.bf16.msra.mxu2 %v3817_v23  ;;  %v4377_v23 = vor.u32 %v4961_v21, %v4376_v20  ;;  %v3834_v20 = vld [vmem:[%s7391_s7 + $0x90] sm:$0xf0]  ;;  %v4472_v21 = vld [vmem:[%s7391_s7 + $0x580] sm:$0xf] }
 0x192   :  { %2564 = vmatpush.bf16.msra.mxu1 %v4057_v38  ;;  %v4456_v38 = vld [vmem:[%s7391_s7 + $0x560] sm:$0xf] }
 0x193   :  { %2551 = vmatpush.bf16.msrb.mxu0 %v3929_v6  ;;  %2579 = vmatpush.bf16.msra.mxu3 %v4153_v30  ;;  %v4025_v6 = vor.u32 %v4873_v3, %v4024_v2  ;;  %v3786_v2 = vld [vmem:[%s7391_s7 + $0x30] sm:$0xf0] }
 0x195   :  { %2538 = vmatpush.bf16.msra.mxu2 %v3801_v33 }
 0x196   :  { %2565 = vmatpush.bf16.msra.mxu1 %v4041_v54 }
 0x197   :  { %2552 = vmatpush.bf16.msrb.mxu0 %v3913_v18  ;;  %v4823_v18 = vld [vmem:[%s7391_s7 + $0x84] sm:$0xf] }
 0x199   :  { %2539 = vmatpush.bf16.msra.mxu2 %v3785_v45  ;;  %v3885_v45 = vor.u32 %v4835_v40, %v3882_v41  ;;  %v4457_v41 = vor.u32 %v4981_v39, %v4456_v38  ;;  %v4552_v38 = vld [vmem:[%s7391_s7 + $0x620] sm:$0xf]  ;;  %v5005_v39 = vld [vmem:[%s7391_s7 + $0x62c] sm:$0xf0] }
 0x19a   :  { %2566 = vmatpush.bf16.msra.mxu1 %v4025_v6  ;;  %v4973_v6 = vld [vmem:[%s7391_s7 + $0x52c] sm:$0xf0] }
 0x19b   :  { %2553 = vmatpush.bf16.msrb.mxu0 %v3897_v34  ;;  %2624 = vmatpush.bf16.msrb.mxu3 %v3885_v45  ;;  %v4819_v34 = vld [vmem:[%s7391_s7 + $0x64] sm:$0xf] }
 0x19c   :  { %v3821_v40 = vor.u32 %v4819_v34, %v3818_v37  ;;  %v336_v34 = vperm.slane %v6150_v11, 3 }
 0x19d   :  { %2540 = vmatpush.bf16.msra.mxu2 %v3769_v59  ;;  %v4345_v59 = vor.u32 %v4953_v55, %v4344_v52  ;;  %v4440_v52 = vld [vmem:[%s7391_s7 + $0x540] sm:$0xf]  ;;  %v4281_v55 = vor.u32 %v4937_v47, %v4280_v46  ;;  %v4074_v46 = vld [vmem:[%s7391_s7 + $0x270] sm:$0xf0] }
 0x19e   :  { %v4441_v62 = vor.u32 %v4977_v56, %v4440_v52 }
 0x19f   :  { %2598 = vmatpush.bf16.msra.mxu0 %v4521_v49  ;;  %2625 = vmatpush.bf16.msrb.mxu3 %v3869_v60 }
 0x1a1   :  { %2585 = vmatpush.bf16.msrb.mxu2 %v4393_v10  ;;  %v4488_v10 = vld [vmem:[%s7391_s7 + $0x5a0] sm:$0xf] }
 0x1a2   :  { %v4489_v15 = vor.u32 %v4989_v12, %v4488_v10 }
 0x1a3   :  { %v1007_v5 = vpop.f32.mrf.mxu0  ;;  %2599 = vmatpush.bf16.msra.mxu0 %v4505_v43  ;;  %2626 = vmatpush.bf16.msrb.mxu3 %v3853_v14  ;;  %v4811_v43 = vld [vmem:[%s7391_s7 + $0x24] sm:$0xf] }
 0x1a4   :  { %v1008_v42 = vadd.f32 %v1007_v5, %v333_v24  ;;  %v3837_v24 = vor.u32 %v4823_v18, %v3834_v20  ;;  %v4807_v14 = vld [vmem:[%s7391_s7 + $0x4] sm:$0xf]  ;;  %v4969_v18 = vld [vmem:[%s7391_s7 + $0x50c] sm:$0xf0] }
 0x1a5   :  { %2586 = vmatpush.bf16.msrb.mxu2 %v4377_v23 }
 0x1a7   :  { %2600 = vmatpush.bf16.msra.mxu0 %v4489_v15  ;;  %2627 = vmatpush.bf16.msrb.mxu3 %v3837_v24  ;;  %v3770_v15 = vld [vmem:[%s7391_s7 + $0x10] sm:$0xf0] }
 0x1a9   :  { %v1020_v26 = vpop.f32.mrf.mxu1  ;;  %v6177_v27 = vpop.f32.mrf.mxu3  ;;  %2587 = vmatpush.bf16.msrb.mxu2 %v4361_v44 }
 0x1aa   :  { %v1021_v53 = vadd.f32 %v1020_v26, %v1008_v42  ;;  %v4473_v26 = vor.u32 %v4985_v22, %v4472_v21  ;;  %v1047_v49 = vadd.f32 %v6177_v27, %v334_v28  ;;  %v3805_v27 = vor.u32 %v4815_v50, %v3802_v51  ;;  %v4891_v22 = vld [vmem:[%s7391_s7 + $0x2a4] sm:$0xf] }
 0x1ab   :  { %v1009_v33 = vpop.f32.mrf.mxu0  ;;  %2628 = vmatpush.bf16.msrb.mxu3 %v3821_v40  ;;  %v3773_v21 = vor.u32 %v4807_v14, %v3770_v15  ;;  %v4883_v40 = vld [vmem:[%s7391_s7 + $0x264] sm:$0xf]  ;;  %v337_v14 = vperm.slane %v6150_v11, 4 }
 0x1ac   :  { %v4941_v33 = vld [vmem:[%s7391_s7 + $0x42c] sm:$0xf0]  ;;  %2601 = vmatpush.bf16.msra.mxu0 %v4473_v26  ;;  %v4409_v26 = vor.u32 %v4969_v18, %v4408_v17  ;;  %v4077_v50 = vor.u32 %v4883_v40, %v4074_v46  ;;  %v3962_v40 = vld [vmem:[%s7391_s7 + $0x190] sm:$0xf0] }
 0x1ad   :  { %2588 = vmatpush.bf16.msrb.mxu2 %v4345_v59  ;;  %v4297_v36 = vor.u32 %v4941_v33, %v4296_v32  ;;  %v4090_v32 = vld [vmem:[%s7391_s7 + $0x290] sm:$0xf0] }
 0x1af   :  { %2629 = vmatpush.bf16.msrb.mxu3 %v3805_v27  ;;  %v4250_v27 = vld [vmem:[%s7391_s7 + $0x3d0] sm:$0xf0] }
 0x1b0   :  { %v1033_v58 = vpop.f32.mrf.mxu2  ;;  %2602 = vmatpush.bf16.msra.mxu0 %v4457_v41 }
 0x1b1   :  { %v6239_v63 = vadd.f32 %v1033_v58, %v1021_v53  ;;  %v1022_v0 = vpop.f32.mrf.mxu1  ;;  %v1048_v1 = vpop.f32.mrf.mxu3  ;;  %2589 = vmatpush.bf16.msrb.mxu2 %v4329_v8  ;;  %v4138_v58 = vld [vmem:[%s7391_s7 + $0x2f0] sm:$0xf0] }
 0x1b2   :  { %v4122_v8 = vld [vmem:[%s7391_s7 + $0x2d0] sm:$0xf0] }
 0x1b3   :  { %v1278_v25 = vmin.f32 %v6239_v63, 0.0  ;;  %v6251_v5 = vpop.f32.mrf.mxu0  ;;  %vm1271_vm7 = vcmp.gt.f32.partialorder %v6239_v63, 0.0  ;;  %v4125_v12 = vor.u32 %v4895_v48, %v4122_v8  ;;  %v4923_v48 = vld [vmem:[%s7391_s7 + $0x3a4] sm:$0xf] }
 0x1b4   :  { %2603 = vmatpush.bf16.msra.mxu0 %v4441_v62  ;;  %v4879_v62 = vld [vmem:[%s7391_s7 + $0x244] sm:$0xf] }
 0x1b5   :  { %v1285_v13 = vmul.f32 1.442695, %v1278_v25  ;;  %2590 = vmatpush.bf16.msrb.mxu2 %v4313_v19  ;;  %v4424_v25 = vld [vmem:[%s7391_s7 + $0x520] sm:$0xf]  ;;  %v4875_v8 = vld [vmem:[%s7391_s7 + $0x224] sm:$0xf] }
 0x1b6   :  { %v4425_v10 = vor.u32 %v4973_v6, %v4424_v25 }
 0x1b7   :  { %5043 = vpow2.f32 %v1285_v13 }
 0x1b8   :  { %v1035_v23 = vpop.f32.mrf.mxu2  ;;  %2604 = vmatpush.bf16.msra.mxu0 %v4425_v10 }
 0x1b9   :  { %v1085_v30 = vpop.f32.mrf.mxu1  ;;  %2591 = vmatpush.bf16.msrb.mxu2 %v4297_v36  ;;  %v4106_v23 = vld [vmem:[%s7391_s7 + $0x2b0] sm:$0xf0] }
 0x1ba   :  { %v1098_v31 = vpop.f32.mrf.mxu3  ;;  %v1086_v45 = vadd.f32 %v1085_v30, %v335_v29  ;;  %v4109_v28 = vor.u32 %v4891_v22, %v4106_v23  ;;  %v4266_v36 = vld [vmem:[%s7391_s7 + $0x3f0] sm:$0xf0] }
 0x1bb   :  { %v1074_v35 = vpop.f32.mrf.mxu0 }
 0x1bc   :  { %v1099_v0 = vadd.f32 %v1098_v31, %v1086_v45  ;;  %v4887_v31 = vld [vmem:[%s7391_s7 + $0x284] sm:$0xf]  ;;  %2605 = vmatpush.bf16.msra.mxu0 %v4409_v26  ;;  %v4553_v45 = vor.u32 %v5005_v39, %v4552_v38  ;;  %v4202_v38 = vld [vmem:[%s7391_s7 + $0x370] sm:$0xf0] }
 0x1bd   :  { %v5044_v42 = vpop.eup %5043  ;;  %2592 = vmatpush.bf16.msrb.mxu2 %v4281_v55  ;;  %v4093_v33 = vor.u32 %v4887_v31, %v4090_v32  ;;  %v4931_v35 = vld [vmem:[%s7391_s7 + $0x3e4] sm:$0xf]  ;;  %v3978_v31 = vld [vmem:[%s7391_s7 + $0x1b0] sm:$0xf0] }
 0x1be   :  { %v3759_v44 = vadd.f32 -1.0, %v5044_v42  ;;  %v4927_v55 = vld [vmem:[%s7391_s7 + $0x3c4] sm:$0xf]  ;;  %2617 = vmatpush.bf16.msrb.mxu1 %v4553_v45 }
 0x1bf   :  { %v4253_v6 = vor.u32 %v4927_v55, %v4250_v27  ;;  %v4871_v26 = vld [vmem:[%s7391_s7 + $0x204] sm:$0xf]  ;;  %v3946_v27 = vld [vmem:[%s7391_s7 + $0x170] sm:$0xf0] }
 0x1c0   :  { %v1306_v53 = vsel %vm1271_vm7, %v6239_v63, %v3759_v44  ;;  %v1059_v54 = vpop.f32.mrf.mxu2  ;;  %v4141_v63 = vor.u32 %v4899_v57, %v4138_v58  ;;  %v4851_v55 = vld [vmem:[%s7391_s7 + $0x164] sm:$0xf] }
 0x1c1   :  { %v6333_v59 = vpack.c.bf16 %v1306_v53, %v1306_v53  ;;  %v1060_v60 = vadd.f32 %v1059_v54, %v1047_v49  ;;  %v1087_v61 = vpop.f32.mrf.mxu1  ;;  %v4269_v54 = vor.u32 %v4931_v35, %v4266_v36 }
 0x1c2   :  { %v1100_v1 = vpop.f32.mrf.mxu3  ;;  %v5001_v61 = vld [vmem:[%s7391_s7 + $0x60c] sm:$0xf0] }
 0x1c3   :  { %v1073_v3 = vadd.f32 %v6251_v5, %v1060_v60  ;;  %2541 = vmatmul.bf16.vlgmr.msra.gmra.mxu2 %v6333_v59  ;;  %v1111_v4 = vpop.f32.mrf.mxu0  ;;  %v3789_v5 = vor.u32 %v4811_v43, %v3786_v2  ;;  %v4536_v60 = vld [vmem:[%s7391_s7 + $0x600] sm:$0xf]  ;;  %v4058_v43 = vld [vmem:[%s7391_s7 + $0x250] sm:$0xf0] }
 0x1c4   :  { %v6352_v7 = vadd.f32 %v1111_v4, %v1099_v0  ;;  %2650 = vmatpush.bf16.msra.mxu2 %v4141_v63  ;;  %v4537_v1 = vor.u32 %v5001_v61, %v4536_v60  ;;  %v4061_v2 = vor.u32 %v4879_v62, %v4058_v43  ;;  %v4010_v4 = vld [vmem:[%s7391_s7 + $0x1f0] sm:$0xf0]  ;;  %v3949_v61 = vor.u32 %v4851_v55, %v3946_v27 }
 0x1c5   :  { %v1279_v9 = vmin.f32 %v1073_v3, 0.0  ;;  %2630 = vmatpush.bf16.msrb.mxu3 %v3789_v5  ;;  %vm1272_vm8 = vcmp.gt.f32.partialorder %v1073_v3, 0.0  ;;  %v4234_v5 = vld [vmem:[%s7391_s7 + $0x3b0] sm:$0xf0] }
 0x1c6   :  { %v1280_v13 = vmin.f32 %v6352_v7, 0.0  ;;  %vm1273_vm9 = vcmp.gt.f32.partialorder %v6352_v7, 0.0  ;;  %2618 = vmatpush.bf16.msrb.mxu1 %v4537_v1  ;;  %v4378_v1 = vld [vmem:[%s7391_s7 + $0x4d0] sm:$0xf0] }
 0x1c7   :  { %v1287_v16 = vmul.f32 1.442695, %v1279_v9  ;;  %v4042_v9 = vld [vmem:[%s7391_s7 + $0x230] sm:$0xf0] }
 0x1c8   :  { %v1289_v19 = vmul.f32 1.442695, %v1280_v13  ;;  %v1061_v20 = vpop.f32.mrf.mxu2  ;;  %2651 = vmatpush.bf16.msra.mxu2 %v4125_v12  ;;  %v4863_v13 = vld [vmem:[%s7391_s7 + $0x1c4] sm:$0xf]  ;;  %v4045_v15 = vor.u32 %v4875_v8, %v4042_v9  ;;  %v4362_v8 = vld [vmem:[%s7391_s7 + $0x4b0] sm:$0xf0] }
 0x1c9   :  { %5045 = vpow2.f32 %v1287_v16  ;;  %v1150_v24 = vpop.f32.mrf.mxu1  ;;  %2631 = vmatpush.bf16.msrb.mxu3 %v3773_v21  ;;  %v3994_v16 = vld [vmem:[%s7391_s7 + $0x1d0] sm:$0xf0]  ;;  %v4237_v20 = vor.u32 %v4923_v48, %v4234_v5  ;;  %v4919_v21 = vld [vmem:[%s7391_s7 + $0x384] sm:$0xf] }
 0x1ca   :  { %5047 = vpow2.f32 %v1289_v19  ;;  %v6376_v29 = vpop.f32.mrf.mxu3  ;;  %v3997_v22 = vor.u32 %v4863_v13, %v3994_v16  ;;  %v4955_v5 = vld [vmem:[%s7391_s7 + $0x4a4] sm:$0xf] }
 0x1cb   :  { %v1113_v30 = vpop.f32.mrf.mxu0  ;;  %v1164_v32 = vadd.f32 %v6376_v29, %v337_v14  ;;  %v4855_v29 = vld [vmem:[%s7391_s7 + $0x184] sm:$0xf] }
 0x1cc   :  { %2652 = vmatpush.bf16.msra.mxu2 %v4109_v28  ;;  %v4026_v28 = vld [vmem:[%s7391_s7 + $0x210] sm:$0xf0]  ;;  %v4859_v30 = vld [vmem:[%s7391_s7 + $0x1a4] sm:$0xf] }
 0x1cd   :  { %v4843_v14 = vld [vmem:[%s7391_s7 + $0x124] sm:$0xf] }
 0x1cf   :  { %v5046_v37 = vpop.eup %5045 }
 0x1d0   :  { %v5048_v41 = vpop.eup %5047  ;;  %v3760_v42 = vadd.f32 -1.0, %v5046_v37  ;;  %v1124_v44 = vpop.f32.mrf.mxu2  ;;  %2653 = vmatpush.bf16.msra.mxu2 %v4093_v33  ;;  %v4029_v33 = vor.u32 %v4871_v26, %v4026_v28  ;;  %v4915_v37 = vld [vmem:[%s7391_s7 + $0x364] sm:$0xf]  ;;  %v4346_v26 = vld [vmem:[%s7391_s7 + $0x490] sm:$0xf0] }
 0x1d1   :  { %v3761_v47 = vadd.f32 -1.0, %v5048_v41  ;;  %v1152_v49 = vpop.f32.mrf.mxu1  ;;  %v1125_v52 = vadd.f32 %v1124_v44, %v336_v34  ;;  %v3981_v34 = vor.u32 %v4859_v30, %v3978_v31 }
 0x1d2   :  { %v1307_v51 = vsel %vm1272_vm8, %v1073_v3, %v3760_v42  ;;  %v1165_v53 = vpop.f32.mrf.mxu3  ;;  %v4867_v3 = vld [vmem:[%s7391_s7 + $0x1e4] sm:$0xf]  ;;  %v3965_v42 = vor.u32 %v4855_v29, %v3962_v40  ;;  %v4394_v49 = vld [vmem:[%s7391_s7 + $0x4f0] sm:$0xf0] }
 0x1d3   :  { %v6410_v56 = vpack.c.bf16 %v1307_v51, %v1307_v51  ;;  %v1308_v57 = vsel %vm1273_vm9, %v6352_v7, %v3761_v47  ;;  %v1137_v58 = vpop.f32.mrf.mxu0  ;;  %v4013_v7 = vor.u32 %v4867_v3, %v4010_v4  ;;  %v4963_v47 = vld [vmem:[%s7391_s7 + $0x4e4] sm:$0xf]  ;;  %v4170_v3 = vld [vmem:[%s7391_s7 + $0x330] sm:$0xf0] }
 0x1d4   :  { %v6422_v63 = vpack.c.bf16 %v1308_v57, %v1308_v57  ;;  %v1138_v0 = vadd.f32 %v1137_v58, %v1125_v52  ;;  %2654 = vmatpush.bf16.msra.mxu2 %v4077_v50  ;;  %v4205_v50 = vor.u32 %v4915_v37, %v4202_v38  ;;  %v4911_v53 = vld [vmem:[%s7391_s7 + $0x344] sm:$0xf]  ;;  %v4397_v60 = vor.u32 %v4963_v47, %v4394_v49 }
 0x1d5   :  { %2554 = vmatmul.bf16.vlgmr.msrb.gmra.mxu0 %v6410_v56  ;;  %v4999_v38 = vld [vmem:[%s7391_s7 + $0x604] sm:$0xf] }
 0x1d6   :  { %v6434_v25 = vadd.f32 %v1150_v24, %v1138_v0  ;;  %2567 = vmatmul.bf16.vlgmr.msra.gmra.mxu1 %v6422_v63  ;;  %2663 = vmatpush.bf16.msrb.mxu0 %v4269_v54  ;;  %v4218_v24 = vld [vmem:[%s7391_s7 + $0x390] sm:$0xf0]  ;;  %v4959_v0 = vld [vmem:[%s7391_s7 + $0x4c4] sm:$0xf] }
 0x1d7   :  { %2637 = vmatpush.bf16.msra.mxu1 %v4013_v7  ;;  %v4221_v35 = vor.u32 %v4919_v21, %v4218_v24  ;;  %v4186_v54 = vld [vmem:[%s7391_s7 + $0x350] sm:$0xf0]  ;;  %v4381_v48 = vor.u32 %v4959_v0, %v4378_v1  ;;  %v4951_v24 = vld [vmem:[%s7391_s7 + $0x484] sm:$0xf]  ;;  %v4016_v0 = vld [vmem:[%s7391_s7 + $0x1e8] sm:$0xf] }
 0x1d8   :  { %v1281_v10 = vmin.f32 %v6434_v25, 0.0  ;;  %v1126_v12 = vpop.f32.mrf.mxu2  ;;  %2655 = vmatpush.bf16.msra.mxu2 %v4061_v2  ;;  %vm1274_vm10 = vcmp.gt.f32.partialorder %v6434_v25, 0.0  ;;  %v4189_v43 = vor.u32 %v4911_v53, %v4186_v54  ;;  %v4907_v2 = vld [vmem:[%s7391_s7 + $0x324] sm:$0xf]  ;;  %v4554_v21 = vld [vmem:[%s7391_s7 + $0x630] sm:$0xf0]  ;;  %v4349_v37 = vor.u32 %v4951_v24, %v4346_v26 }
 0x1d9   :  { %v1176_v18 = vpop.f32.mrf.mxu1  ;;  %v4173_v9 = vor.u32 %v4907_v2, %v4170_v3  ;;  %v4154_v12 = vld [vmem:[%s7391_s7 + $0x310] sm:$0xf0]  ;;  %v339_v54 = vperm.slane %v6150_v11, 6  ;;  %v4870_v1 = vld [vmem:[%s7391_s7 + $0x1f4] sm:$0xf0] }
 0x1da   :  { %v1291_v17 = vmul.f32 1.442695, %v1281_v10  ;;  %v6457_v19 = vpop.f32.mrf.mxu3  ;;  %2664 = vmatpush.bf16.msrb.mxu0 %v4253_v6  ;;  %v1177_v36 = vadd.f32 %v1176_v18, %v1164_v32  ;;  %v3930_v6 = vld [vmem:[%s7391_s7 + $0x150] sm:$0xf0]  ;;  %v4903_v10 = vld [vmem:[%s7391_s7 + $0x304] sm:$0xf]  ;;  %v4365_v18 = vor.u32 %v4955_v5, %v4362_v8 }
 0x1db   :  { %v1139_v23 = vpop.f32.mrf.mxu0  ;;  %2638 = vmatpush.bf16.msra.mxu1 %v3997_v22  ;;  %v4157_v28 = vor.u32 %v4903_v10, %v4154_v12  ;;  %v4935_v2 = vld [vmem:[%s7391_s7 + $0x404] sm:$0xf]  ;;  %v4282_v3 = vld [vmem:[%s7391_s7 + $0x410] sm:$0xf0]  ;;  %v3888_v5 = vld [vmem:[%s7391_s7 + $0xe8] sm:$0xf] }
 0x1dc   :  { %5049 = vpow2.f32 %v1291_v17  ;;  %2656 = vmatpush.bf16.msra.mxu2 %v4045_v15  ;;  %v3914_v15 = vld [vmem:[%s7391_s7 + $0x130] sm:$0xf0]  ;;  %v338_v17 = vperm.slane %v6150_v11, 5  ;;  %v4285_v10 = vor.u32 %v4935_v2, %v4282_v3  ;;  %v4838_v12 = vld [vmem:[%s7391_s7 + $0xf4] sm:$0xf0] }
 0x1dd   :  { %v3917_v22 = vor.u32 %v4843_v14, %v3914_v15  ;;  %v4866_v14 = vld [vmem:[%s7391_s7 + $0x1d4] sm:$0xf0]  ;;  %v3872_v24 = vld [vmem:[%s7391_s7 + $0xc8] sm:$0xf]  ;;  %v4506_v3 = vld [vmem:[%s7391_s7 + $0x5d0] sm:$0xf0] }
 0x1de   :  { %2665 = vmatpush.bf16.msrb.mxu0 %v4237_v20  ;;  %v5003_v20 = vld [vmem:[%s7391_s7 + $0x624] sm:$0xf]  ;;  %v4834_v26 = vld [vmem:[%s7391_s7 + $0xd4] sm:$0xf0] }
 0x1df   :  { %2639 = vmatpush.bf16.msra.mxu1 %v3981_v34  ;;  %v4557_v32 = vor.u32 %v5003_v20, %v4554_v21  ;;  %v3898_v34 = vld [vmem:[%s7391_s7 + $0x110] sm:$0xf0]  ;;  %v4898_v20 = vld [vmem:[%s7391_s7 + $0x2d4] sm:$0xf0] }
 0x1e0   :  { %v1189_v39 = vpop.f32.mrf.mxu2  ;;  %2657 = vmatpush.bf16.msra.mxu2 %v4029_v33  ;;  %v4839_v33 = vld [vmem:[%s7391_s7 + $0x104] sm:$0xf] }
 0x1e1   :  { %v1190_v41 = vadd.f32 %v1189_v39, %v1177_v36  ;;  %v1178_v45 = vpop.f32.mrf.mxu1  ;;  %v4538_v39 = vld [vmem:[%s7391_s7 + $0x610] sm:$0xf0]  ;;  %v3901_v29 = vor.u32 %v4839_v33, %v3898_v34  ;;  %v4112_v34 = vld [vmem:[%s7391_s7 + $0x2a8] sm:$0xf] }
 0x1e2   :  { %v5050_v44 = vpop.eup %5049  ;;  %v1230_v46 = vpop.f32.mrf.mxu3  ;;  %2666 = vmatpush.bf16.msrb.mxu0 %v4221_v35 }
 0x1e3   :  { %v3762_v51 = vadd.f32 -1.0, %v5050_v44  ;;  %v1282_v52 = vmin.f32 %v1190_v41, 0.0  ;;  %2640 = vmatpush.bf16.msra.mxu1 %v3965_v42  ;;  %vm1275_vm11 = vcmp.gt.f32.partialorder %v1190_v41, 0.0  ;;  %v4330_v42 = vld [vmem:[%s7391_s7 + $0x470] sm:$0xf0]  ;;  %v4541_v46 = vor.u32 %v4999_v38, %v4538_v39 }
 0x1e4   :  { %v3873_v38 = vor.u32 %v4834_v26, %v3872_v24  ;;  %v4983_v26 = vld [vmem:[%s7391_s7 + $0x584] sm:$0xf] }
 0x1e5   :  { %v1309_v57 = vsel %vm1274_vm10, %v6434_v25, %v3762_v51  ;;  %v1293_v58 = vmul.f32 1.442695, %v1282_v52  ;;  %v4847_v25 = vld [vmem:[%s7391_s7 + $0x144] sm:$0xf]  ;;  %v4314_v52 = vld [vmem:[%s7391_s7 + $0x450] sm:$0xf0] }
 0x1e6   :  { %v6510_v62 = vpack.c.bf16 %v1309_v57, %v1309_v57  ;;  %2667 = vmatpush.bf16.msrb.mxu0 %v4205_v50  ;;  %v3933_v7 = vor.u32 %v4847_v25, %v3930_v6  ;;  %v4943_v51 = vld [vmem:[%s7391_s7 + $0x444] sm:$0xf]  ;;  %v4144_v25 = vld [vmem:[%s7391_s7 + $0x2e8] sm:$0xf]  ;;  %v4902_v6 = vld [vmem:[%s7391_s7 + $0x2f4] sm:$0xf0] }
 0x1e7   :  { %5051 = vpow2.f32 %v1293_v58  ;;  %2641 = vmatpush.bf16.msra.mxu1 %v3949_v61  ;;  %v4939_v58 = vld [vmem:[%s7391_s7 + $0x424] sm:$0xf] }
 0x1e8   :  { %v1191_v4 = vpop.f32.mrf.mxu2  ;;  %2580 = vmatmul.bf16.vlgmr.msra.gmra.mxu3 %v6510_v62 }
 0x1e9   :  { %2676 = vmatpush.bf16.msra.mxu3 %v4397_v60  ;;  %v4298_v60 = vld [vmem:[%s7391_s7 + $0x430] sm:$0xf0] }
 0x1ea   :  { %2668 = vmatpush.bf16.msrb.mxu0 %v4189_v43  ;;  %v4301_v11 = vor.u32 %v4939_v58, %v4298_v60  ;;  %v4080_v58 = vld [vmem:[%s7391_s7 + $0x268] sm:$0xf]  ;;  %v4886_v60 = vld [vmem:[%s7391_s7 + $0x274] sm:$0xf0] }
 0x1eb   :  { %2642 = vmatpush.bf16.msra.mxu1 %v3933_v7  ;;  %v4017_v7 = vor.u32 %v4870_v1, %v4016_v0  ;;  %v4991_v1 = vld [vmem:[%s7391_s7 + $0x5c4] sm:$0xf] }
 0x1ed   :  { %v5052_v16 = vpop.eup %5051  ;;  %2677 = vmatpush.bf16.msra.mxu3 %v4381_v48 }
 0x1ee   :  { %v3763_v23 = vadd.f32 -1.0, %v5052_v16  ;;  %2669 = vmatpush.bf16.msrb.mxu0 %v4173_v9  ;;  %v4145_v16 = vor.u32 %v4902_v6, %v4144_v25  ;;  %v4822_v25 = vld [vmem:[%s7391_s7 + $0x74] sm:$0xf0]  ;;  %v4081_v6 = vor.u32 %v4886_v60, %v4080_v58 }
 0x1ef   :  { %2643 = vmatpush.bf16.msra.mxu1 %v3917_v22  ;;  %v3889_v22 = vor.u32 %v4838_v12, %v3888_v5  ;;  %v4064_v5 = vld [vmem:[%s7391_s7 + $0x248] sm:$0xf]  ;;  %v4987_v12 = vld [vmem:[%s7391_s7 + $0x5a4] sm:$0xf] }
 0x1f0   :  { %v1310_v30 = vsel %vm1275_vm11, %v1190_v41, %v3763_v23  ;;  %v4947_v41 = vld [vmem:[%s7391_s7 + $0x464] sm:$0xf] }
 0x1f1   :  { %v6570_v35 = vpack.c.bf16 %v1310_v30, %v1310_v30  ;;  %2678 = vmatpush.bf16.msra.mxu3 %v4365_v18  ;;  %v4333_v49 = vor.u32 %v4947_v41, %v4330_v42  ;;  %v4128_v18 = vld [vmem:[%s7391_s7 + $0x2c8] sm:$0xf]  ;;  %v4858_v42 = vld [vmem:[%s7391_s7 + $0x194] sm:$0xf0] }
 0x1f2   :  { %v6543_v13 = vpop.f32.mrf.mxu3  ;;  %2670 = vmatpush.bf16.msrb.mxu0 %v4157_v28  ;;  %v4129_v33 = vor.u32 %v4898_v20, %v4128_v18  ;;  %v3968_v41 = vld [vmem:[%s7391_s7 + $0x188] sm:$0xf]  ;;  %v4846_v20 = vld [vmem:[%s7391_s7 + $0x134] sm:$0xf0] }
 0x1f3   :  { %v1202_v31 = vpop.f32.mrf.mxu0  ;;  %2593 = vmatmul.bf16.vlgmr.msrb.gmra.mxu2 %v6570_v35  ;;  %2644 = vmatpush.bf16.msra.mxu1 %v3901_v29  ;;  %v3856_v29 = vld [vmem:[%s7391_s7 + $0xa8] sm:$0xf] }
 0x1f4   :  { %v1203_v36 = vadd.f32 %v1202_v31, %v338_v17  ;;  %2708 = vmatpush.bf16.msrb.mxu2 %v4557_v32  ;;  %v3984_v31 = vld [vmem:[%s7391_s7 + $0x1a8] sm:$0xf]  ;;  %v4862_v32 = vld [vmem:[%s7391_s7 + $0x1b4] sm:$0xf0] }
 0x1f5   :  { %2679 = vmatpush.bf16.msra.mxu3 %v4349_v37  ;;  %v3985_v39 = vor.u32 %v4862_v32, %v3984_v31  ;;  %v3920_v18 = vld [vmem:[%s7391_s7 + $0x128] sm:$0xf]  ;;  %v4474_v31 = vld [vmem:[%s7391_s7 + $0x590] sm:$0xf0] }
 0x1f6   :  { %v3792_v32 = vld [vmem:[%s7391_s7 + $0x28] sm:$0xf] }
 0x1f8   :  { %v1215_v40 = vpop.f32.mrf.mxu2  ;;  %2632 = vmatmul.bf16.vlgmr.msrb.gmra.mxu3 %v6333_v59  ;;  %2709 = vmatpush.bf16.msrb.mxu2 %v4541_v46  ;;  %v4890_v46 = vld [vmem:[%s7391_s7 + $0x294] sm:$0xf0] }
 0x1f9   :  { %v1216_v44 = vadd.f32 %v1215_v40, %v1203_v36  ;;  %v1241_v50 = vpop.f32.mrf.mxu1  ;;  %2680 = vmatpush.bf16.msra.mxu3 %v4333_v49  ;;  %v4894_v36 = vld [vmem:[%s7391_s7 + $0x2b4] sm:$0xf0]  ;;  %v3969_v49 = vor.u32 %v4858_v42, %v3968_v41  ;;  %v4477_v41 = vor.u32 %v4983_v26, %v4474_v31  ;;  %v4967_v26 = vld [vmem:[%s7391_s7 + $0x504] sm:$0xf] }
 0x1fa   :  { %v1256_v45 = vpop.f32.mrf.mxu3  ;;  %v1242_v61 = vadd.f32 %v1241_v50, %v339_v54  ;;  %v4830_v40 = vld [vmem:[%s7391_s7 + $0xb4] sm:$0xf0]  ;;  %v4995_v50 = vld [vmem:[%s7391_s7 + $0x5e4] sm:$0xf] }
 0x1fb   :  { %v1229_v47 = vadd.f32 %v6457_v19, %v1216_v44  ;;  %v1204_v55 = vpop.f32.mrf.mxu0  ;;  %v4317_v19 = vor.u32 %v4943_v51, %v4314_v52  ;;  %v4113_v44 = vor.u32 %v4894_v36, %v4112_v34  ;;  %v4096_v45 = vld [vmem:[%s7391_s7 + $0x288] sm:$0xf]  ;;  %v4522_v52 = vld [vmem:[%s7391_s7 + $0x5f0] sm:$0xf0]  ;;  %v4826_v54 = vld [vmem:[%s7391_s7 + $0x94] sm:$0xf0] }
 0x1fc   :  { %v1255_v4 = vadd.f32 %v6543_v13, %v1242_v61  ;;  %v4000_v13 = vld [vmem:[%s7391_s7 + $0x1c8] sm:$0xf] }
 0x1fd   :  { %v1283_v53 = vmin.f32 %v1229_v47, 0.0  ;;  %2681 = vmatpush.bf16.msra.mxu3 %v4317_v19  ;;  %vm1276_vm12 = vcmp.gt.f32.partialorder %v1229_v47, 0.0  ;;  %v4001_v23 = vor.u32 %v4866_v14, %v4000_v13  ;;  %v3952_v19 = vld [vmem:[%s7391_s7 + $0x168] sm:$0xf]  ;;  %v4490_v14 = vld [vmem:[%s7391_s7 + $0x5b0] sm:$0xf0] }
 0x1fe   :  { %v3904_v36 = vld [vmem:[%s7391_s7 + $0x108] sm:$0xf] }
 0x1ff   :  { %v1295_v27 = vmul.f32 1.442695, %v1283_v53  ;;  %v3840_v53 = vld [vmem:[%s7391_s7 + $0x88] sm:$0xf] }
 0x200   :  { %v1217_v57 = vpop.f32.mrf.mxu2  ;;  %v3841_v0 = vor.u32 %v4826_v54, %v3840_v53  ;;  %v4400_v54 = vld [vmem:[%s7391_s7 + $0x4e8] sm:$0xf] }
 0x201   :  { %5053 = vpow2.f32 %v1295_v27  ;;  %v1243_v43 = vpop.f32.mrf.mxu1  ;;  %2682 = vmatpush.bf16.msra.mxu3 %v4301_v11  ;;  %v4097_v27 = vor.u32 %v4890_v46, %v4096_v45  ;;  %v4854_v57 = vld [vmem:[%s7391_s7 + $0x174] sm:$0xf0]  ;;  %v4525_v11 = vor.u32 %v4995_v50, %v4522_v52  ;;  %v4560_v45 = vld [vmem:[%s7391_s7 + $0x628] sm:$0xf] }
 0x202   :  { %v3953_v2 = vor.u32 %v4854_v57, %v3952_v19  ;;  %v5006_v46 = vld [vmem:[%s7391_s7 + $0x634] sm:$0xf0]  ;;  %v3776_v50 = vld [vmem:[%s7391_s7 + $0x8] sm:$0xf] }
 0x203   :  { %v1267_v48 = vpop.f32.mrf.mxu0  ;;  %2658 = vmatmul.bf16.vlgmr.msra.gmra.mxu2 %v6422_v63  ;;  %v4512_v19 = vld [vmem:[%s7391_s7 + $0x5c8] sm:$0xf]  ;;  %v4994_v57 = vld [vmem:[%s7391_s7 + $0x5d4] sm:$0xf0] }
 0x204   :  { %v1268_v9 = vadd.f32 %v1267_v48, %v1255_v4  ;;  %2728 = vmatpush.bf16.msra.mxu2 %v4017_v7  ;;  %v3824_v4 = vld [vmem:[%s7391_s7 + $0x68] sm:$0xf]  ;;  %v4850_v7 = vld [vmem:[%s7391_s7 + $0x154] sm:$0xf0] }
 0x205   :  { %2683 = vmatpush.bf16.msra.mxu3 %v4285_v10  ;;  %v3936_v48 = vld [vmem:[%s7391_s7 + $0x148] sm:$0xf]  ;;  %v3825_v10 = vor.u32 %v4822_v25, %v3824_v4  ;;  %v4018_v4 = vld [vmem:[%s7391_s7 + $0x1f8] sm:$0xf0]  ;;  %v4513_v25 = vor.u32 %v4994_v57, %v4512_v19 }
 0x206   :  { %v1284_v17 = vmin.f32 %v1268_v9, 0.0  ;;  %vm1277_vm13 = vcmp.gt.f32.partialorder %v1268_v9, 0.0  ;;  %v3937_v13 = vor.u32 %v4850_v7, %v3936_v48  ;;  %v4962_v48 = vld [vmem:[%s7391_s7 + $0x4d4] sm:$0xf0] }
 0x207   :  { %v5054_v8 = vpop.eup %5053 }
 0x208   :  { %v3764_v15 = vadd.f32 -1.0, %v5054_v8  ;;  %v1297_v30 = vmul.f32 1.442695, %v1284_v17  ;;  %2729 = vmatpush.bf16.msra.mxu2 %v4001_v23  ;;  %2684 = vmatmul.bf16.vlgmr.msra.gmra.mxu3 %v6570_v35  ;;  %v4882_v8 = vld [vmem:[%s7391_s7 + $0x254] sm:$0xf0]  ;;  %v4493_v23 = vor.u32 %v4987_v12, %v4490_v14 }
 0x209   :  { %2741 = vmatpush.bf16.msrb.mxu3 %v4145_v16  ;;  %v4818_v16 = vld [vmem:[%s7391_s7 + $0x54] sm:$0xf0]  ;;  %v4065_v17 = vor.u32 %v4882_v8, %v4064_v5  ;;  %v4496_v5 = vld [vmem:[%s7391_s7 + $0x5a8] sm:$0xf]  ;;  %v4971_v12 = vld [vmem:[%s7391_s7 + $0x524] sm:$0xf] }
 0x20a   :  { %v1311_v21 = vsel %vm1276_vm12, %v1229_v47, %v3764_v15  ;;  %5055 = vpow2.f32 %v1297_v30  ;;  %v3857_v47 = vor.u32 %v4830_v40, %v3856_v29  ;;  %v3808_v15 = vld [vmem:[%s7391_s7 + $0x48] sm:$0xf]  ;;  %v3921_v30 = vor.u32 %v4846_v20, %v3920_v18  ;;  %v4874_v40 = vld [vmem:[%s7391_s7 + $0x214] sm:$0xf0]  ;;  %v4426_v14 = vld [vmem:[%s7391_s7 + $0x530] sm:$0xf0] }
 0x20b   :  { %v6644_v28 = vpack.c.bf16 %v1311_v21, %v1311_v21  ;;  %v1269_v37 = vpop.f32.mrf.mxu0  ;;  %v4048_v21 = vld [vmem:[%s7391_s7 + $0x228] sm:$0xf]  ;;  %v3809_v24 = vor.u32 %v4818_v16, %v3808_v15  ;;  %v4990_v8 = vld [vmem:[%s7391_s7 + $0x5b4] sm:$0xf0]  ;;  %v4864_v15 = vld [vmem:[%s7391_s7 + $0x1cc] sm:$0xf] }
 0x20c   :  { %2730 = vmatpush.bf16.msra.mxu2 %v3985_v39  ;;  %v4842_v37 = vld [vmem:[%s7391_s7 + $0x114] sm:$0xf0]  ;;  %v4032_v29 = vld [vmem:[%s7391_s7 + $0x208] sm:$0xf]  ;;  %v4002_v16 = vld [vmem:[%s7391_s7 + $0x1d8] sm:$0xf0] }
 0x20d   :  { %2606 = vmatmul.bf16.vlgmr.msra.gmra.mxu0 %v6644_v28  ;;  %2742 = vmatpush.bf16.msrb.mxu3 %v4129_v33  ;;  %v4814_v33 = vld [vmem:[%s7391_s7 + $0x34] sm:$0xf0]  ;;  %v4033_v53 = vor.u32 %v4874_v40, %v4032_v29  ;;  %v4368_v18 = vld [vmem:[%s7391_s7 + $0x4a8] sm:$0xf] }
 0x20e   :  { %2715 = vmatpush.bf16.msra.mxu0 %v3889_v22  ;;  %v4878_v22 = vld [vmem:[%s7391_s7 + $0x234] sm:$0xf0]  ;;  %v3793_v42 = vor.u32 %v4814_v33, %v3792_v32  ;;  %v4272_v32 = vld [vmem:[%s7391_s7 + $0x3e8] sm:$0xf]  ;;  %v4860_v33 = vld [vmem:[%s7391_s7 + $0x1ac] sm:$0xf] }
 0x20f   :  { %v4049_v34 = vor.u32 %v4878_v22, %v4048_v21  ;;  %v4998_v39 = vld [vmem:[%s7391_s7 + $0x5f4] sm:$0xf0]  ;;  %v4480_v21 = vld [vmem:[%s7391_s7 + $0x588] sm:$0xf] }
 0x210   :  { %v5056_v51 = vpop.eup %5055  ;;  %2731 = vmatpush.bf16.msra.mxu2 %v3969_v49  ;;  %v4458_v49 = vld [vmem:[%s7391_s7 + $0x570] sm:$0xf0]  ;;  %v4958_v20 = vld [vmem:[%s7391_s7 + $0x4b4] sm:$0xf0]  ;;  %v4464_v29 = vld [vmem:[%s7391_s7 + $0x568] sm:$0xf] }
 0x211   :  { %v3765_v55 = vadd.f32 -1.0, %v5056_v51  ;;  %2743 = vmatpush.bf16.msrb.mxu3 %v4113_v44  ;;  %v4979_v44 = vld [vmem:[%s7391_s7 + $0x564] sm:$0xf]  ;;  %v4810_v51 = vld [vmem:[%s7391_s7 + $0x14] sm:$0xf0]  ;;  %v4369_v31 = vor.u32 %v4958_v20, %v4368_v18 }
 0x212   :  { %2716 = vmatpush.bf16.msra.mxu0 %v3873_v38  ;;  %v4528_v38 = vld [vmem:[%s7391_s7 + $0x5e8] sm:$0xf]  ;;  %v4461_v58 = vor.u32 %v4979_v44, %v4458_v49  ;;  %v3777_v60 = vor.u32 %v4810_v51, %v3776_v50  ;;  %v4986_v22 = vld [vmem:[%s7391_s7 + $0x594] sm:$0xf0]  ;;  %v3970_v49 = vld [vmem:[%s7391_s7 + $0x198] sm:$0xf0] }
 0x213   :  { %v1312_v61 = vsel %vm1277_vm13, %v1268_v9, %v3765_v55  ;;  %v4509_v9 = vor.u32 %v4991_v1, %v4506_v3  ;;  %v4529_v52 = vor.u32 %v4998_v39, %v4528_v38  ;;  %v4966_v55 = vld [vmem:[%s7391_s7 + $0x4f4] sm:$0xf0]  ;;  %v4868_v3 = vld [vmem:[%s7391_s7 + $0x1ec] sm:$0xf]  ;;  %v4352_v38 = vld [vmem:[%s7391_s7 + $0x488] sm:$0xf] }
 0x214   :  { %v6705_v43 = vpack.c.bf16 %v1312_v61, %v1312_v61  ;;  %2732 = vmatpush.bf16.msra.mxu2 %v3953_v2  ;;  %v4975_v61 = vld [vmem:[%s7391_s7 + $0x544] sm:$0xf]  ;;  %v4401_v1 = vor.u32 %v4966_v55, %v4400_v54  ;;  %v4442_v2 = vld [vmem:[%s7391_s7 + $0x550] sm:$0xf0]  ;;  %v4954_v39 = vld [vmem:[%s7391_s7 + $0x494] sm:$0xf0] }
 0x215   :  { %2744 = vmatpush.bf16.msrb.mxu3 %v4097_v27  ;;  %v4561_v27 = vor.u32 %v5006_v46, %v4560_v45  ;;  %v4982_v40 = vld [vmem:[%s7391_s7 + $0x574] sm:$0xf0]  ;;  %v4353_v45 = vor.u32 %v4954_v39, %v4352_v38  ;;  %v4256_v46 = vld [vmem:[%s7391_s7 + $0x3c8] sm:$0xf]  ;;  %v4274_v18 = vld [vmem:[%s7391_s7 + $0x3f8] sm:$0xf0] }
 0x216   :  { %2717 = vmatpush.bf16.msra.mxu0 %v3857_v47  ;;  %4566 = vmatmul.msk.bf16.vlgmr.msrb.gmra.mxu1 %vm123_vm3, %v6705_v43  ;;  %v3905_v47 = vor.u32 %v4842_v37, %v3904_v36  ;;  %v4481_v36 = vor.u32 %v4986_v22, %v4480_v21  ;;  %v4934_v37 = vld [vmem:[%s7391_s7 + $0x3f4] sm:$0xf0]  ;;  %v4465_v50 = vor.u32 %v4982_v40, %v4464_v29  ;;  %v4448_v54 = vld [vmem:[%s7391_s7 + $0x548] sm:$0xf]  ;;  %v4844_v22 = vld [vmem:[%s7391_s7 + $0x12c] sm:$0xf] }
 0x217   :  { %4567 = vmatmul.msk.bf16.vlgmr.msrb.gmra.mxu2 %vm123_vm3, %v6705_v43  ;;  %2689 = vmatpush.bf16.msrb.mxu1 %v4525_v11  ;;  %v4544_v11 = vld [vmem:[%s7391_s7 + $0x608] sm:$0xf]  ;;  %v4273_v44 = vor.u32 %v4934_v37, %v4272_v32  ;;  %v4930_v51 = vld [vmem:[%s7391_s7 + $0x3d4] sm:$0xf0]  ;;  %v4146_v37 = vld [vmem:[%s7391_s7 + $0x2f8] sm:$0xf0] }
 0x218   :  { %2733 = vmatpush.bf16.msra.mxu2 %v3937_v13  ;;  %v4978_v55 = vld [vmem:[%s7391_s7 + $0x554] sm:$0xf0]  ;;  %v4257_v19 = vor.u32 %v4930_v51, %v4256_v46  ;;  %v4288_v32 = vld [vmem:[%s7391_s7 + $0x408] sm:$0xf]  ;;  %v4928_v38 = vld [vmem:[%s7391_s7 + $0x3cc] sm:$0xf] }
 0x219   :  { %2745 = vmatpush.bf16.msrb.mxu3 %v4081_v6  ;;  %v4384_v6 = vld [vmem:[%s7391_s7 + $0x4c8] sm:$0xf]  ;;  %v4258_v39 = vld [vmem:[%s7391_s7 + $0x3d8] sm:$0xf0]  ;;  %v4840_v40 = vld [vmem:[%s7391_s7 + $0x10c] sm:$0xf] }
 0x21a   :  { %2718 = vmatpush.bf16.msra.mxu0 %v3841_v0  ;;  %v5002_v0 = vld [vmem:[%s7391_s7 + $0x614] sm:$0xf0]  ;;  %v4385_v13 = vor.u32 %v4962_v48, %v4384_v6  ;;  %v4530_v51 = vld [vmem:[%s7391_s7 + $0x5f8] sm:$0xf0] }
 0x21b   :  { %2690 = vmatpush.bf16.msrb.mxu1 %v4509_v9  ;;  %v4545_v7 = vor.u32 %v5002_v0, %v4544_v11  ;;  %v4445_v9 = vor.u32 %v4975_v61, %v4442_v2  ;;  %v3954_v61 = vld [vmem:[%s7391_s7 + $0x178] sm:$0xf0]  ;;  %v4449_v11 = vor.u32 %v4978_v55, %v4448_v54  ;;  %v4926_v0 = vld [vmem:[%s7391_s7 + $0x3b4] sm:$0xf0]  ;;  %v4924_v54 = vld [vmem:[%s7391_s7 + $0x3ac] sm:$0xf] }
 0x21c   :  { %2734 = vmatpush.bf16.msra.mxu2 %v3921_v30  ;;  %v4410_v30 = vld [vmem:[%s7391_s7 + $0x510] sm:$0xf0]  ;;  %v4946_v2 = vld [vmem:[%s7391_s7 + $0x454] sm:$0xf0]  ;;  %v4242_v55 = vld [vmem:[%s7391_s7 + $0x3b8] sm:$0xf0] }
 0x21d   :  { %2671 = vmatmul.bf16.vlgmr.msrb.gmra.mxu0 %v6510_v62  ;;  %2746 = vmatpush.bf16.msrb.mxu3 %v4065_v17  ;;  %v4497_v17 = vor.u32 %v4990_v8, %v4496_v5  ;;  %v4848_v5 = vld [vmem:[%s7391_s7 + $0x14c] sm:$0xf]  ;;  %v3938_v8 = vld [vmem:[%s7391_s7 + $0x158] sm:$0xf0] }
 0x21e   :  { %2719 = vmatpush.bf16.msra.mxu0 %v3825_v10  ;;  %v4021_v10 = vor.u32 %v4868_v3, %v4018_v4  ;;  %v4432_v3 = vld [vmem:[%s7391_s7 + $0x528] sm:$0xf]  ;;  %v4974_v4 = vld [vmem:[%s7391_s7 + $0x534] sm:$0xf0] }
 0x21f   :  { %2691 = vmatpush.bf16.msrb.mxu1 %v4493_v23  ;;  %v4429_v23 = vor.u32 %v4971_v12, %v4426_v14  ;;  %v4304_v12 = vld [vmem:[%s7391_s7 + $0x428] sm:$0xf] }
 0x220   :  { %2735 = vmatpush.bf16.msra.mxu2 %v3905_v47  ;;  %v4856_v47 = vld [vmem:[%s7391_s7 + $0x18c] sm:$0xf]  ;;  %v4416_v14 = vld [vmem:[%s7391_s7 + $0x508] sm:$0xf] }
 0x221   :  { %2747 = vmatpush.bf16.msrb.mxu3 %v4049_v34  ;;  %v3986_v34 = vld [vmem:[%s7391_s7 + $0x1b8] sm:$0xf0] }
 0x222   :  { %2720 = vmatpush.bf16.msra.mxu0 %v3809_v24  ;;  %v4005_v24 = vor.u32 %v4864_v15, %v4002_v16  ;;  %v4970_v15 = vld [vmem:[%s7391_s7 + $0x514] sm:$0xf0]  ;;  %v3941_v16 = vor.u32 %v4848_v5, %v3938_v8  ;;  %v4836_v8 = vld [vmem:[%s7391_s7 + $0xec] sm:$0xf] }
 0x223   :  { %2692 = vmatpush.bf16.msrb.mxu1 %v4477_v41  ;;  %v4413_v41 = vor.u32 %v4967_v26, %v4410_v30  ;;  %v4208_v26 = vld [vmem:[%s7391_s7 + $0x368] sm:$0xf]  ;;  %v4918_v30 = vld [vmem:[%s7391_s7 + $0x374] sm:$0xf0] }
 0x224   :  { %2780 = vmatpush.bf16.msrb.mxu2 %v4529_v52  ;;  %v4336_v52 = vld [vmem:[%s7391_s7 + $0x468] sm:$0xf]  ;;  %v4209_v29 = vor.u32 %v4918_v30, %v4208_v26  ;;  %v4906_v5 = vld [vmem:[%s7391_s7 + $0x314] sm:$0xf0]  ;;  %v4884_v30 = vld [vmem:[%s7391_s7 + $0x26c] sm:$0xf] }
 0x225   :  { %2748 = vmatpush.bf16.msrb.mxu3 %v4033_v53  ;;  %v4950_v53 = vld [vmem:[%s7391_s7 + $0x474] sm:$0xf0] }
 0x226   :  { %2721 = vmatpush.bf16.msra.mxu0 %v3793_v42  ;;  %2645 = vmatmul.bf16.vlgmr.msra.gmra.mxu1 %v6410_v56  ;;  %v3989_v42 = vor.u32 %v4860_v33, %v3986_v34  ;;  %v4337_v57 = vor.u32 %v4950_v53, %v4336_v52  ;;  %v4938_v33 = vld [vmem:[%s7391_s7 + $0x414] sm:$0xf0]  ;;  %v4900_v34 = vld [vmem:[%s7391_s7 + $0x2ec] sm:$0xf]  ;;  %v4130_v53 = vld [vmem:[%s7391_s7 + $0x2d8] sm:$0xf0] }
 0x227   :  { %2693 = vmatpush.bf16.msrb.mxu1 %v4461_v58  ;;  %2736 = vmatmul.bf16.vlgmr.msra.gmra.mxu2 %v6410_v56  ;;  %v4240_v58 = vld [vmem:[%s7391_s7 + $0x3a8] sm:$0xf]  ;;  %v4149_v46 = vor.u32 %v4900_v34, %v4146_v37  ;;  %v4912_v34 = vld [vmem:[%s7391_s7 + $0x34c] sm:$0xf] }
 0x228   :  { %2781 = vmatpush.bf16.msrb.mxu2 %v4513_v25  ;;  %2749 = vmatmul.bf16.vlgmr.msrb.gmra.mxu3 %v6422_v63  ;;  %v4241_v6 = vor.u32 %v4926_v0, %v4240_v58  ;;  %v4910_v58 = vld [vmem:[%s7391_s7 + $0x334] sm:$0xf0]  ;;  %v4992_v0 = vld [vmem:[%s7391_s7 + $0x5cc] sm:$0xf] }
 0x229   :  { %2799 = vmatpush.bf16.msra.mxu3 %v4561_v27  ;;  %v3973_v27 = vor.u32 %v4856_v47, %v3970_v49  ;;  %v4261_v47 = vor.u32 %v4928_v38, %v4258_v39  ;;  %v4896_v49 = vld [vmem:[%s7391_s7 + $0x2cc] sm:$0xf] }
 0x22a   :  { %2722 = vmatpush.bf16.msra.mxu0 %v3777_v60  ;;  %v4852_v60 = vld [vmem:[%s7391_s7 + $0x16c] sm:$0xf] }
 0x22b   :  { %2694 = vmatpush.bf16.msrb.mxu1 %v4445_v9  ;;  %v3957_v25 = vor.u32 %v4852_v60, %v3954_v61  ;;  %v4433_v9 = vor.u32 %v4974_v4, %v4432_v3  ;;  %v4133_v60 = vor.u32 %v4896_v49, %v4130_v53  ;;  %v4245_v61 = vor.u32 %v4924_v54, %v4242_v55  ;;  %v4920_v3 = vld [vmem:[%s7391_s7 + $0x38c] sm:$0xf]  ;;  %v4226_v4 = vld [vmem:[%s7391_s7 + $0x398] sm:$0xf0] }
 0x22c   :  { %2782 = vmatpush.bf16.msrb.mxu2 %v4497_v17  ;;  %v4932_v17 = vld [vmem:[%s7391_s7 + $0x3ec] sm:$0xf]  ;;  %v3842_v55 = vld [vmem:[%s7391_s7 + $0x98] sm:$0xf0] }
 0x22d   :  { %2723 = vmatmul.bf16.vlgmr.msra.gmra.mxu0 %v6333_v59  ;;  %2800 = vmatpush.bf16.msra.mxu3 %v4545_v7  ;;  %v4224_v7 = vld [vmem:[%s7391_s7 + $0x388] sm:$0xf]  ;;  %v4908_v49 = vld [vmem:[%s7391_s7 + $0x32c] sm:$0xf] }
 0x22e   :  { %2767 = vmatpush.bf16.msrb.mxu0 %v4401_v1  ;;  %v4320_v1 = vld [vmem:[%s7391_s7 + $0x448] sm:$0xf]  ;;  %v4824_v54 = vld [vmem:[%s7391_s7 + $0x8c] sm:$0xf] }
 0x22f   :  { %2695 = vmatpush.bf16.msrb.mxu1 %v4429_v23  ;;  %v4321_v48 = vor.u32 %v4946_v2, %v4320_v1  ;;  %v3922_v23 = vld [vmem:[%s7391_s7 + $0x138] sm:$0xf0] }
 0x230   :  { %2783 = vmatpush.bf16.msrb.mxu2 %v4481_v36  ;;  %v3925_v36 = vor.u32 %v4844_v22, %v3922_v23  ;;  %v4514_v1 = vld [vmem:[%s7391_s7 + $0x5d8] sm:$0xf0] }
 0x231   :  { %2819 = vmatpush.bf16.msrb.mxu3 %v4021_v10  ;;  %v4922_v10 = vld [vmem:[%s7391_s7 + $0x394] sm:$0xf0]  ;;  %v4114_v2 = vld [vmem:[%s7391_s7 + $0x2b8] sm:$0xf0] }
 0x232   :  { %2768 = vmatpush.bf16.msrb.mxu0 %v4385_v13  ;;  %v4942_v13 = vld [vmem:[%s7391_s7 + $0x434] sm:$0xf0]  ;;  %v4225_v20 = vor.u32 %v4922_v10, %v4224_v7  ;;  %v4517_v7 = vor.u32 %v4992_v0, %v4514_v1  ;;  %v3874_v23 = vld [vmem:[%s7391_s7 + $0xd8] sm:$0xf0]  ;;  %v4904_v0 = vld [vmem:[%s7391_s7 + $0x30c] sm:$0xf] }
 0x233   :  { %2696 = vmatpush.bf16.msrb.mxu1 %v4413_v41  ;;  %v4305_v21 = vor.u32 %v4942_v13, %v4304_v12  ;;  %v3906_v41 = vld [vmem:[%s7391_s7 + $0x118] sm:$0xf0]  ;;  %v4229_v12 = vor.u32 %v4920_v3, %v4226_v4  ;;  %v4888_v13 = vld [vmem:[%s7391_s7 + $0x28c] sm:$0xf] }
 0x234   :  { %2784 = vmatpush.bf16.msrb.mxu2 %v4465_v50  ;;  %v4996_v50 = vld [vmem:[%s7391_s7 + $0x5ec] sm:$0xf]  ;;  %v3909_v52 = vor.u32 %v4840_v40, %v3906_v41  ;;  %v3858_v40 = vld [vmem:[%s7391_s7 + $0xb8] sm:$0xf0] }
 0x235   :  { %2820 = vmatpush.bf16.msrb.mxu3 %v4005_v24  ;;  %v4417_v24 = vor.u32 %v4970_v15, %v4416_v14  ;;  %v4988_v14 = vld [vmem:[%s7391_s7 + $0x5ac] sm:$0xf]  ;;  %v4498_v15 = vld [vmem:[%s7391_s7 + $0x5b8] sm:$0xf0] }
 0x236   :  { %2769 = vmatpush.bf16.msrb.mxu0 %v4369_v31  ;;  %2697 = vmatmul.bf16.vlgmr.msrb.gmra.mxu1 %v6644_v28  ;;  %v4277_v31 = vor.u32 %v4932_v17, %v4274_v18  ;;  %v4916_v17 = vld [vmem:[%s7391_s7 + $0x36c] sm:$0xf]  ;;  %v4210_v18 = vld [vmem:[%s7391_s7 + $0x378] sm:$0xf0]  ;;  %v4501_v22 = vor.u32 %v4988_v14, %v4498_v15 }
 0x237   :  { %2754 = vmatpush.bf16.msra.mxu1 %v4273_v44  ;;  %v4192_v44 = vld [vmem:[%s7391_s7 + $0x348] sm:$0xf]  ;;  %v4213_v26 = vor.u32 %v4916_v17, %v4210_v18  ;;  %v4162_v1 = vld [vmem:[%s7391_s7 + $0x318] sm:$0xf0] }
 0x238   :  { %2785 = vmatpush.bf16.msrb.mxu2 %v4449_v11  ;;  %4568 = vmatmul.msk.bf16.vlgmr.msra.gmra.mxu3 %vm123_vm3, %v6705_v43  ;;  %v4892_v11 = vld [vmem:[%s7391_s7 + $0x2ac] sm:$0xf] }
 0x239   :  { %2821 = vmatpush.bf16.msrb.mxu3 %v3989_v42  ;;  %v4289_v42 = vor.u32 %v4938_v33, %v4288_v32  ;;  %v4117_v10 = vor.u32 %v4892_v11, %v4114_v2  ;;  %v4482_v32 = vld [vmem:[%s7391_s7 + $0x598] sm:$0xf0]  ;;  %v3845_v2 = vor.u32 %v4824_v54, %v3842_v55  ;;  %v5011_v54 = vld [vmem:[%s7393_s9 + $0x20] sm:$0xff] }
 0x23a   :  { %2770 = vmatpush.bf16.msrb.mxu0 %v4353_v45  ;;  %v4914_v45 = vld [vmem:[%s7391_s7 + $0x354] sm:$0xf0]  ;;  %v4082_v33 = vld [vmem:[%s7391_s7 + $0x278] sm:$0xf0] }
 0x23b   :  { %2755 = vmatpush.bf16.msra.mxu1 %v4257_v19  ;;  %v4533_v19 = vor.u32 %v4996_v50, %v4530_v51  ;;  %v4085_v41 = vor.u32 %v4884_v30, %v4082_v33  ;;  %v4178_v50 = vld [vmem:[%s7391_s7 + $0x338] sm:$0xf0] }
 0x23c   :  { %2786 = vmatpush.bf16.msrb.mxu2 %v4433_v9  ;;  %v3890_v9 = vld [vmem:[%s7391_s7 + $0xf8] sm:$0xf0] }
 0x23d   :  { %2822 = vmatpush.bf16.msrb.mxu3 %v3973_v27  ;;  %v4193_v27 = vor.u32 %v4914_v45, %v4192_v44  ;;  %v4880_v44 = vld [vmem:[%s7391_s7 + $0x24c] sm:$0xf]  ;;  %v4050_v11 = vld [vmem:[%s7391_s7 + $0x238] sm:$0xf0] }
 0x23e   :  { %2771 = vmatpush.bf16.msrb.mxu0 %v4337_v57  ;;  %v4176_v57 = vld [vmem:[%s7391_s7 + $0x328] sm:$0xf]  ;;  %v4980_v45 = vld [vmem:[%s7391_s7 + $0x56c] sm:$0xf]  ;;  %v3794_v33 = vld [vmem:[%s7391_s7 + $0x38] sm:$0xf0] }
 0x23f   :  { %2756 = vmatpush.bf16.msra.mxu1 %v4241_v6  ;;  %v4160_v6 = vld [vmem:[%s7391_s7 + $0x308] sm:$0xf] }
 0x240   :  { %2787 = vmatpush.bf16.msrb.mxu2 %v4417_v24 }
 0x241   :  { %2823 = vmatpush.bf16.msrb.mxu3 %v3957_v25  ;;  %v4177_v25 = vor.u32 %v4910_v58, %v4176_v57  ;;  %v4181_v57 = vor.u32 %v4908_v49, %v4178_v50  ;;  %v4876_v58 = vld [vmem:[%s7391_s7 + $0x22c] sm:$0xf] }
 0x242   :  { %2772 = vmatpush.bf16.msrb.mxu0 %v4321_v48  ;;  %v4053_v4 = vor.u32 %v4876_v58, %v4050_v11  ;;  %v5012_v49 = vld [vmem:[%s7393_s9 + $0x28] sm:$0xff]  ;;  %v5010_v58 = vld [vmem:[%s7393_s9 + $0x18] sm:$0xff] }
 0x243   :  { %2757 = vmatpush.bf16.msra.mxu1 %v4225_v20  ;;  %2788 = vmatmul.bf16.vlgmr.msrb.gmra.mxu2 %v6644_v28  ;;  %v4161_v20 = vor.u32 %v4906_v5, %v4160_v6  ;;  %v4820_v6 = vld [vmem:[%s7391_s7 + $0x6c] sm:$0xf]  ;;  %v4322_v11 = vld [vmem:[%s7391_s7 + $0x458] sm:$0xf0] }
 0x244   :  { %2845 = vmatpush.bf16.msra.mxu2 %v4277_v31  ;;  %v4984_v31 = vld [vmem:[%s7391_s7 + $0x58c] sm:$0xf] }
 0x245   :  { %2824 = vmatpush.bf16.msrb.mxu3 %v3941_v16  ;;  %v4098_v16 = vld [vmem:[%s7391_s7 + $0x298] sm:$0xf0]  ;;  %v4485_v39 = vor.u32 %v4984_v31, %v4482_v32  ;;  %v4872_v5 = vld [vmem:[%s7391_s7 + $0x20c] sm:$0xf] }
 0x246   :  { %2773 = vmatpush.bf16.msrb.mxu0 %v4305_v21  ;;  %v7075_v48 = vpop.f32.mrf.mxu2  ;;  %v3893_v21 = vor.u32 %v4836_v8, %v3890_v9  ;;  %v4101_v24 = vor.u32 %v4888_v13, %v4098_v16  ;;  %v4034_v8 = vld [vmem:[%s7391_s7 + $0x218] sm:$0xf0]  ;;  %v4972_v9 = vld [vmem:[%s7391_s7 + $0x52c] sm:$0xf] }
 0x247   :  { %2758 = vmatpush.bf16.msra.mxu1 %v4209_v29  ;;  %v4828_v29 = vld [vmem:[%s7391_s7 + $0xac] sm:$0xf]  ;;  %v4562_v13 = vld [vmem:[%s7391_s7 + $0x638] sm:$0xf0]  ;;  %v4037_v17 = vor.u32 %v4872_v5, %v4034_v8 }
 0x248   :  { %2846 = vmatpush.bf16.msra.mxu2 %v4261_v47  ;;  %v4066_v47 = vld [vmem:[%s7391_s7 + $0x258] sm:$0xf0]  ;;  %v4812_v32 = vld [vmem:[%s7391_s7 + $0x2c] sm:$0xf] }
 0x249   :  { %2825 = vmatpush.bf16.msrb.mxu3 %v3925_v36  ;;  %v4194_v36 = vld [vmem:[%s7391_s7 + $0x358] sm:$0xf0] }
 0x24a   :  { %2774 = vmatpush.bf16.msrb.mxu0 %v4289_v42  ;;  %v4197_v42 = vor.u32 %v4912_v34, %v4194_v36  ;;  %v3797_v36 = vor.u32 %v4812_v32, %v3794_v33 }
 0x24b   :  { %2759 = vmatpush.bf16.msra.mxu1 %v4193_v27 }
 0x24c   :  { %2847 = vmatpush.bf16.msra.mxu2 %v4245_v61  ;;  %v4450_v61 = vld [vmem:[%s7391_s7 + $0x558] sm:$0xf0] }
 0x24d   :  { %2826 = vmatpush.bf16.msrb.mxu3 %v3909_v52  ;;  %2775 = vmatmul.bf16.vlgmr.msrb.gmra.mxu0 %v6570_v35  ;;  %v3861_v52 = vor.u32 %v4828_v29, %v3858_v40 }
 0x24e   :  { %2832 = vmatpush.bf16.msra.mxu0 %v4149_v46  ;;  %v2544_v37 = vpop.f32.mrf.mxu2  ;;  %v4466_v46 = vld [vmem:[%s7391_s7 + $0x578] sm:$0xf0] }
 0x24f   :  { %2760 = vmatpush.bf16.msra.mxu1 %v4177_v25  ;;  %v4469_v53 = vor.u32 %v4980_v45, %v4466_v46  ;;  %v4165_v25 = vor.u32 %v4904_v0, %v4162_v1  ;;  %v3778_v37 = vld [vmem:[%s7391_s7 + $0x18] sm:$0xf0]  ;;  %v4956_v46 = vld [vmem:[%s7391_s7 + $0x4ac] sm:$0xf]  ;;  %v5009_v0 = vld [vmem:[%s7393_s9 + $0x10] sm:$0xff] }
 0x250   :  { %2827 = vmatmul.bf16.vlgmr.msrb.gmra.mxu3 %v6410_v56  ;;  %v4832_v56 = vld [vmem:[%s7391_s7 + $0xcc] sm:$0xf]  ;;  %2848 = vmatpush.bf16.msra.mxu2 %v4229_v12  ;;  %v7299_v1 = vld [vmem:[%s7392_s8] sm:$0xf] }
 0x251   :  { %2871 = vmatpush.bf16.msra.mxu3 %v4533_v19  ;;  %v3877_v38 = vor.u32 %v4832_v56, %v3874_v23  ;;  %v4069_v19 = vor.u32 %v4880_v44, %v4066_v47  ;;  %v5004_v12 = vld [vmem:[%s7391_s7 + $0x62c] sm:$0xf]  ;;  %v4418_v56 = vld [vmem:[%s7391_s7 + $0x518] sm:$0xf0]  ;;  %v1522_v5 = vperm.slane %v7299_v1, 0 }
 0x252   :  { %2833 = vmatpush.bf16.msra.mxu0 %v4133_v60  ;;  %v7154_v51 = vpop.f32.mrf.mxu0  ;;  %v4976_v60 = vld [vmem:[%s7391_s7 + $0x54c] sm:$0xf]  ;;  %v4565_v23 = vor.u32 %v5004_v12, %v4562_v13  ;;  %v4386_v44 = vld [vmem:[%s7391_s7 + $0x4d8] sm:$0xf0]  ;;  %v5007_v12 = vld [vmem:[%s7393_s9] sm:$0xff] }
 0x253   :  { %2761 = vmatpush.bf16.msra.mxu1 %v4161_v20  ;;  %v7162_v27 = vpop.f32.mrf.mxu1  ;;  %v4453_v3 = vor.u32 %v4976_v60, %v4450_v61  ;;  %v4816_v20 = vld [vmem:[%s7391_s7 + $0x4c] sm:$0xf]  ;;  %v4370_v47 = vld [vmem:[%s7391_s7 + $0x4b8] sm:$0xf0]  ;;  %v2543_v13 = vadd.f32 %v7075_v48, %v1522_v5  ;;  %v5021_v48 = vld [vmem:[%s7393_s9 + $0x70] sm:$0xff] }
 0x254   :  { %2849 = vmatpush.bf16.msra.mxu2 %v4213_v26  ;;  %v4546_v26 = vld [vmem:[%s7391_s7 + $0x618] sm:$0xf0]  ;;  %v4373_v50 = vor.u32 %v4956_v46, %v4370_v47 }
 0x255   :  { %2872 = vmatpush.bf16.msra.mxu3 %v4517_v7  ;;  %v3826_v7 = vld [vmem:[%s7391_s7 + $0x78] sm:$0xf0] }
 0x256   :  { %2834 = vmatpush.bf16.msra.mxu0 %v4117_v10  ;;  %2762 = vmatmul.bf16.vlgmr.msra.gmra.mxu1 %v6510_v62  ;;  %v4434_v10 = vld [vmem:[%s7391_s7 + $0x538] sm:$0xf0]  ;;  %v3829_v15 = vor.u32 %v4820_v6, %v3826_v7  ;;  %v5008_v6 = vld [vmem:[%s7393_s9 + $0x8] sm:$0xff] }
 0x257   :  { %2806 = vmatpush.bf16.msrb.mxu1 %v3893_v21  ;;  %v4437_v18 = vor.u32 %v4972_v9, %v4434_v10  ;;  %v3810_v21 = vld [vmem:[%s7391_s7 + $0x58] sm:$0xf0]  ;;  %v4936_v9 = vld [vmem:[%s7391_s7 + $0x40c] sm:$0xf] }
 0x258   :  { %2850 = vmatpush.bf16.msra.mxu2 %v4197_v42  ;;  %v3813_v30 = vor.u32 %v4816_v20, %v3810_v21  ;;  %v4960_v42 = vld [vmem:[%s7391_s7 + $0x4cc] sm:$0xf]  ;;  %v4290_v10 = vld [vmem:[%s7391_s7 + $0x418] sm:$0xf0] }
 0x259   :  { %2873 = vmatpush.bf16.msra.mxu3 %v4501_v22  ;;  %v4968_v22 = vld [vmem:[%s7391_s7 + $0x50c] sm:$0xf]  ;;  %v5022_v20 = vld [vmem:[%s7393_s9 + $0x78] sm:$0xff] }
 0x25a   :  { %2835 = vmatpush.bf16.msra.mxu0 %v4101_v24  ;;  %v2557_v14 = vpop.f32.mrf.mxu0  ;;  %v5000_v24 = vld [vmem:[%s7391_s7 + $0x60c] sm:$0xf]  ;;  %v4421_v31 = vor.u32 %v4968_v22, %v4418_v56 }
 0x25b   :  { %2807 = vmatpush.bf16.msrb.mxu1 %v3877_v38  ;;  %v2570_v16 = vpop.f32.mrf.mxu1  ;;  %v4549_v34 = vor.u32 %v5000_v24, %v4546_v26  ;;  %v4964_v38 = vld [vmem:[%s7391_s7 + $0x4ec] sm:$0xf] }
 0x25c   :  { %2851 = vmatpush.bf16.msra.mxu2 %v4181_v57  ;;  %v4338_v57 = vld [vmem:[%s7391_s7 + $0x478] sm:$0xf0]  ;;  %v5020_v26 = vld [vmem:[%s7393_s9 + $0x68] sm:$0xff] }
 0x25d   :  { %2874 = vmatpush.bf16.msra.mxu3 %v4485_v39  ;;  %v4402_v39 = vld [vmem:[%s7391_s7 + $0x4f8] sm:$0xf0] }
 0x25e   :  { %2836 = vmatpush.bf16.msra.mxu0 %v4085_v41  ;;  %v4405_v40 = vor.u32 %v4964_v38, %v4402_v39  ;;  %v5013_v41 = vld [vmem:[%s7393_s9 + $0x30] sm:$0xff] }
 0x25f   :  { %2808 = vmatpush.bf16.msrb.mxu1 %v3861_v52  ;;  %v4952_v52 = vld [vmem:[%s7391_s7 + $0x48c] sm:$0xf]  ;;  %v5017_v39 = vld [vmem:[%s7393_s9 + $0x50] sm:$0xff] }
 0x260   :  { %2852 = vmatpush.bf16.msra.mxu2 %v4165_v25  ;;  %v4306_v25 = vld [vmem:[%s7391_s7 + $0x438] sm:$0xf0] }
 0x261   :  { %2875 = vmatpush.bf16.msra.mxu3 %v4469_v53  ;;  %v4354_v53 = vld [vmem:[%s7391_s7 + $0x498] sm:$0xf0] }
 0x262   :  { %2837 = vmatpush.bf16.msra.mxu0 %v4069_v19  ;;  %v4357_v55 = vor.u32 %v4952_v52, %v4354_v53  ;;  %v4948_v19 = vld [vmem:[%s7391_s7 + $0x46c] sm:$0xf]  ;;  %v5030_v53 = vld [vmem:[%s7393_s9 + $0xb8] sm:$0xff] }
 0x263   :  { %2809 = vmatpush.bf16.msrb.mxu1 %v3845_v2  ;;  %2853 = vmatmul.bf16.vlgmr.msra.gmra.mxu2 %v6510_v62  ;;  %v4808_v62 = vld [vmem:[%s7391_s7 + $0xc] sm:$0xf]  ;;  %v4341_v61 = vor.u32 %v4948_v19, %v4338_v57  ;;  %v5029_v57 = vld [vmem:[%s7393_s9 + $0xb0] sm:$0xff] }
 0x264   :  { %v3781_v29 = vor.u32 %v4808_v62, %v3778_v37  ;;  %v5018_v37 = vld [vmem:[%s7393_s9 + $0x58] sm:$0xff] }
 0x265   :  { %2876 = vmatpush.bf16.msra.mxu3 %v4453_v3 }
 0x266   :  { %2838 = vmatpush.bf16.msra.mxu0 %v4053_v4  ;;  %v4940_v4 = vld [vmem:[%s7391_s7 + $0x42c] sm:$0xf] }
 0x267   :  { %2810 = vmatpush.bf16.msrb.mxu1 %v3829_v15  ;;  %v4309_v8 = vor.u32 %v4940_v4, %v4306_v25  ;;  %v4293_v15 = vor.u32 %v4936_v9, %v4290_v10  ;;  %v5027_v4 = vld [vmem:[%s7393_s9 + $0xa0] sm:$0xff]  ;;  %v5025_v10 = vld [vmem:[%s7393_s9 + $0x90] sm:$0xff] }
 0x269   :  { %2877 = vmatpush.bf16.msra.mxu3 %v4437_v18 }
 0x26a   :  { %2839 = vmatpush.bf16.msra.mxu0 %v4037_v17  ;;  %v2556_v17 = vadd.f32 %v7154_v51, %v2543_v13 }
 0x26b   :  { %2811 = vmatpush.bf16.msrb.mxu1 %v3813_v30  ;;  %v2581_v45 = vpop.f32.mrf.mxu3 }
 0x26c   :  { %v2569_v21 = vadd.f32 %v7162_v27, %v2556_v17 }
 0x26d   :  { %2840 = vmatmul.bf16.vlgmr.msra.gmra.mxu0 %v6422_v63  ;;  %2878 = vmatpush.bf16.msra.mxu3 %v4421_v31  ;;  %v5014_v63 = vld [vmem:[%s7393_s9 + $0x38] sm:$0xff] }
 0x26e   :  { %2890 = vmatpush.bf16.msrb.mxu0 %v4565_v23  ;;  %3133 = vmatpush.bf16.msrb.mxu2 %v5014_v63  ;;  %v2582_v22 = vadd.f32 %v2581_v45, %v2569_v21 }
 0x26f   :  { %2812 = vmatpush.bf16.msrb.mxu1 %v3797_v36 }
 0x270   :  { %2879 = vmatmul.bf16.vlgmr.msra.gmra.mxu3 %v6644_v28  ;;  %v4389_v28 = vor.u32 %v4960_v42, %v4386_v44  ;;  %v5016_v44 = vld [vmem:[%s7393_s9 + $0x48] sm:$0xff] }
 0x272   :  { %2891 = vmatpush.bf16.msrb.mxu0 %v4549_v34  ;;  %3134 = vmatpush.bf16.msrb.mxu2 %v5013_v41 }
 0x273   :  { %2813 = vmatpush.bf16.msrb.mxu1 %v3781_v29 }
 0x276   :  { %2814 = vmatmul.bf16.vlgmr.msrb.gmra.mxu1 %v6333_v59  ;;  %3135 = vmatpush.bf16.msrb.mxu2 %v5012_v49  ;;  %v2583_v59 = vpop.f32.mrf.mxu3  ;;  %v2594_v60 = vpop.f32.mrf.mxu2  ;;  %v5015_v49 = vld [vmem:[%s7393_s9 + $0x40] sm:$0xff] }
 0x277   :  { %2858 = vmatpush.bf16.msra.mxu1 %v4405_v40  ;;  %3146 = vmatpush.bf16.msra.mxu0 %v5022_v20  ;;  %v2595_v51 = vadd.f32 %v2594_v60, %v2582_v22  ;;  %v1523_v40 = vperm.slane %v7299_v1, 1  ;;  %v5023_v20 = vld [vmem:[%s7393_s9 + $0x80] sm:$0xff] }
 0x27a   :  { %3136 = vmatpush.bf16.msrb.mxu2 %v5011_v54 }
 0x27b   :  { %2859 = vmatpush.bf16.msra.mxu1 %v4389_v28  ;;  %3147 = vmatpush.bf16.msra.mxu0 %v5021_v48 }
 0x27d   :  { %4569 = vmatmul.msk.bf16.vlgmr.msrb.gmra.mxu0 %vm123_vm3, %v6705_v43  ;;  %v4944_v43 = vld [vmem:[%s7391_s7 + $0x44c] sm:$0xf] }
 0x27e   :  { %3137 = vmatpush.bf16.msrb.mxu2 %v5010_v58  ;;  %v2633_v2 = vpop.f32.mrf.mxu3  ;;  %v4325_v3 = vor.u32 %v4944_v43, %v4322_v11  ;;  %v2596_v7 = vpop.f32.mrf.mxu2 }
 0x27f   :  { %2860 = vmatpush.bf16.msra.mxu1 %v4373_v50  ;;  %3148 = vmatpush.bf16.msra.mxu0 %v5020_v26  ;;  %v2634_v46 = vadd.f32 %v2633_v2, %v1523_v40  ;;  %v5026_v7 = vld [vmem:[%s7393_s9 + $0x98] sm:$0xff] }
 0x282   :  { %3138 = vmatpush.bf16.msrb.mxu2 %v5009_v0 }
 0x283   :  { %2861 = vmatpush.bf16.msra.mxu1 %v4357_v55 }
 0x286   :  { %3139 = vmatpush.bf16.msrb.mxu2 %v5008_v6  ;;  %v2635_v14 = vpop.f32.mrf.mxu3  ;;  %v2659_v18 = vpop.f32.mrf.mxu2 }
 0x287   :  { %2862 = vmatpush.bf16.msra.mxu1 %v4341_v61  ;;  %v5028_v61 = vld [vmem:[%s7393_s9 + $0xa8] sm:$0xff]  ;;  %v1524_v14 = vperm.slane %v7299_v1, 2 }
 0x28a   :  { %3140 = vmatpush.bf16.msrb.mxu2 %v5007_v12  ;;  %v2607_v16 = vpop.f32.mrf.mxu0  ;;  %v5024_v12 = vld [vmem:[%s7393_s9 + $0x88] sm:$0xff] }
 0x28b   :  { %2863 = vmatpush.bf16.msra.mxu1 %v4325_v3  ;;  %v2608_v30 = vadd.f32 %v2607_v16, %v2595_v51 }
 0x28e   :  { %v2685_v23 = vpop.f32.mrf.mxu3  ;;  %v2661_v24 = vpop.f32.mrf.mxu2 }
 0x28f   :  { %2864 = vmatpush.bf16.msra.mxu1 %v4309_v8 }
 0x292   :  { %v2609_v56 = vpop.f32.mrf.mxu0 }
 0x293   :  { %2865 = vmatpush.bf16.msra.mxu1 %v4293_v15  ;;  %v2620_v31 = vpop.f32.mrf.mxu1 }
 0x294   :  { %v2621_v27 = vadd.f32 %v2620_v31, %v2608_v30 }
 0x296   :  { %2866 = vmatmul.bf16.vlgmr.msra.gmra.mxu1 %v6570_v35  ;;  %v5019_v35 = vld [vmem:[%s7393_s9 + $0x60] sm:$0xff]  ;;  %v2901_v32 = vmin.f32 %v2621_v27, 0.0  ;;  %v2687_v34 = vpop.f32.mrf.mxu3  ;;  %vm2897_vm14 = vcmp.gt.f32.partialorder %v2621_v27, 0.0 }
 0x297   :  { %3149 = vmatpush.bf16.msra.mxu0 %v5019_v35  ;;  %3159 = vmatpush.bf16.msrb.mxu1 %v5030_v53  ;;  %v5031_v53 = vld [vmem:[%s7393_s9 + $0xc0] sm:$0xff] }
 0x298   :  { %v2905_v36 = vmul.f32 1.442695, %v2901_v32  ;;  %3179 = vmatpush.bf16.msrb.mxu3 %v5031_v53 }
 0x29a   :  { %v2672_v33 = vpop.f32.mrf.mxu0  ;;  %v2711_v62 = vpop.f32.mrf.mxu2  ;;  %5057 = vpow2.f32 %v2905_v36 }
 0x29b   :  { %v2622_v38 = vpop.f32.mrf.mxu1  ;;  %3150 = vmatpush.bf16.msra.mxu0 %v5018_v37  ;;  %3160 = vmatpush.bf16.msrb.mxu1 %v5029_v57 }
 0x29f   :  { %3151 = vmatpush.bf16.msra.mxu0 %v5017_v39  ;;  %3161 = vmatpush.bf16.msrb.mxu1 %v5028_v61 }
 0x2a0   :  { %v5058_v29 = vpop.eup %5057 }
 0x2a1   :  { %v4570_v41 = vadd.f32 -1.0, %v5058_v29 }
 0x2a2   :  { %v2674_v63 = vpop.f32.mrf.mxu0  ;;  %v2713_v42 = vpop.f32.mrf.mxu2 }
 0x2a3   :  { %v2917_v45 = vsel %vm2897_vm14, %v2621_v27, %v4570_v41  ;;  %v2646_v28 = vpop.f32.mrf.mxu1  ;;  %3152 = vmatpush.bf16.msra.mxu0 %v5016_v44  ;;  %3162 = vmatpush.bf16.msrb.mxu1 %v5027_v4 }
 0x2a4   :  { %v2921_v47 = vpack.c.bf16 %v2917_v45, %v2917_v45  ;;  %v2647_v50 = vadd.f32 %v2646_v28, %v2634_v46 }
 0x2a6   :  { %3141 = vmatmul.bf16.vlgmr.msrb.gmra.mxu2 %v2921_v47  ;;  %v2660_v54 = vadd.f32 %v2659_v18, %v2647_v50 }
 0x2a7   :  { %3153 = vmatpush.bf16.msra.mxu0 %v5015_v49  ;;  %3163 = vmatpush.bf16.msrb.mxu1 %v5026_v7  ;;  %v1525_v49 = vperm.slane %v7299_v1, 3 }
 0x2a8   :  { %v2673_v58 = vadd.f32 %v2672_v33, %v2660_v54 }
 0x2aa   :  { %v2724_v52 = vpop.f32.mrf.mxu0  ;;  %v2737_v59 = vpop.f32.mrf.mxu2  ;;  %v2686_v43 = vadd.f32 %v2685_v23, %v2673_v58 }
 0x2ab   :  { %v2648_v55 = vpop.f32.mrf.mxu1  ;;  %v2750_v19 = vpop.f32.mrf.mxu3  ;;  %3164 = vmatpush.bf16.msrb.mxu1 %v5025_v10  ;;  %v2725_v48 = vadd.f32 %v2724_v52, %v1524_v14 }
 0x2ad   :  { %v2738_v56 = vadd.f32 %v2737_v59, %v2725_v48 }
 0x2af   :  { %3165 = vmatpush.bf16.msrb.mxu1 %v5024_v12  ;;  %v2751_v24 = vadd.f32 %v2750_v19, %v2738_v56 }
 0x2b2   :  { %v2726_v60 = vpop.f32.mrf.mxu0  ;;  %v2739_v11 = vpop.f32.mrf.mxu2 }
 0x2b3   :  { %v2698_v0 = vpop.f32.mrf.mxu1  ;;  %v2752_v3 = vpop.f32.mrf.mxu3  ;;  %3166 = vmatpush.bf16.msrb.mxu1 %v5023_v20 }
 0x2b4   :  { %v2699_v2 = vadd.f32 %v2698_v0, %v2686_v43 }
 0x2b6   :  { %v2712_v25 = vadd.f32 %v2711_v62, %v2699_v2 }
 0x2b8   :  { %v2902_v6 = vmin.f32 %v2712_v25, 0.0  ;;  %vm2898_vm15 = vcmp.gt.f32.partialorder %v2712_v25, 0.0 }
 0x2ba   :  { %v2907_v5 = vmul.f32 1.442695, %v2902_v6  ;;  %v5034_v6 = vld [vmem:[%s7394_s10] ss:$0 sm:$0xff]  ;;  %s5095_s10 = smov [#allocation2]  }
 0x2bb   :  { %v2700_v8 = vpop.f32.mrf.mxu1  ;;  %v2802_v9 = vpop.f32.mrf.mxu3  ;;  %s3205_s12 = sshll.u32 %s5095_s10, 4  ;;  %s3206_s12 = int_to_ptr.vmem [resolvable:$true] %s3205_s12 }
 0x2bc   :  { %5059 = vpow2.f32 %v2907_v5 }
 0x2c2   :  { %v5060_v13 = vpop.eup %5059 }
 0x2c3   :  { %v4571_v15 = vadd.f32 -1.0, %v5060_v13  ;;  %v2804_v16 = vpop.f32.mrf.mxu3 }
 0x2c5   :  { %v2918_v17 = vsel %vm2898_vm15, %v2712_v25, %v4571_v15 }
 0x2c6   :  { %v2922_v21 = vpack.c.bf16 %v2918_v17, %v2918_v17  ;;  %v2789_v22 = vpop.f32.mrf.mxu2 }
 0x2c8   :  { %3154 = vmatmul.bf16.vlgmr.msra.gmra.mxu0 %v2922_v21 }
 0x2ca   :  { %v2776_v18 = vpop.f32.mrf.mxu0 }
 0x2ce   :  { %v2791_v26 = vpop.f32.mrf.mxu2 }
 0x2d2   :  { %v2778_v23 = vpop.f32.mrf.mxu0 }
 0x2d3   :  { %v2828_v51 = vpop.f32.mrf.mxu3  ;;  %v2763_v30 = vpop.f32.mrf.mxu1 }
 0x2d4   :  { %v2764_v31 = vadd.f32 %v2763_v30, %v2751_v24 }
 0x2d6   :  { %v2777_v27 = vadd.f32 %v2776_v18, %v2764_v31 }
 0x2d8   :  { %v2790_v35 = vadd.f32 %v2789_v22, %v2777_v27  ;;  %v3185_v22 = vlaneseq }
 0x2da   :  { %v2803_v33 = vadd.f32 %v2802_v9, %v2790_v35  ;;  %v3186_v56 = vand.u32 127, %v3185_v22 }
 0x2db   :  { %v2830_v32 = vpop.f32.mrf.mxu3  ;;  %v2765_v34 = vpop.f32.mrf.mxu1 }
 0x2dc   :  { %v2903_v36 = vmin.f32 %v2803_v33, 0.0  ;;  %vm2899_vm0 = vcmp.gt.f32.partialorder %v2803_v33, 0.0  ;;  %vm3187_vm3 = vcmp.lt.s32.totalorder %v3186_v56, 25 }
 0x2de   :  { %v2909_v62 = vmul.f32 1.442695, %v2903_v36 }
 0x2e0   :  { %5061 = vpow2.f32 %v2909_v62 }
 0x2e6   :  { %v5062_v38 = vpop.eup %5061  ;;  %v2854_v63 = vpop.f32.mrf.mxu2 }
 0x2e7   :  { %v4572_v39 = vadd.f32 -1.0, %v5062_v38 }
 0x2e9   :  { %v2919_v29 = vsel %vm2899_vm0, %v2803_v33, %v4572_v39 }
 0x2ea   :  { %v2841_v37 = vpop.f32.mrf.mxu0  ;;  %v2923_v40 = vpack.c.bf16 %v2919_v29, %v2919_v29 }
 0x2ec   :  { %3167 = vmatmul.bf16.vlgmr.msrb.gmra.mxu1 %v2923_v40 }
 0x2ee   :  { %v2856_v42 = vpop.f32.mrf.mxu2 }
 0x2f2   :  { %v2843_v41 = vpop.f32.mrf.mxu0 }
 0x2f3   :  { %v2880_v44 = vpop.f32.mrf.mxu3  ;;  %v2815_v45 = vpop.f32.mrf.mxu1 }
 0x2f4   :  { %v2816_v52 = vadd.f32 %v2815_v45, %v1525_v49 }
 0x2f6   :  { %v2829_v54 = vadd.f32 %v2828_v51, %v2816_v52 }
 0x2f8   :  { %v2842_v59 = vadd.f32 %v2841_v37, %v2829_v54 }
 0x2fa   :  { %v2893_v28 = vpop.f32.mrf.mxu0  ;;  %v2855_v55 = vadd.f32 %v2854_v63, %v2842_v59 }
 0x2fb   :  { %v2882_v46 = vpop.f32.mrf.mxu3  ;;  %v2817_v47 = vpop.f32.mrf.mxu1 }
 0x302   :  { %v2895_v50 = vpop.f32.mrf.mxu0 }
 0x313   :  { %v2867_v19 = vpop.f32.mrf.mxu1 }
 0x314   :  { %v2868_v57 = vadd.f32 %v2867_v19, %v2855_v55 }
 0x316   :  { %v2881_v58 = vadd.f32 %v2880_v44, %v2868_v57 }
 0x318   :  { %v2894_v60 = vadd.f32 %v2893_v28, %v2881_v58 }
 0x31a   :  { %v2904_v61 = vmin.f32 %v2894_v60, 0.0  ;;  %vm2900_vm1 = vcmp.gt.f32.partialorder %v2894_v60, 0.0 }
 0x31b   :  { %v2869_v43 = vpop.f32.mrf.mxu1 }
 0x31c   :  { %v2911_v11 = vmul.f32 1.442695, %v2904_v61 }
 0x31e   :  { %5063 = vpow2.f32 %v2911_v11 }
 0x324   :  { %v5064_v0 = vpop.eup %5063 }
 0x325   :  { %v4573_v1 = vadd.f32 -1.0, %v5064_v0 }
 0x327   :  { %v2920_v2 = vsel %vm2900_vm1, %v2894_v60, %v4573_v1 }
 0x328   :  { %v2924_v3 = vpack.c.bf16 %v2920_v2, %v2920_v2 }
 0x329   :  { %v3142_v4 = vpop.f32.mrf.mxu2 }
 0x32a   :  { %4674 = vmatmul.msk.bf16.vlgmr.msrb.gmra.mxu3 %vm3129_vm2, %v2924_v3  ;;  %v3143_v7 = vadd.f32 %v5034_v6, %v3142_v4 }
 0x331   :  { %v3144_v25 = vpop.f32.mrf.mxu2 }
 0x345   :  { %v3155_v5 = vpop.f32.mrf.mxu0 }
 0x346   :  { %v3156_v8 = vadd.f32 %v3155_v5, %v3143_v7 }
 0x34d   :  { %v3157_v9 = vpop.f32.mrf.mxu0 }
 0x369   :  { %v3168_v10 = vpop.f32.mrf.mxu1 }
 0x36a   :  { %v3169_v13 = vadd.f32 %v3168_v10, %v3156_v8 }
 0x371   :  { %v3170_v12 = vpop.f32.mrf.mxu1 }
 0x3ad   :  { %v3181_v14 = vpop.f32.mrf.mxu3 }
 0x3ae   :  { %v3182_v15 = vadd.f32 %v3181_v14, %v3169_v13 }
 0x3b0   :  { %v3189_v16 = vand.u32 2147483647, %v3182_v15  ;;  %v3188_v51 = vmax.f32 %v3182_v15, 0.0 }
 0x3b2   :  { %v3190_v17 = vsub.f32 0.0, %v3189_v16 }
 0x3b4   :  { %v3191_v18 = vmul.f32 1.442695, %v3190_v17 }
 0x3b5   :  { %v3183_v20 = vpop.f32.mrf.mxu3 }
 0x3b6   :  { %5065 = vpow2.f32 %v3191_v18 }
 0x3bc   :  { %v5066_v21 = vpop.eup %5065 }
 0x3bd   :  { %v3193_v48 = vadd.f32 1.0, %v5066_v21 }
 0x3bf   :  { %5067 = vlog2.f32 %v3193_v48 }
 0x3c5   :  { %v5068_v23 = vpop.eup %5067 }
 0x3c6   :  { %v3195_v24 = vmul.f32 0.6931472, %v5068_v23 }
 0x3c8   :  { %v3196_v26 = vadd.f32 %v3195_v24, %v3188_v51 }
 0x3ca   :  { %v3197_v30 = vsel %vm3187_vm3, %v3182_v15, %v3196_v26 }
 0x3cb   :  { %3199 = vst.msk [vmem:[#allocation2] sm:$0xff] %vm3198_vm4, %v3197_v30 }
 0x3cc   :  { %3210 = dma.vmem_to_hbm [thread:$0]  %s3206_s12, 128, %s3208_s15, [#allocation3]  }
 0x3cd   :  { %5093 = dma.done.wait [#allocation3], 128  }
 0x3ce   :  { %5094 = vsyncadd [#allocation3], 4294967168 }
 0x3cf   :  { %3215 = vsyncpa [#allocation3], 1 }

</bundles_post_ra>
